<compile_context>
chip_gen: v6e
topology: v6e:2x2x1
jax: 0.10.0
libtpu: 0.0.40
codegen_flags: <defaults>
</compile_context>

<pallas_src>
import math
from functools import partial

import jax
import jax.numpy as jnp
from jax.experimental import pallas as pl
from jax.experimental.pallas import tpu as pltpu


def _decoder_layer_kernel(
    x_ref, enc_ref, tgt_mask_ref, src_mask_ref,
    wqkv1, bqkv1, wo1, bo1,
    wq2, bq2, wkv2, bkv2, wo2, bo2,
    wf1, bf1, wf2, bf2,
    g1, be1, g2, be2, g3, be3,
    out_ref,
    *, num_heads, d_k, mm_dtype, approx_recip,
):
    f32 = jnp.float32
    d_model = num_heads * d_k
    scale = 1.0 / math.sqrt(d_k)

    def linear(x2d, w_ref, b_ref):
        # One lane-dense 2-D MXU matmul: (T, D) @ (D, E) -> (T, E) f32.
        return jnp.dot(x2d.astype(mm_dtype), w_ref[...],
                       preferred_element_type=f32) + b_ref[...]

    def split_heads(y2d, col_off):
        # (T, cols) -> (H, T, d_k): static lane slices stacked along a new leading
        # head axis.  No activation replication, no per-head projection matmuls.
        return jnp.stack(
            [y2d[:, col_off + h * d_k: col_off + (h + 1) * d_k]
             for h in range(num_heads)],
            axis=0)

    def attention(q3, k3, v3, bias2d, wo_ref, bo_ref):
        # q3: (H, Sq, dk); k3/v3: (H, Sk, dk); bias2d: (Sq, Sk) additive {0, -1e9}.
        s = jnp.einsum("hqd,hkd->hqk",
                       (q3 * scale).astype(mm_dtype), k3.astype(mm_dtype),
                       preferred_element_type=f32)
        s = s + bias2d[None, :, :]                     # one vadd; no compare+select
        s = s - jnp.max(s, axis=-1, keepdims=True)     # f32 softmax
        p = jnp.exp(s)                                 # EUP
        denom = jnp.sum(p, axis=-1, keepdims=True)     # (H, Sq, 1)
        ctx = jnp.einsum("hqk,hkd->hqd",
                         p.astype(mm_dtype), v3.astype(mm_dtype),
                         preferred_element_type=f32)
        # Normalize AFTER the PV matmul: scales (H,Sq,dk) elements, not (H,Sq,Sk).
        ctx = ctx * pl.reciprocal(denom, approx=approx_recip)
        # Combine heads in-lane, then ONE output matmul with K = H*dk: the head
        # reduction happens inside the MXU contraction (no (H,S,D) intermediate).
        combined = jnp.concatenate([ctx[h] for h in range(num_heads)], axis=-1)
        return jnp.dot(combined.astype(mm_dtype), wo_ref[...],
                       preferred_element_type=f32) + bo_ref[...]

    def layernorm(h, g_ref, b_ref):                    # f32 on the VPU
        mean = jnp.mean(h, axis=-1, keepdims=True)
        c = h - mean
        var = jnp.mean(c * c, axis=-1, keepdims=True)
        return c * jax.lax.rsqrt(var + 1e-5) * g_ref[...] + b_ref[...]

    x = x_ref[0]                                       # (S, D) f32
    enc = enc_ref[0]                                   # (S_enc, D) f32
    # {0,1} keep masks -> additive biases, computed once per attention.
    tgt_bias = (tgt_mask_ref[0].astype(f32) - 1.0) * 1e9
    src_bias = (src_mask_ref[0].astype(f32) - 1.0) * 1e9

    # --- self-attention: one fused (D, 3D) projection matmul ---
    qkv = linear(x, wqkv1, bqkv1)                      # (S, 3D)
    a1 = attention(split_heads(qkv, 0),
                   split_heads(qkv, d_model),
                   split_heads(qkv, 2 * d_model),
                   tgt_bias, wo1, bo1)
    x = layernorm(x + a1, g1, be1)

    # --- cross-attention: Q (D,D) + fused KV (D,2D) projections ---
    q2d = linear(x, wq2, bq2)                          # (S, D)
    kv = linear(enc, wkv2, bkv2)                       # (S_enc, 2D)
    a2 = attention(split_heads(q2d, 0),
                   split_heads(kv, 0),
                   split_heads(kv, d_model),
                   src_bias, wo2, bo2)
    x = layernorm(x + a2, g2, be2)

    # --- position-wise feed forward + residual + LN ---
    h = jnp.maximum(linear(x, wf1, bf1), 0.0)
    x = layernorm(x + linear(h, wf2, bf2), g3, be3)

    out_ref[0] = x.astype(out_ref.dtype)


def _pack_params(params, *, mm_dtype):
    """Pack PyTorch-layout (in, out) params into fused 2-D operands (wrapper-side)."""
    f32 = jnp.float32
    wqkv1 = jnp.concatenate(
        [params["wq1"], params["wk1"], params["wv1"]], axis=1).astype(mm_dtype)  # (D,3D)
    bqkv1 = jnp.concatenate(
        [params["bq1"], params["bk1"], params["bv1"]], axis=1).astype(f32)       # (1,3D)
    wo1 = params["wo1"].astype(mm_dtype)                                         # (D,D)
    bo1 = params["bo1"].astype(f32)

    wq2 = params["wq2"].astype(mm_dtype)
    bq2 = params["bq2"].astype(f32)
    wkv2 = jnp.concatenate([params["wk2"], params["wv2"]], axis=1).astype(mm_dtype)
    bkv2 = jnp.concatenate([params["bk2"], params["bv2"]], axis=1).astype(f32)
    wo2 = params["wo2"].astype(mm_dtype)
    bo2 = params["bo2"].astype(f32)

    wf1 = params["wf1"].astype(mm_dtype)
    bf1 = params["bf1"].astype(f32)
    wf2 = params["wf2"].astype(mm_dtype)
    bf2 = params["bf2"].astype(f32)

    lns = [params[k].astype(f32) for k in ("g1", "be1", "g2", "be2", "g3", "be3")]

    return [wqkv1, bqkv1, wo1, bo1,
            wq2, bq2, wkv2, bkv2, wo2, bo2,
            wf1, bf1, wf2, bf2, *lns]


def decoder_layer(x, enc_output, tgt_mask, src_mask, params, *, num_heads,
                  matmul_dtype=jnp.bfloat16, approx_softmax_recip=True,
                  single_buffer_params=True):
    B, S, D = x.shape
    _, S_enc, _ = enc_output.shape
    d_k = D // num_heads
    d_ff = params["wf1"].shape[1]

    packed = _pack_params(params, mm_dtype=matmul_dtype)

    # Masks only carry {0,1}: bf16 is exact and halves mask HBM traffic.
    tgt_m = tgt_mask.astype(jnp.bfloat16)
    src_m = src_mask.astype(jnp.bfloat16)

    if single_buffer_params and not hasattr(pl, "Buffered"):
        single_buffer_params = False

    def param_spec(arr):
        nd = arr.ndim
        index_map = lambda b, _nd=nd: (0,) * _nd        # constant across the grid
        if single_buffer_params:
            # Parameters never change across grid steps -> one VMEM buffer suffices.
            return pl.BlockSpec(arr.shape, index_map, pipeline_mode=pl.Buffered(1))
        return pl.BlockSpec(arr.shape, index_map)

    in_specs = [
        pl.BlockSpec((1, S, D), lambda b: (b, 0, 0)),          # x
        pl.BlockSpec((1, S_enc, D), lambda b: (b, 0, 0)),      # enc_output
        pl.BlockSpec((1, S, S), lambda b: (b, 0, 0)),          # tgt_mask (bf16 {0,1})
        pl.BlockSpec((1, S, S_enc), lambda b: (b, 0, 0)),      # src_mask (bf16 {0,1})
    ] + [param_spec(a) for a in packed]
    out_spec = pl.BlockSpec((1, S, D), lambda b: (b, 0, 0))

    kernel = partial(_decoder_layer_kernel, num_heads=num_heads, d_k=d_k,
                     mm_dtype=matmul_dtype, approx_recip=approx_softmax_recip)

    # Advisory cost estimate so XLA schedules the custom call sensibly.
    macs_per_batch = (
        S * D * (3 * D)            # fused self-attn QKV projection
        + 2 * S * S * D            # self-attn scores + attn@V (all heads)
        + S * D * D                # self-attn output projection
        + S * D * D                # cross-attn Q projection
        + S_enc * D * (2 * D)      # fused cross-attn KV projection
        + 2 * S * S_enc * D        # cross-attn scores + attn@V
        + S * D * D                # cross-attn output projection
        + 2 * S * D * d_ff         # FFN
    )
    transcendentals = B * (num_heads * (S * S + S * S_enc)    # exp
                           + 2 * num_heads * S                # softmax reciprocals
                           + 3 * S)                           # LayerNorm rsqrt
    bytes_accessed = (sum(int(a.size) * a.dtype.itemsize
                          for a in (x, enc_output, tgt_m, src_m, *packed))
                      + B * S * D * 4)
    cost = pl.CostEstimate(flops=int(2 * B * macs_per_batch),
                           transcendentals=int(transcendentals),
                           bytes_accessed=int(bytes_accessed))

    return pl.pallas_call(
        kernel,
        out_shape=jax.ShapeDtypeStruct((B, S, D), jnp.float32),
        grid_spec=pltpu.PrefetchScalarGridSpec(
            num_scalar_prefetch=0,
            grid=(B,),                                 # B=2 -> both v7x TensorCores
            in_specs=in_specs,
            out_specs=out_spec,
        ),
        compiler_params=pltpu.CompilerParams(
            dimension_semantics=("parallel",),
            vmem_limit_bytes=32 * 1024 * 1024,         # explicit (v7x: 64 MiB physical)
        ),
        cost_estimate=cost,
    )(x, enc_output, tgt_m, src_m, *packed)


# ---------------- pure-JAX reference (for correctness check) ----------------
def _ref_decoder_layer(x, enc, tgt_mask, src_mask, p, num_heads):
    def linear(h, w, b):
        return h @ w + b

    def ln(h, g, b):
        m = h.mean(-1, keepdims=True)
        v = ((h - m) ** 2).mean(-1, keepdims=True)
        return (h - m) / jnp.sqrt(v + 1e-5) * g + b

    def mha(xq, xkv, mask, wq, bq, wk, bk, wv, bv, wo, bo):
        B, Sq, D = xq.shape
        Sk = xkv.shape[1]
        dk = D // num_heads
        q = linear(xq, wq, bq).reshape(B, Sq, num_heads, dk).transpose(0, 2, 1, 3)
        k = linear(xkv, wk, bk).reshape(B, Sk, num_heads, dk).transpose(0, 2, 1, 3)
        v = linear(xkv, wv, bv).reshape(B, Sk, num_heads, dk).transpose(0, 2, 1, 3)
        s = jnp.einsum("bhqd,bhkd->bhqk", q, k) / math.sqrt(dk)
        s = jnp.where(mask[:, None, :, :] == 0.0, -1e9, s)
        pr = jax.nn.softmax(s, axis=-1)
        o = jnp.einsum("bhqk,bhkd->bhqd", pr, v).transpose(0, 2, 1, 3).reshape(B, Sq, D)
        return linear(o, wo, bo)

    a1 = mha(x, x, tgt_mask, p["wq1"], p["bq1"], p["wk1"], p["bk1"],
             p["wv1"], p["bv1"], p["wo1"], p["bo1"])
    x = ln(x + a1, p["g1"], p["be1"])
    a2 = mha(x, enc, src_mask, p["wq2"], p["bq2"], p["wk2"], p["bk2"],
             p["wv2"], p["bv2"], p["wo2"], p["bo2"])
    x = ln(x + a2, p["g2"], p["be2"])
    ff = linear(jnp.maximum(linear(x, p["wf1"], p["bf1"]), 0.0), p["wf2"], p["bf2"])
    return ln(x + ff, p["g3"], p["be3"])


if __name__ == "__main__":
    B, S, S_ENC = 2, 8, 8
    D_MODEL, NUM_HEADS, D_FF = 32, 4, 64

    key = jax.random.PRNGKey(0)
    keys = iter(jax.random.split(key, 64))

    def w(shape, scale=0.1):
        return (scale * jax.random.normal(next(keys), shape)).astype(jnp.float32)

    params = {}
    # two attention blocks (self, cross): W_q, W_k, W_v, W_o (stored as W.T) + biases
    for tag in ("1", "2"):
        for name in ("q", "k", "v", "o"):
            params[f"w{name}{tag}"] = w((D_MODEL, D_MODEL))
            params[f"b{name}{tag}"] = w((1, D_MODEL))
    # feed forward
    params["wf1"] = w((D_MODEL, D_FF))
    params["bf1"] = w((1, D_FF))
    params["wf2"] = w((D_FF, D_MODEL))
    params["bf2"] = w((1, D_MODEL))
    # layer norms (PyTorch default init: weight=1, bias=0)
    for i in ("1", "2", "3"):
        params[f"g{i}"] = jnp.ones((1, D_MODEL), jnp.float32)
        params[f"be{i}"] = jnp.zeros((1, D_MODEL), jnp.float32)

    x = jax.random.normal(next(keys), (B, S, D_MODEL)).astype(jnp.float32)
    enc_output = jax.random.normal(next(keys), (B, S_ENC, D_MODEL)).astype(jnp.float32)
    # causal target mask; source mask with the last two encoder positions masked for b=1
    tgt_mask = jnp.tril(jnp.ones((S, S), jnp.float32))[None].repeat(B, axis=0)
    src_mask = jnp.ones((B, S, S_ENC), jnp.float32).at[1, :, S_ENC - 2:].set(0.0)

    ref = _ref_decoder_layer(x, enc_output, tgt_mask, src_mask, params, NUM_HEADS)

    run = partial(decoder_layer, x, enc_output, tgt_mask, src_mask, params,
                  num_heads=NUM_HEADS)

    # Optimized path: bf16 MXU operands, EUP softmax reciprocal, single-buffered params.
    try:
        out_fast = jax.block_until_ready(run())
        single_buffer_ok = True
    except Exception:
        # This jax build rejected pl.Buffered(1); fall back to default double-buffering.
        out_fast = jax.block_until_ready(run(single_buffer_params=False))
        single_buffer_ok = False

    assert out_fast.shape == (B, S, D_MODEL)
    assert jnp.allclose(out_fast, ref, atol=5e-2, rtol=5e-2), \
        "bf16 kernel diverges from f32 reference beyond bf16 tolerance"

    # Precision-matched path (f32 MXU inputs, exact reciprocal): tight semantic check.
    out_precise = jax.block_until_ready(
        run(matmul_dtype=jnp.float32, approx_softmax_recip=False,
            single_buffer_params=single_buffer_ok))
    assert jnp.allclose(out_precise, ref, atol=2e-4, rtol=2e-4), \
        "f32 kernel mismatch vs pure-JAX reference"

    print("KERNEL_OK")
</pallas_src>

<mosaic_0001>
module attributes {stable_mosaic.version = 11 : i64} {
  func.func @_decoder_layer_kernel(%arg0: i32, %arg1: memref<1x8x32xf32, #tpu.memory_space<vmem>>, %arg2: memref<1x8x32xf32, #tpu.memory_space<vmem>>, %arg3: memref<1x8x8xbf16, #tpu.memory_space<vmem>>, %arg4: memref<1x8x8xbf16, #tpu.memory_space<vmem>>, %arg5: memref<32x96xbf16, #tpu.memory_space<vmem>>, %arg6: memref<1x96xf32, #tpu.memory_space<vmem>>, %arg7: memref<32x32xbf16, #tpu.memory_space<vmem>>, %arg8: memref<1x32xf32, #tpu.memory_space<vmem>>, %arg9: memref<32x32xbf16, #tpu.memory_space<vmem>>, %arg10: memref<1x32xf32, #tpu.memory_space<vmem>>, %arg11: memref<32x64xbf16, #tpu.memory_space<vmem>>, %arg12: memref<1x64xf32, #tpu.memory_space<vmem>>, %arg13: memref<32x32xbf16, #tpu.memory_space<vmem>>, %arg14: memref<1x32xf32, #tpu.memory_space<vmem>>, %arg15: memref<32x64xbf16, #tpu.memory_space<vmem>>, %arg16: memref<1x64xf32, #tpu.memory_space<vmem>>, %arg17: memref<64x32xbf16, #tpu.memory_space<vmem>>, %arg18: memref<1x32xf32, #tpu.memory_space<vmem>>, %arg19: memref<1x32xf32, #tpu.memory_space<vmem>>, %arg20: memref<1x32xf32, #tpu.memory_space<vmem>>, %arg21: memref<1x32xf32, #tpu.memory_space<vmem>>, %arg22: memref<1x32xf32, #tpu.memory_space<vmem>>, %arg23: memref<1x32xf32, #tpu.memory_space<vmem>>, %arg24: memref<1x32xf32, #tpu.memory_space<vmem>>, %arg25: memref<1x8x32xf32, #tpu.memory_space<vmem>>) attributes {dimension_semantics = [#tpu.dimension_semantics<parallel>], iteration_bounds = array<i64: 2>, scalar_prefetch = 0 : i64, scratch_operands = 0 : i64, tpu.core_type = #tpu.core_type<tc>, window_params = [{transform_indices = @transform_0, window_bounds = array<i64: 1, 8, 32>}, {transform_indices = @transform_1, window_bounds = array<i64: 1, 8, 32>}, {transform_indices = @transform_2, window_bounds = array<i64: 1, 8, 8>}, {transform_indices = @transform_3, window_bounds = array<i64: 1, 8, 8>}, {pipeline_mode = #tpu.pipeline_mode<synchronous>, transform_indices = @transform_4, window_bounds = array<i64: 32, 96>}, {pipeline_mode = #tpu.pipeline_mode<synchronous>, transform_indices = @transform_5, window_bounds = array<i64: 1, 96>}, {pipeline_mode = #tpu.pipeline_mode<synchronous>, transform_indices = @transform_6, window_bounds = array<i64: 32, 32>}, {pipeline_mode = #tpu.pipeline_mode<synchronous>, transform_indices = @transform_7, window_bounds = array<i64: 1, 32>}, {pipeline_mode = #tpu.pipeline_mode<synchronous>, transform_indices = @transform_8, window_bounds = array<i64: 32, 32>}, {pipeline_mode = #tpu.pipeline_mode<synchronous>, transform_indices = @transform_9, window_bounds = array<i64: 1, 32>}, {pipeline_mode = #tpu.pipeline_mode<synchronous>, transform_indices = @transform_10, window_bounds = array<i64: 32, 64>}, {pipeline_mode = #tpu.pipeline_mode<synchronous>, transform_indices = @transform_11, window_bounds = array<i64: 1, 64>}, {pipeline_mode = #tpu.pipeline_mode<synchronous>, transform_indices = @transform_12, window_bounds = array<i64: 32, 32>}, {pipeline_mode = #tpu.pipeline_mode<synchronous>, transform_indices = @transform_13, window_bounds = array<i64: 1, 32>}, {pipeline_mode = #tpu.pipeline_mode<synchronous>, transform_indices = @transform_14, window_bounds = array<i64: 32, 64>}, {pipeline_mode = #tpu.pipeline_mode<synchronous>, transform_indices = @transform_15, window_bounds = array<i64: 1, 64>}, {pipeline_mode = #tpu.pipeline_mode<synchronous>, transform_indices = @transform_16, window_bounds = array<i64: 64, 32>}, {pipeline_mode = #tpu.pipeline_mode<synchronous>, transform_indices = @transform_17, window_bounds = array<i64: 1, 32>}, {pipeline_mode = #tpu.pipeline_mode<synchronous>, transform_indices = @transform_18, window_bounds = array<i64: 1, 32>}, {pipeline_mode = #tpu.pipeline_mode<synchronous>, transform_indices = @transform_19, window_bounds = array<i64: 1, 32>}, {pipeline_mode = #tpu.pipeline_mode<synchronous>, transform_indices = @transform_20, window_bounds = array<i64: 1, 32>}, {pipeline_mode = #tpu.pipeline_mode<synchronous>, transform_indices = @transform_21, window_bounds = array<i64: 1, 32>}, {pipeline_mode = #tpu.pipeline_mode<synchronous>, transform_indices = @transform_22, window_bounds = array<i64: 1, 32>}, {pipeline_mode = #tpu.pipeline_mode<synchronous>, transform_indices = @transform_23, window_bounds = array<i64: 1, 32>}, {transform_indices = @transform_24, window_bounds = array<i64: 1, 8, 32>}]} {
    %c0 = arith.constant 0 : index
    %c0_0 = arith.constant 0 : index
    %c0_1 = arith.constant 0 : index
    %0 = vector.load %arg1[%c0, %c0_0, %c0_1] : memref<1x8x32xf32, #tpu.memory_space<vmem>>, vector<1x8x32xf32>
    %1 = vector.shape_cast %0 : vector<1x8x32xf32> to vector<8x32xf32>
    %c0_2 = arith.constant 0 : index
    %c0_3 = arith.constant 0 : index
    %c0_4 = arith.constant 0 : index
    %2 = vector.load %arg2[%c0_2, %c0_3, %c0_4] : memref<1x8x32xf32, #tpu.memory_space<vmem>>, vector<1x8x32xf32>
    %3 = vector.shape_cast %2 : vector<1x8x32xf32> to vector<8x32xf32>
    %c0_5 = arith.constant 0 : index
    %c0_6 = arith.constant 0 : index
    %c0_7 = arith.constant 0 : index
    %4 = vector.load %arg3[%c0_5, %c0_6, %c0_7] : memref<1x8x8xbf16, #tpu.memory_space<vmem>>, vector<1x8x8xbf16>
    %5 = vector.shape_cast %4 : vector<1x8x8xbf16> to vector<8x8xbf16>
    %6 = arith.extf %5 : vector<8x8xbf16> to vector<8x8xf32>
    %cst = arith.constant 1.000000e+00 : f32
    %7 = vector.broadcast %cst : f32 to vector<8x8xf32>
    %8 = arith.subf %6, %7 : vector<8x8xf32>
    %cst_8 = arith.constant 1.000000e+09 : f32
    %9 = vector.broadcast %cst_8 : f32 to vector<8x8xf32>
    %10 = arith.mulf %8, %9 : vector<8x8xf32>
    %c0_9 = arith.constant 0 : index
    %c0_10 = arith.constant 0 : index
    %c0_11 = arith.constant 0 : index
    %11 = vector.load %arg4[%c0_9, %c0_10, %c0_11] : memref<1x8x8xbf16, #tpu.memory_space<vmem>>, vector<1x8x8xbf16>
    %12 = vector.shape_cast %11 : vector<1x8x8xbf16> to vector<8x8xbf16>
    %13 = arith.extf %12 : vector<8x8xbf16> to vector<8x8xf32>
    %cst_12 = arith.constant 1.000000e+00 : f32
    %14 = vector.broadcast %cst_12 : f32 to vector<8x8xf32>
    %15 = arith.subf %13, %14 : vector<8x8xf32>
    %cst_13 = arith.constant 1.000000e+09 : f32
    %16 = vector.broadcast %cst_13 : f32 to vector<8x8xf32>
    %17 = arith.mulf %15, %16 : vector<8x8xf32>
    %18 = arith.truncf %1 : vector<8x32xf32> to vector<8x32xbf16>
    %c0_14 = arith.constant 0 : index
    %c0_15 = arith.constant 0 : index
    %19 = vector.load %arg5[%c0_14, %c0_15] : memref<32x96xbf16, #tpu.memory_space<vmem>>, vector<32x96xbf16>
    %cst_16 = arith.constant dense<0.000000e+00> : vector<8x96xf32>
    %20 = tpu.matmul %18, %19, %cst_16 {dimension_numbers = #tpu.dot_dimension_numbers<[1], [0], [0], [1], [0, 0, 1, 1], [], []>} : vector<8x32xbf16>, vector<32x96xbf16>, vector<8x96xf32> -> vector<8x96xf32>
    %c0_17 = arith.constant 0 : index
    %c0_18 = arith.constant 0 : index
    %21 = vector.load %arg6[%c0_17, %c0_18] : memref<1x96xf32, #tpu.memory_space<vmem>>, vector<1x96xf32>
    %22 = vector.broadcast %21 : vector<1x96xf32> to vector<8x96xf32>
    %23 = arith.addf %20, %22 : vector<8x96xf32>
    %24 = vector.extract_strided_slice %23 {offsets = [0, 0], sizes = [8, 8], strides = [1, 1]} : vector<8x96xf32> to vector<8x8xf32>
    %25 = vector.extract_strided_slice %23 {offsets = [0, 8], sizes = [8, 8], strides = [1, 1]} : vector<8x96xf32> to vector<8x8xf32>
    %26 = vector.extract_strided_slice %23 {offsets = [0, 16], sizes = [8, 8], strides = [1, 1]} : vector<8x96xf32> to vector<8x8xf32>
    %27 = vector.extract_strided_slice %23 {offsets = [0, 24], sizes = [8, 8], strides = [1, 1]} : vector<8x96xf32> to vector<8x8xf32>
    %28 = vector.shape_cast %24 : vector<8x8xf32> to vector<1x8x8xf32>
    %29 = vector.shape_cast %25 : vector<8x8xf32> to vector<1x8x8xf32>
    %30 = vector.shape_cast %26 : vector<8x8xf32> to vector<1x8x8xf32>
    %31 = vector.shape_cast %27 : vector<8x8xf32> to vector<1x8x8xf32>
    %32 = tpu.concatenate %28, %29, %30, %31 in 0 : vector<1x8x8xf32>, vector<1x8x8xf32>, vector<1x8x8xf32>, vector<1x8x8xf32> -> vector<4x8x8xf32>
    %33 = vector.extract_strided_slice %23 {offsets = [0, 32], sizes = [8, 8], strides = [1, 1]} : vector<8x96xf32> to vector<8x8xf32>
    %34 = vector.extract_strided_slice %23 {offsets = [0, 40], sizes = [8, 8], strides = [1, 1]} : vector<8x96xf32> to vector<8x8xf32>
    %35 = vector.extract_strided_slice %23 {offsets = [0, 48], sizes = [8, 8], strides = [1, 1]} : vector<8x96xf32> to vector<8x8xf32>
    %36 = vector.extract_strided_slice %23 {offsets = [0, 56], sizes = [8, 8], strides = [1, 1]} : vector<8x96xf32> to vector<8x8xf32>
    %37 = vector.shape_cast %33 : vector<8x8xf32> to vector<1x8x8xf32>
    %38 = vector.shape_cast %34 : vector<8x8xf32> to vector<1x8x8xf32>
    %39 = vector.shape_cast %35 : vector<8x8xf32> to vector<1x8x8xf32>
    %40 = vector.shape_cast %36 : vector<8x8xf32> to vector<1x8x8xf32>
    %41 = tpu.concatenate %37, %38, %39, %40 in 0 : vector<1x8x8xf32>, vector<1x8x8xf32>, vector<1x8x8xf32>, vector<1x8x8xf32> -> vector<4x8x8xf32>
    %42 = vector.extract_strided_slice %23 {offsets = [0, 64], sizes = [8, 8], strides = [1, 1]} : vector<8x96xf32> to vector<8x8xf32>
    %43 = vector.extract_strided_slice %23 {offsets = [0, 72], sizes = [8, 8], strides = [1, 1]} : vector<8x96xf32> to vector<8x8xf32>
    %44 = vector.extract_strided_slice %23 {offsets = [0, 80], sizes = [8, 8], strides = [1, 1]} : vector<8x96xf32> to vector<8x8xf32>
    %45 = vector.extract_strided_slice %23 {offsets = [0, 88], sizes = [8, 8], strides = [1, 1]} : vector<8x96xf32> to vector<8x8xf32>
    %46 = vector.shape_cast %42 : vector<8x8xf32> to vector<1x8x8xf32>
    %47 = vector.shape_cast %43 : vector<8x8xf32> to vector<1x8x8xf32>
    %48 = vector.shape_cast %44 : vector<8x8xf32> to vector<1x8x8xf32>
    %49 = vector.shape_cast %45 : vector<8x8xf32> to vector<1x8x8xf32>
    %50 = tpu.concatenate %46, %47, %48, %49 in 0 : vector<1x8x8xf32>, vector<1x8x8xf32>, vector<1x8x8xf32>, vector<1x8x8xf32> -> vector<4x8x8xf32>
    %cst_19 = arith.constant 0.353553385 : f32
    %51 = vector.broadcast %cst_19 : f32 to vector<4x8x8xf32>
    %52 = arith.mulf %32, %51 : vector<4x8x8xf32>
    %53 = arith.truncf %52 : vector<4x8x8xf32> to vector<4x8x8xbf16>
    %54 = arith.truncf %41 : vector<4x8x8xf32> to vector<4x8x8xbf16>
    "tpu.trace_start"() <{level = 10 : i32, message = "hqd,hkd->hqk"}> : () -> ()
    %cst_20 = arith.constant dense<0.000000e+00> : vector<4x8x8xf32>
    %55 = tpu.matmul %53, %54, %cst_20 {dimension_numbers = #tpu.dot_dimension_numbers<[2], [2], [1], [1], [0, 0, 0, 1, 1, 1], [0], [0]>} : vector<4x8x8xbf16>, vector<4x8x8xbf16>, vector<4x8x8xf32> -> vector<4x8x8xf32>
    "tpu.trace_stop"() : () -> ()
    %56 = vector.shape_cast %10 : vector<8x8xf32> to vector<1x8x8xf32>
    %57 = vector.broadcast %56 : vector<1x8x8xf32> to vector<4x8x8xf32>
    %58 = arith.addf %55, %57 : vector<4x8x8xf32>
    %cst_21 = arith.constant dense<0xFF800000> : vector<4x8xf32>
    %59 = vector.multi_reduction <maximumf>, %58, %cst_21 [2] : vector<4x8x8xf32> to vector<4x8xf32>
    %60 = vector.shape_cast %59 : vector<4x8xf32> to vector<4x8x1xf32>
    %61 = vector.broadcast %60 : vector<4x8x1xf32> to vector<4x8x8xf32>
    %62 = arith.subf %58, %61 : vector<4x8x8xf32>
    %63 = math.exp %62 : vector<4x8x8xf32>
    %cst_22 = arith.constant dense<0.000000e+00> : vector<4x8xf32>
    %64 = vector.multi_reduction <add>, %63, %cst_22 [2] : vector<4x8x8xf32> to vector<4x8xf32>
    %65 = vector.shape_cast %64 : vector<4x8xf32> to vector<4x8x1xf32>
    %66 = arith.truncf %63 : vector<4x8x8xf32> to vector<4x8x8xbf16>
    %67 = arith.truncf %50 : vector<4x8x8xf32> to vector<4x8x8xbf16>
    "tpu.trace_start"() <{level = 10 : i32, message = "hqk,hkd->hqd"}> : () -> ()
    %cst_23 = arith.constant dense<0.000000e+00> : vector<4x8x8xf32>
    %68 = tpu.matmul %66, %67, %cst_23 {dimension_numbers = #tpu.dot_dimension_numbers<[2], [1], [1], [2], [0, 0, 0, 1, 1, 2], [0], [0]>} : vector<4x8x8xbf16>, vector<4x8x8xbf16>, vector<4x8x8xf32> -> vector<4x8x8xf32>
    "tpu.trace_stop"() : () -> ()
    %69 = tpu.reciprocal %65 {approx = true} : vector<4x8x1xf32> -> vector<4x8x1xf32>
    %70 = vector.broadcast %69 : vector<4x8x1xf32> to vector<4x8x8xf32>
    %71 = arith.mulf %68, %70 : vector<4x8x8xf32>
    %72 = vector.extract_strided_slice %71 {offsets = [0, 0, 0], sizes = [1, 8, 8], strides = [1, 1, 1]} : vector<4x8x8xf32> to vector<1x8x8xf32>
    %73 = vector.shape_cast %72 : vector<1x8x8xf32> to vector<8x8xf32>
    %74 = vector.extract_strided_slice %71 {offsets = [1, 0, 0], sizes = [1, 8, 8], strides = [1, 1, 1]} : vector<4x8x8xf32> to vector<1x8x8xf32>
    %75 = vector.shape_cast %74 : vector<1x8x8xf32> to vector<8x8xf32>
    %76 = vector.extract_strided_slice %71 {offsets = [2, 0, 0], sizes = [1, 8, 8], strides = [1, 1, 1]} : vector<4x8x8xf32> to vector<1x8x8xf32>
    %77 = vector.shape_cast %76 : vector<1x8x8xf32> to vector<8x8xf32>
    %78 = vector.extract_strided_slice %71 {offsets = [3, 0, 0], sizes = [1, 8, 8], strides = [1, 1, 1]} : vector<4x8x8xf32> to vector<1x8x8xf32>
    %79 = vector.shape_cast %78 : vector<1x8x8xf32> to vector<8x8xf32>
    %80 = tpu.concatenate %73, %75, %77, %79 in 1 : vector<8x8xf32>, vector<8x8xf32>, vector<8x8xf32>, vector<8x8xf32> -> vector<8x32xf32>
    %81 = arith.truncf %80 : vector<8x32xf32> to vector<8x32xbf16>
    %c0_24 = arith.constant 0 : index
    %c0_25 = arith.constant 0 : index
    %82 = vector.load %arg7[%c0_24, %c0_25] : memref<32x32xbf16, #tpu.memory_space<vmem>>, vector<32x32xbf16>
    %cst_26 = arith.constant dense<0.000000e+00> : vector<8x32xf32>
    %83 = tpu.matmul %81, %82, %cst_26 {dimension_numbers = #tpu.dot_dimension_numbers<[1], [0], [0], [1], [0, 0, 1, 1], [], []>} : vector<8x32xbf16>, vector<32x32xbf16>, vector<8x32xf32> -> vector<8x32xf32>
    %c0_27 = arith.constant 0 : index
    %c0_28 = arith.constant 0 : index
    %84 = vector.load %arg8[%c0_27, %c0_28] : memref<1x32xf32, #tpu.memory_space<vmem>>, vector<1x32xf32>
    %85 = vector.broadcast %84 : vector<1x32xf32> to vector<8x32xf32>
    %86 = arith.addf %83, %85 : vector<8x32xf32>
    %87 = arith.addf %1, %86 : vector<8x32xf32>
    %cst_29 = arith.constant dense<0.000000e+00> : vector<8xf32>
    %88 = vector.multi_reduction <add>, %87, %cst_29 [1] : vector<8x32xf32> to vector<8xf32>
    %89 = vector.shape_cast %88 : vector<8xf32> to vector<8x1xf32>
    %cst_30 = arith.constant 3.200000e+01 : f32
    %90 = vector.broadcast %cst_30 : f32 to vector<8x1xf32>
    %91 = arith.divf %89, %90 : vector<8x1xf32>
    %92 = vector.broadcast %91 : vector<8x1xf32> to vector<8x32xf32>
    %93 = arith.subf %87, %92 : vector<8x32xf32>
    %94 = arith.mulf %93, %93 : vector<8x32xf32>
    %cst_31 = arith.constant dense<0.000000e+00> : vector<8xf32>
    %95 = vector.multi_reduction <add>, %94, %cst_31 [1] : vector<8x32xf32> to vector<8xf32>
    %96 = vector.shape_cast %95 : vector<8xf32> to vector<8x1xf32>
    %cst_32 = arith.constant 3.200000e+01 : f32
    %97 = vector.broadcast %cst_32 : f32 to vector<8x1xf32>
    %98 = arith.divf %96, %97 : vector<8x1xf32>
    %cst_33 = arith.constant 9.99999974E-6 : f32
    %99 = vector.broadcast %cst_33 : f32 to vector<8x1xf32>
    %100 = arith.addf %98, %99 : vector<8x1xf32>
    %101 = math.rsqrt %100 : vector<8x1xf32>
    %102 = vector.broadcast %101 : vector<8x1xf32> to vector<8x32xf32>
    %103 = arith.mulf %93, %102 : vector<8x32xf32>
    %c0_34 = arith.constant 0 : index
    %c0_35 = arith.constant 0 : index
    %104 = vector.load %arg19[%c0_34, %c0_35] : memref<1x32xf32, #tpu.memory_space<vmem>>, vector<1x32xf32>
    %105 = vector.broadcast %104 : vector<1x32xf32> to vector<8x32xf32>
    %106 = arith.mulf %103, %105 : vector<8x32xf32>
    %c0_36 = arith.constant 0 : index
    %c0_37 = arith.constant 0 : index
    %107 = vector.load %arg20[%c0_36, %c0_37] : memref<1x32xf32, #tpu.memory_space<vmem>>, vector<1x32xf32>
    %108 = vector.broadcast %107 : vector<1x32xf32> to vector<8x32xf32>
    %109 = arith.addf %106, %108 : vector<8x32xf32>
    %110 = arith.truncf %109 : vector<8x32xf32> to vector<8x32xbf16>
    %c0_38 = arith.constant 0 : index
    %c0_39 = arith.constant 0 : index
    %111 = vector.load %arg9[%c0_38, %c0_39] : memref<32x32xbf16, #tpu.memory_space<vmem>>, vector<32x32xbf16>
    %cst_40 = arith.constant dense<0.000000e+00> : vector<8x32xf32>
    %112 = tpu.matmul %110, %111, %cst_40 {dimension_numbers = #tpu.dot_dimension_numbers<[1], [0], [0], [1], [0, 0, 1, 1], [], []>} : vector<8x32xbf16>, vector<32x32xbf16>, vector<8x32xf32> -> vector<8x32xf32>
    %c0_41 = arith.constant 0 : index
    %c0_42 = arith.constant 0 : index
    %113 = vector.load %arg10[%c0_41, %c0_42] : memref<1x32xf32, #tpu.memory_space<vmem>>, vector<1x32xf32>
    %114 = vector.broadcast %113 : vector<1x32xf32> to vector<8x32xf32>
    %115 = arith.addf %112, %114 : vector<8x32xf32>
    %116 = arith.truncf %3 : vector<8x32xf32> to vector<8x32xbf16>
    %c0_43 = arith.constant 0 : index
    %c0_44 = arith.constant 0 : index
    %117 = vector.load %arg11[%c0_43, %c0_44] : memref<32x64xbf16, #tpu.memory_space<vmem>>, vector<32x64xbf16>
    %cst_45 = arith.constant dense<0.000000e+00> : vector<8x64xf32>
    %118 = tpu.matmul %116, %117, %cst_45 {dimension_numbers = #tpu.dot_dimension_numbers<[1], [0], [0], [1], [0, 0, 1, 1], [], []>} : vector<8x32xbf16>, vector<32x64xbf16>, vector<8x64xf32> -> vector<8x64xf32>
    %c0_46 = arith.constant 0 : index
    %c0_47 = arith.constant 0 : index
    %119 = vector.load %arg12[%c0_46, %c0_47] : memref<1x64xf32, #tpu.memory_space<vmem>>, vector<1x64xf32>
    %120 = vector.broadcast %119 : vector<1x64xf32> to vector<8x64xf32>
    %121 = arith.addf %118, %120 : vector<8x64xf32>
    %122 = vector.extract_strided_slice %115 {offsets = [0, 0], sizes = [8, 8], strides = [1, 1]} : vector<8x32xf32> to vector<8x8xf32>
    %123 = vector.extract_strided_slice %115 {offsets = [0, 8], sizes = [8, 8], strides = [1, 1]} : vector<8x32xf32> to vector<8x8xf32>
    %124 = vector.extract_strided_slice %115 {offsets = [0, 16], sizes = [8, 8], strides = [1, 1]} : vector<8x32xf32> to vector<8x8xf32>
    %125 = vector.extract_strided_slice %115 {offsets = [0, 24], sizes = [8, 8], strides = [1, 1]} : vector<8x32xf32> to vector<8x8xf32>
    %126 = vector.shape_cast %122 : vector<8x8xf32> to vector<1x8x8xf32>
    %127 = vector.shape_cast %123 : vector<8x8xf32> to vector<1x8x8xf32>
    %128 = vector.shape_cast %124 : vector<8x8xf32> to vector<1x8x8xf32>
    %129 = vector.shape_cast %125 : vector<8x8xf32> to vector<1x8x8xf32>
    %130 = tpu.concatenate %126, %127, %128, %129 in 0 : vector<1x8x8xf32>, vector<1x8x8xf32>, vector<1x8x8xf32>, vector<1x8x8xf32> -> vector<4x8x8xf32>
    %131 = vector.extract_strided_slice %121 {offsets = [0, 0], sizes = [8, 8], strides = [1, 1]} : vector<8x64xf32> to vector<8x8xf32>
    %132 = vector.extract_strided_slice %121 {offsets = [0, 8], sizes = [8, 8], strides = [1, 1]} : vector<8x64xf32> to vector<8x8xf32>
    %133 = vector.extract_strided_slice %121 {offsets = [0, 16], sizes = [8, 8], strides = [1, 1]} : vector<8x64xf32> to vector<8x8xf32>
    %134 = vector.extract_strided_slice %121 {offsets = [0, 24], sizes = [8, 8], strides = [1, 1]} : vector<8x64xf32> to vector<8x8xf32>
    %135 = vector.shape_cast %131 : vector<8x8xf32> to vector<1x8x8xf32>
    %136 = vector.shape_cast %132 : vector<8x8xf32> to vector<1x8x8xf32>
    %137 = vector.shape_cast %133 : vector<8x8xf32> to vector<1x8x8xf32>
    %138 = vector.shape_cast %134 : vector<8x8xf32> to vector<1x8x8xf32>
    %139 = tpu.concatenate %135, %136, %137, %138 in 0 : vector<1x8x8xf32>, vector<1x8x8xf32>, vector<1x8x8xf32>, vector<1x8x8xf32> -> vector<4x8x8xf32>
    %140 = vector.extract_strided_slice %121 {offsets = [0, 32], sizes = [8, 8], strides = [1, 1]} : vector<8x64xf32> to vector<8x8xf32>
    %141 = vector.extract_strided_slice %121 {offsets = [0, 40], sizes = [8, 8], strides = [1, 1]} : vector<8x64xf32> to vector<8x8xf32>
    %142 = vector.extract_strided_slice %121 {offsets = [0, 48], sizes = [8, 8], strides = [1, 1]} : vector<8x64xf32> to vector<8x8xf32>
    %143 = vector.extract_strided_slice %121 {offsets = [0, 56], sizes = [8, 8], strides = [1, 1]} : vector<8x64xf32> to vector<8x8xf32>
    %144 = vector.shape_cast %140 : vector<8x8xf32> to vector<1x8x8xf32>
    %145 = vector.shape_cast %141 : vector<8x8xf32> to vector<1x8x8xf32>
    %146 = vector.shape_cast %142 : vector<8x8xf32> to vector<1x8x8xf32>
    %147 = vector.shape_cast %143 : vector<8x8xf32> to vector<1x8x8xf32>
    %148 = tpu.concatenate %144, %145, %146, %147 in 0 : vector<1x8x8xf32>, vector<1x8x8xf32>, vector<1x8x8xf32>, vector<1x8x8xf32> -> vector<4x8x8xf32>
    %cst_48 = arith.constant 0.353553385 : f32
    %149 = vector.broadcast %cst_48 : f32 to vector<4x8x8xf32>
    %150 = arith.mulf %130, %149 : vector<4x8x8xf32>
    %151 = arith.truncf %150 : vector<4x8x8xf32> to vector<4x8x8xbf16>
    %152 = arith.truncf %139 : vector<4x8x8xf32> to vector<4x8x8xbf16>
    "tpu.trace_start"() <{level = 10 : i32, message = "hqd,hkd->hqk"}> : () -> ()
    %cst_49 = arith.constant dense<0.000000e+00> : vector<4x8x8xf32>
    %153 = tpu.matmul %151, %152, %cst_49 {dimension_numbers = #tpu.dot_dimension_numbers<[2], [2], [1], [1], [0, 0, 0, 1, 1, 1], [0], [0]>} : vector<4x8x8xbf16>, vector<4x8x8xbf16>, vector<4x8x8xf32> -> vector<4x8x8xf32>
    "tpu.trace_stop"() : () -> ()
    %154 = vector.shape_cast %17 : vector<8x8xf32> to vector<1x8x8xf32>
    %155 = vector.broadcast %154 : vector<1x8x8xf32> to vector<4x8x8xf32>
    %156 = arith.addf %153, %155 : vector<4x8x8xf32>
    %cst_50 = arith.constant dense<0xFF800000> : vector<4x8xf32>
    %157 = vector.multi_reduction <maximumf>, %156, %cst_50 [2] : vector<4x8x8xf32> to vector<4x8xf32>
    %158 = vector.shape_cast %157 : vector<4x8xf32> to vector<4x8x1xf32>
    %159 = vector.broadcast %158 : vector<4x8x1xf32> to vector<4x8x8xf32>
    %160 = arith.subf %156, %159 : vector<4x8x8xf32>
    %161 = math.exp %160 : vector<4x8x8xf32>
    %cst_51 = arith.constant dense<0.000000e+00> : vector<4x8xf32>
    %162 = vector.multi_reduction <add>, %161, %cst_51 [2] : vector<4x8x8xf32> to vector<4x8xf32>
    %163 = vector.shape_cast %162 : vector<4x8xf32> to vector<4x8x1xf32>
    %164 = arith.truncf %161 : vector<4x8x8xf32> to vector<4x8x8xbf16>
    %165 = arith.truncf %148 : vector<4x8x8xf32> to vector<4x8x8xbf16>
    "tpu.trace_start"() <{level = 10 : i32, message = "hqk,hkd->hqd"}> : () -> ()
    %cst_52 = arith.constant dense<0.000000e+00> : vector<4x8x8xf32>
    %166 = tpu.matmul %164, %165, %cst_52 {dimension_numbers = #tpu.dot_dimension_numbers<[2], [1], [1], [2], [0, 0, 0, 1, 1, 2], [0], [0]>} : vector<4x8x8xbf16>, vector<4x8x8xbf16>, vector<4x8x8xf32> -> vector<4x8x8xf32>
    "tpu.trace_stop"() : () -> ()
    %167 = tpu.reciprocal %163 {approx = true} : vector<4x8x1xf32> -> vector<4x8x1xf32>
    %168 = vector.broadcast %167 : vector<4x8x1xf32> to vector<4x8x8xf32>
    %169 = arith.mulf %166, %168 : vector<4x8x8xf32>
    %170 = vector.extract_strided_slice %169 {offsets = [0, 0, 0], sizes = [1, 8, 8], strides = [1, 1, 1]} : vector<4x8x8xf32> to vector<1x8x8xf32>
    %171 = vector.shape_cast %170 : vector<1x8x8xf32> to vector<8x8xf32>
    %172 = vector.extract_strided_slice %169 {offsets = [1, 0, 0], sizes = [1, 8, 8], strides = [1, 1, 1]} : vector<4x8x8xf32> to vector<1x8x8xf32>
    %173 = vector.shape_cast %172 : vector<1x8x8xf32> to vector<8x8xf32>
    %174 = vector.extract_strided_slice %169 {offsets = [2, 0, 0], sizes = [1, 8, 8], strides = [1, 1, 1]} : vector<4x8x8xf32> to vector<1x8x8xf32>
    %175 = vector.shape_cast %174 : vector<1x8x8xf32> to vector<8x8xf32>
    %176 = vector.extract_strided_slice %169 {offsets = [3, 0, 0], sizes = [1, 8, 8], strides = [1, 1, 1]} : vector<4x8x8xf32> to vector<1x8x8xf32>
    %177 = vector.shape_cast %176 : vector<1x8x8xf32> to vector<8x8xf32>
    %178 = tpu.concatenate %171, %173, %175, %177 in 1 : vector<8x8xf32>, vector<8x8xf32>, vector<8x8xf32>, vector<8x8xf32> -> vector<8x32xf32>
    %179 = arith.truncf %178 : vector<8x32xf32> to vector<8x32xbf16>
    %c0_53 = arith.constant 0 : index
    %c0_54 = arith.constant 0 : index
    %180 = vector.load %arg13[%c0_53, %c0_54] : memref<32x32xbf16, #tpu.memory_space<vmem>>, vector<32x32xbf16>
    %cst_55 = arith.constant dense<0.000000e+00> : vector<8x32xf32>
    %181 = tpu.matmul %179, %180, %cst_55 {dimension_numbers = #tpu.dot_dimension_numbers<[1], [0], [0], [1], [0, 0, 1, 1], [], []>} : vector<8x32xbf16>, vector<32x32xbf16>, vector<8x32xf32> -> vector<8x32xf32>
    %c0_56 = arith.constant 0 : index
    %c0_57 = arith.constant 0 : index
    %182 = vector.load %arg14[%c0_56, %c0_57] : memref<1x32xf32, #tpu.memory_space<vmem>>, vector<1x32xf32>
    %183 = vector.broadcast %182 : vector<1x32xf32> to vector<8x32xf32>
    %184 = arith.addf %181, %183 : vector<8x32xf32>
    %185 = arith.addf %109, %184 : vector<8x32xf32>
    %cst_58 = arith.constant dense<0.000000e+00> : vector<8xf32>
    %186 = vector.multi_reduction <add>, %185, %cst_58 [1] : vector<8x32xf32> to vector<8xf32>
    %187 = vector.shape_cast %186 : vector<8xf32> to vector<8x1xf32>
    %cst_59 = arith.constant 3.200000e+01 : f32
    %188 = vector.broadcast %cst_59 : f32 to vector<8x1xf32>
    %189 = arith.divf %187, %188 : vector<8x1xf32>
    %190 = vector.broadcast %189 : vector<8x1xf32> to vector<8x32xf32>
    %191 = arith.subf %185, %190 : vector<8x32xf32>
    %192 = arith.mulf %191, %191 : vector<8x32xf32>
    %cst_60 = arith.constant dense<0.000000e+00> : vector<8xf32>
    %193 = vector.multi_reduction <add>, %192, %cst_60 [1] : vector<8x32xf32> to vector<8xf32>
    %194 = vector.shape_cast %193 : vector<8xf32> to vector<8x1xf32>
    %cst_61 = arith.constant 3.200000e+01 : f32
    %195 = vector.broadcast %cst_61 : f32 to vector<8x1xf32>
    %196 = arith.divf %194, %195 : vector<8x1xf32>
    %cst_62 = arith.constant 9.99999974E-6 : f32
    %197 = vector.broadcast %cst_62 : f32 to vector<8x1xf32>
    %198 = arith.addf %196, %197 : vector<8x1xf32>
    %199 = math.rsqrt %198 : vector<8x1xf32>
    %200 = vector.broadcast %199 : vector<8x1xf32> to vector<8x32xf32>
    %201 = arith.mulf %191, %200 : vector<8x32xf32>
    %c0_63 = arith.constant 0 : index
    %c0_64 = arith.constant 0 : index
    %202 = vector.load %arg21[%c0_63, %c0_64] : memref<1x32xf32, #tpu.memory_space<vmem>>, vector<1x32xf32>
    %203 = vector.broadcast %202 : vector<1x32xf32> to vector<8x32xf32>
    %204 = arith.mulf %201, %203 : vector<8x32xf32>
    %c0_65 = arith.constant 0 : index
    %c0_66 = arith.constant 0 : index
    %205 = vector.load %arg22[%c0_65, %c0_66] : memref<1x32xf32, #tpu.memory_space<vmem>>, vector<1x32xf32>
    %206 = vector.broadcast %205 : vector<1x32xf32> to vector<8x32xf32>
    %207 = arith.addf %204, %206 : vector<8x32xf32>
    %208 = arith.truncf %207 : vector<8x32xf32> to vector<8x32xbf16>
    %c0_67 = arith.constant 0 : index
    %c0_68 = arith.constant 0 : index
    %209 = vector.load %arg15[%c0_67, %c0_68] : memref<32x64xbf16, #tpu.memory_space<vmem>>, vector<32x64xbf16>
    %cst_69 = arith.constant dense<0.000000e+00> : vector<8x64xf32>
    %210 = tpu.matmul %208, %209, %cst_69 {dimension_numbers = #tpu.dot_dimension_numbers<[1], [0], [0], [1], [0, 0, 1, 1], [], []>} : vector<8x32xbf16>, vector<32x64xbf16>, vector<8x64xf32> -> vector<8x64xf32>
    %c0_70 = arith.constant 0 : index
    %c0_71 = arith.constant 0 : index
    %211 = vector.load %arg16[%c0_70, %c0_71] : memref<1x64xf32, #tpu.memory_space<vmem>>, vector<1x64xf32>
    %212 = vector.broadcast %211 : vector<1x64xf32> to vector<8x64xf32>
    %213 = arith.addf %210, %212 : vector<8x64xf32>
    %cst_72 = arith.constant 0.000000e+00 : f32
    %214 = vector.broadcast %cst_72 : f32 to vector<8x64xf32>
    %215 = arith.maximumf %213, %214 : vector<8x64xf32>
    %216 = arith.truncf %215 : vector<8x64xf32> to vector<8x64xbf16>
    %c0_73 = arith.constant 0 : index
    %c0_74 = arith.constant 0 : index
    %217 = vector.load %arg17[%c0_73, %c0_74] : memref<64x32xbf16, #tpu.memory_space<vmem>>, vector<64x32xbf16>
    %cst_75 = arith.constant dense<0.000000e+00> : vector<8x32xf32>
    %218 = tpu.matmul %216, %217, %cst_75 {dimension_numbers = #tpu.dot_dimension_numbers<[1], [0], [0], [1], [0, 0, 1, 1], [], []>} : vector<8x64xbf16>, vector<64x32xbf16>, vector<8x32xf32> -> vector<8x32xf32>
    %c0_76 = arith.constant 0 : index
    %c0_77 = arith.constant 0 : index
    %219 = vector.load %arg18[%c0_76, %c0_77] : memref<1x32xf32, #tpu.memory_space<vmem>>, vector<1x32xf32>
    %220 = vector.broadcast %219 : vector<1x32xf32> to vector<8x32xf32>
    %221 = arith.addf %218, %220 : vector<8x32xf32>
    %222 = arith.addf %207, %221 : vector<8x32xf32>
    %cst_78 = arith.constant dense<0.000000e+00> : vector<8xf32>
    %223 = vector.multi_reduction <add>, %222, %cst_78 [1] : vector<8x32xf32> to vector<8xf32>
    %224 = vector.shape_cast %223 : vector<8xf32> to vector<8x1xf32>
    %cst_79 = arith.constant 3.200000e+01 : f32
    %225 = vector.broadcast %cst_79 : f32 to vector<8x1xf32>
    %226 = arith.divf %224, %225 : vector<8x1xf32>
    %227 = vector.broadcast %226 : vector<8x1xf32> to vector<8x32xf32>
    %228 = arith.subf %222, %227 : vector<8x32xf32>
    %229 = arith.mulf %228, %228 : vector<8x32xf32>
    %cst_80 = arith.constant dense<0.000000e+00> : vector<8xf32>
    %230 = vector.multi_reduction <add>, %229, %cst_80 [1] : vector<8x32xf32> to vector<8xf32>
    %231 = vector.shape_cast %230 : vector<8xf32> to vector<8x1xf32>
    %cst_81 = arith.constant 3.200000e+01 : f32
    %232 = vector.broadcast %cst_81 : f32 to vector<8x1xf32>
    %233 = arith.divf %231, %232 : vector<8x1xf32>
    %cst_82 = arith.constant 9.99999974E-6 : f32
    %234 = vector.broadcast %cst_82 : f32 to vector<8x1xf32>
    %235 = arith.addf %233, %234 : vector<8x1xf32>
    %236 = math.rsqrt %235 : vector<8x1xf32>
    %237 = vector.broadcast %236 : vector<8x1xf32> to vector<8x32xf32>
    %238 = arith.mulf %228, %237 : vector<8x32xf32>
    %c0_83 = arith.constant 0 : index
    %c0_84 = arith.constant 0 : index
    %239 = vector.load %arg23[%c0_83, %c0_84] : memref<1x32xf32, #tpu.memory_space<vmem>>, vector<1x32xf32>
    %240 = vector.broadcast %239 : vector<1x32xf32> to vector<8x32xf32>
    %241 = arith.mulf %238, %240 : vector<8x32xf32>
    %c0_85 = arith.constant 0 : index
    %c0_86 = arith.constant 0 : index
    %242 = vector.load %arg24[%c0_85, %c0_86] : memref<1x32xf32, #tpu.memory_space<vmem>>, vector<1x32xf32>
    %243 = vector.broadcast %242 : vector<1x32xf32> to vector<8x32xf32>
    %244 = arith.addf %241, %243 : vector<8x32xf32>
    %c0_87 = arith.constant 0 : index
    %c0_88 = arith.constant 0 : index
    %c0_89 = arith.constant 0 : index
    %245 = vector.load %arg25[%c0_87, %c0_88, %c0_89] : memref<1x8x32xf32, #tpu.memory_space<vmem>>, vector<1x8x32xf32>
    %246 = vector.shape_cast %245 : vector<1x8x32xf32> to vector<8x32xf32>
    %247 = vector.shape_cast %244 : vector<8x32xf32> to vector<1x8x32xf32>
    tpu.vector_store %arg25[%c0_87, %c0_88, %c0_89], %247 {strides = array<i32>} : memref<1x8x32xf32, #tpu.memory_space<vmem>>, vector<1x8x32xf32>,
    return
  }
  func.func @transform_0(%arg0: i32) -> (i32, i32, i32) {
    %c0_i32 = arith.constant 0 : i32
    %c0_i32_0 = arith.constant 0 : i32
    %c0_i32_1 = arith.constant 0 : i32
    return %arg0, %c0_i32, %c0_i32_0 : i32, i32, i32
  }
  func.func @transform_1(%arg0: i32) -> (i32, i32, i32) {
    %c0_i32 = arith.constant 0 : i32
    %c0_i32_0 = arith.constant 0 : i32
    %c0_i32_1 = arith.constant 0 : i32
    return %arg0, %c0_i32, %c0_i32_0 : i32, i32, i32
  }
  func.func @transform_2(%arg0: i32) -> (i32, i32, i32) {
    %c0_i32 = arith.constant 0 : i32
    %c0_i32_0 = arith.constant 0 : i32
    %c0_i32_1 = arith.constant 0 : i32
    return %arg0, %c0_i32, %c0_i32_0 : i32, i32, i32
  }
  func.func @transform_3(%arg0: i32) -> (i32, i32, i32) {
    %c0_i32 = arith.constant 0 : i32
    %c0_i32_0 = arith.constant 0 : i32
    %c0_i32_1 = arith.constant 0 : i32
    return %arg0, %c0_i32, %c0_i32_0 : i32, i32, i32
  }
  func.func @transform_4(%arg0: i32) -> (i32, i32) {
    %c0_i32 = arith.constant 0 : i32
    %c0_i32_0 = arith.constant 0 : i32
    %c0_i32_1 = arith.constant 0 : i32
    return %c0_i32, %c0_i32_0 : i32, i32
  }
  func.func @transform_5(%arg0: i32) -> (i32, i32) {
    %c0_i32 = arith.constant 0 : i32
    %c0_i32_0 = arith.constant 0 : i32
    %c0_i32_1 = arith.constant 0 : i32
    return %c0_i32, %c0_i32_0 : i32, i32
  }
  func.func @transform_6(%arg0: i32) -> (i32, i32) {
    %c0_i32 = arith.constant 0 : i32
    %c0_i32_0 = arith.constant 0 : i32
    %c0_i32_1 = arith.constant 0 : i32
    return %c0_i32, %c0_i32_0 : i32, i32
  }
  func.func @transform_7(%arg0: i32) -> (i32, i32) {
    %c0_i32 = arith.constant 0 : i32
    %c0_i32_0 = arith.constant 0 : i32
    %c0_i32_1 = arith.constant 0 : i32
    return %c0_i32, %c0_i32_0 : i32, i32
  }
  func.func @transform_8(%arg0: i32) -> (i32, i32) {
    %c0_i32 = arith.constant 0 : i32
    %c0_i32_0 = arith.constant 0 : i32
    %c0_i32_1 = arith.constant 0 : i32
    return %c0_i32, %c0_i32_0 : i32, i32
  }
  func.func @transform_9(%arg0: i32) -> (i32, i32) {
    %c0_i32 = arith.constant 0 : i32
    %c0_i32_0 = arith.constant 0 : i32
    %c0_i32_1 = arith.constant 0 : i32
    return %c0_i32, %c0_i32_0 : i32, i32
  }
  func.func @transform_10(%arg0: i32) -> (i32, i32) {
    %c0_i32 = arith.constant 0 : i32
    %c0_i32_0 = arith.constant 0 : i32
    %c0_i32_1 = arith.constant 0 : i32
    return %c0_i32, %c0_i32_0 : i32, i32
  }
  func.func @transform_11(%arg0: i32) -> (i32, i32) {
    %c0_i32 = arith.constant 0 : i32
    %c0_i32_0 = arith.constant 0 : i32
    %c0_i32_1 = arith.constant 0 : i32
    return %c0_i32, %c0_i32_0 : i32, i32
  }
  func.func @transform_12(%arg0: i32) -> (i32, i32) {
    %c0_i32 = arith.constant 0 : i32
    %c0_i32_0 = arith.constant 0 : i32
    %c0_i32_1 = arith.constant 0 : i32
    return %c0_i32, %c0_i32_0 : i32, i32
  }
  func.func @transform_13(%arg0: i32) -> (i32, i32) {
    %c0_i32 = arith.constant 0 : i32
    %c0_i32_0 = arith.constant 0 : i32
    %c0_i32_1 = arith.constant 0 : i32
    return %c0_i32, %c0_i32_0 : i32, i32
  }
  func.func @transform_14(%arg0: i32) -> (i32, i32) {
    %c0_i32 = arith.constant 0 : i32
    %c0_i32_0 = arith.constant 0 : i32
    %c0_i32_1 = arith.constant 0 : i32
    return %c0_i32, %c0_i32_0 : i32, i32
  }
  func.func @transform_15(%arg0: i32) -> (i32, i32) {
    %c0_i32 = arith.constant 0 : i32
    %c0_i32_0 = arith.constant 0 : i32
    %c0_i32_1 = arith.constant 0 : i32
    return %c0_i32, %c0_i32_0 : i32, i32
  }
  func.func @transform_16(%arg0: i32) -> (i32, i32) {
    %c0_i32 = arith.constant 0 : i32
    %c0_i32_0 = arith.constant 0 : i32
    %c0_i32_1 = arith.constant 0 : i32
    return %c0_i32, %c0_i32_0 : i32, i32
  }
  func.func @transform_17(%arg0: i32) -> (i32, i32) {
    %c0_i32 = arith.constant 0 : i32
    %c0_i32_0 = arith.constant 0 : i32
    %c0_i32_1 = arith.constant 0 : i32
    return %c0_i32, %c0_i32_0 : i32, i32
  }
  func.func @transform_18(%arg0: i32) -> (i32, i32) {
    %c0_i32 = arith.constant 0 : i32
    %c0_i32_0 = arith.constant 0 : i32
    %c0_i32_1 = arith.constant 0 : i32
    return %c0_i32, %c0_i32_0 : i32, i32
  }
  func.func @transform_19(%arg0: i32) -> (i32, i32) {
    %c0_i32 = arith.constant 0 : i32
    %c0_i32_0 = arith.constant 0 : i32
    %c0_i32_1 = arith.constant 0 : i32
    return %c0_i32, %c0_i32_0 : i32, i32
  }
  func.func @transform_20(%arg0: i32) -> (i32, i32) {
    %c0_i32 = arith.constant 0 : i32
    %c0_i32_0 = arith.constant 0 : i32
    %c0_i32_1 = arith.constant 0 : i32
    return %c0_i32, %c0_i32_0 : i32, i32
  }
  func.func @transform_21(%arg0: i32) -> (i32, i32) {
    %c0_i32 = arith.constant 0 : i32
    %c0_i32_0 = arith.constant 0 : i32
    %c0_i32_1 = arith.constant 0 : i32
    return %c0_i32, %c0_i32_0 : i32, i32
  }
  func.func @transform_22(%arg0: i32) -> (i32, i32) {
    %c0_i32 = arith.constant 0 : i32
    %c0_i32_0 = arith.constant 0 : i32
    %c0_i32_1 = arith.constant 0 : i32
    return %c0_i32, %c0_i32_0 : i32, i32
  }
  func.func @transform_23(%arg0: i32) -> (i32, i32) {
    %c0_i32 = arith.constant 0 : i32
    %c0_i32_0 = arith.constant 0 : i32
    %c0_i32_1 = arith.constant 0 : i32
    return %c0_i32, %c0_i32_0 : i32, i32
  }
  func.func @transform_24(%arg0: i32) -> (i32, i32, i32) {
    %c0_i32 = arith.constant 0 : i32
    %c0_i32_0 = arith.constant 0 : i32
    %c0_i32_1 = arith.constant 0 : i32
    return %arg0, %c0_i32, %c0_i32_0 : i32, i32, i32
  }
}

module attributes {stable_mosaic.version = 11 : i64} {
  func.func @_decoder_layer_kernel(%arg0: i32, %arg1: memref<1x8x32xf32, #tpu.memory_space<vmem>>, %arg2: memref<1x8x32xf32, #tpu.memory_space<vmem>>, %arg3: memref<1x8x8xbf16, #tpu.memory_space<vmem>>, %arg4: memref<1x8x8xbf16, #tpu.memory_space<vmem>>, %arg5: memref<32x96xbf16, #tpu.memory_space<vmem>>, %arg6: memref<1x96xf32, #tpu.memory_space<vmem>>, %arg7: memref<32x32xbf16, #tpu.memory_space<vmem>>, %arg8: memref<1x32xf32, #tpu.memory_space<vmem>>, %arg9: memref<32x32xbf16, #tpu.memory_space<vmem>>, %arg10: memref<1x32xf32, #tpu.memory_space<vmem>>, %arg11: memref<32x64xbf16, #tpu.memory_space<vmem>>, %arg12: memref<1x64xf32, #tpu.memory_space<vmem>>, %arg13: memref<32x32xbf16, #tpu.memory_space<vmem>>, %arg14: memref<1x32xf32, #tpu.memory_space<vmem>>, %arg15: memref<32x64xbf16, #tpu.memory_space<vmem>>, %arg16: memref<1x64xf32, #tpu.memory_space<vmem>>, %arg17: memref<64x32xbf16, #tpu.memory_space<vmem>>, %arg18: memref<1x32xf32, #tpu.memory_space<vmem>>, %arg19: memref<1x32xf32, #tpu.memory_space<vmem>>, %arg20: memref<1x32xf32, #tpu.memory_space<vmem>>, %arg21: memref<1x32xf32, #tpu.memory_space<vmem>>, %arg22: memref<1x32xf32, #tpu.memory_space<vmem>>, %arg23: memref<1x32xf32, #tpu.memory_space<vmem>>, %arg24: memref<1x32xf32, #tpu.memory_space<vmem>>, %arg25: memref<1x8x32xf32, #tpu.memory_space<vmem>>) attributes {dimension_semantics = [#tpu.dimension_semantics<parallel>], iteration_bounds = array<i64: 2>, scalar_prefetch = 0 : i64, scratch_operands = 0 : i64, tpu.core_type = #tpu.core_type<tc>, window_params = [{transform_indices = @transform_0, window_bounds = array<i64: 1, 8, 32>}, {transform_indices = @transform_1, window_bounds = array<i64: 1, 8, 32>}, {transform_indices = @transform_2, window_bounds = array<i64: 1, 8, 8>}, {transform_indices = @transform_3, window_bounds = array<i64: 1, 8, 8>}, {pipeline_mode = #tpu.pipeline_mode<synchronous>, transform_indices = @transform_4, window_bounds = array<i64: 32, 96>}, {pipeline_mode = #tpu.pipeline_mode<synchronous>, transform_indices = @transform_5, window_bounds = array<i64: 1, 96>}, {pipeline_mode = #tpu.pipeline_mode<synchronous>, transform_indices = @transform_6, window_bounds = array<i64: 32, 32>}, {pipeline_mode = #tpu.pipeline_mode<synchronous>, transform_indices = @transform_7, window_bounds = array<i64: 1, 32>}, {pipeline_mode = #tpu.pipeline_mode<synchronous>, transform_indices = @transform_8, window_bounds = array<i64: 32, 32>}, {pipeline_mode = #tpu.pipeline_mode<synchronous>, transform_indices = @transform_9, window_bounds = array<i64: 1, 32>}, {pipeline_mode = #tpu.pipeline_mode<synchronous>, transform_indices = @transform_10, window_bounds = array<i64: 32, 64>}, {pipeline_mode = #tpu.pipeline_mode<synchronous>, transform_indices = @transform_11, window_bounds = array<i64: 1, 64>}, {pipeline_mode = #tpu.pipeline_mode<synchronous>, transform_indices = @transform_12, window_bounds = array<i64: 32, 32>}, {pipeline_mode = #tpu.pipeline_mode<synchronous>, transform_indices = @transform_13, window_bounds = array<i64: 1, 32>}, {pipeline_mode = #tpu.pipeline_mode<synchronous>, transform_indices = @transform_14, window_bounds = array<i64: 32, 64>}, {pipeline_mode = #tpu.pipeline_mode<synchronous>, transform_indices = @transform_15, window_bounds = array<i64: 1, 64>}, {pipeline_mode = #tpu.pipeline_mode<synchronous>, transform_indices = @transform_16, window_bounds = array<i64: 64, 32>}, {pipeline_mode = #tpu.pipeline_mode<synchronous>, transform_indices = @transform_17, window_bounds = array<i64: 1, 32>}, {pipeline_mode = #tpu.pipeline_mode<synchronous>, transform_indices = @transform_18, window_bounds = array<i64: 1, 32>}, {pipeline_mode = #tpu.pipeline_mode<synchronous>, transform_indices = @transform_19, window_bounds = array<i64: 1, 32>}, {pipeline_mode = #tpu.pipeline_mode<synchronous>, transform_indices = @transform_20, window_bounds = array<i64: 1, 32>}, {pipeline_mode = #tpu.pipeline_mode<synchronous>, transform_indices = @transform_21, window_bounds = array<i64: 1, 32>}, {pipeline_mode = #tpu.pipeline_mode<synchronous>, transform_indices = @transform_22, window_bounds = array<i64: 1, 32>}, {pipeline_mode = #tpu.pipeline_mode<synchronous>, transform_indices = @transform_23, window_bounds = array<i64: 1, 32>}, {transform_indices = @transform_24, window_bounds = array<i64: 1, 8, 32>}]} {
    %c0 = arith.constant 0 : index
    %c0_0 = arith.constant 0 : index
    %c0_1 = arith.constant 0 : index
    %0 = vector.load %arg1[%c0, %c0_0, %c0_1] : memref<1x8x32xf32, #tpu.memory_space<vmem>>, vector<1x8x32xf32>
    %1 = vector.shape_cast %0 : vector<1x8x32xf32> to vector<8x32xf32>
    %c0_2 = arith.constant 0 : index
    %c0_3 = arith.constant 0 : index
    %c0_4 = arith.constant 0 : index
    %2 = vector.load %arg2[%c0_2, %c0_3, %c0_4] : memref<1x8x32xf32, #tpu.memory_space<vmem>>, vector<1x8x32xf32>
    %3 = vector.shape_cast %2 : vector<1x8x32xf32> to vector<8x32xf32>
    %c0_5 = arith.constant 0 : index
    %c0_6 = arith.constant 0 : index
    %c0_7 = arith.constant 0 : index
    %4 = vector.load %arg3[%c0_5, %c0_6, %c0_7] : memref<1x8x8xbf16, #tpu.memory_space<vmem>>, vector<1x8x8xbf16>
    %5 = vector.shape_cast %4 : vector<1x8x8xbf16> to vector<8x8xbf16>
    %6 = arith.extf %5 : vector<8x8xbf16> to vector<8x8xf32>
    %cst = arith.constant 1.000000e+00 : f32
    %7 = vector.broadcast %cst : f32 to vector<8x8xf32>
    %8 = arith.subf %6, %7 : vector<8x8xf32>
    %cst_8 = arith.constant 1.000000e+09 : f32
    %9 = vector.broadcast %cst_8 : f32 to vector<8x8xf32>
    %10 = arith.mulf %8, %9 : vector<8x8xf32>
    %c0_9 = arith.constant 0 : index
    %c0_10 = arith.constant 0 : index
    %c0_11 = arith.constant 0 : index
    %11 = vector.load %arg4[%c0_9, %c0_10, %c0_11] : memref<1x8x8xbf16, #tpu.memory_space<vmem>>, vector<1x8x8xbf16>
    %12 = vector.shape_cast %11 : vector<1x8x8xbf16> to vector<8x8xbf16>
    %13 = arith.extf %12 : vector<8x8xbf16> to vector<8x8xf32>
    %cst_12 = arith.constant 1.000000e+00 : f32
    %14 = vector.broadcast %cst_12 : f32 to vector<8x8xf32>
    %15 = arith.subf %13, %14 : vector<8x8xf32>
    %cst_13 = arith.constant 1.000000e+09 : f32
    %16 = vector.broadcast %cst_13 : f32 to vector<8x8xf32>
    %17 = arith.mulf %15, %16 : vector<8x8xf32>
    %18 = arith.truncf %1 : vector<8x32xf32> to vector<8x32xbf16>
    %c0_14 = arith.constant 0 : index
    %c0_15 = arith.constant 0 : index
    %19 = vector.load %arg5[%c0_14, %c0_15] : memref<32x96xbf16, #tpu.memory_space<vmem>>, vector<32x96xbf16>
    %cst_16 = arith.constant dense<0.000000e+00> : vector<8x96xf32>
    %20 = tpu.matmul %18, %19, %cst_16 {dimension_numbers = #tpu.dot_dimension_numbers<[1], [0], [0], [1], [0, 0, 1, 1], [], []>} : vector<8x32xbf16>, vector<32x96xbf16>, vector<8x96xf32> -> vector<8x96xf32>
    %c0_17 = arith.constant 0 : index
    %c0_18 = arith.constant 0 : index
    %21 = vector.load %arg6[%c0_17, %c0_18] : memref<1x96xf32, #tpu.memory_space<vmem>>, vector<1x96xf32>
    %22 = vector.broadcast %21 : vector<1x96xf32> to vector<8x96xf32>
    %23 = arith.addf %20, %22 : vector<8x96xf32>
    %24 = vector.extract_strided_slice %23 {offsets = [0, 0], sizes = [8, 8], strides = [1, 1]} : vector<8x96xf32> to vector<8x8xf32>
    %25 = vector.extract_strided_slice %23 {offsets = [0, 8], sizes = [8, 8], strides = [1, 1]} : vector<8x96xf32> to vector<8x8xf32>
    %26 = vector.extract_strided_slice %23 {offsets = [0, 16], sizes = [8, 8], strides = [1, 1]} : vector<8x96xf32> to vector<8x8xf32>
    %27 = vector.extract_strided_slice %23 {offsets = [0, 24], sizes = [8, 8], strides = [1, 1]} : vector<8x96xf32> to vector<8x8xf32>
    %28 = vector.shape_cast %24 : vector<8x8xf32> to vector<1x8x8xf32>
    %29 = vector.shape_cast %25 : vector<8x8xf32> to vector<1x8x8xf32>
    %30 = vector.shape_cast %26 : vector<8x8xf32> to vector<1x8x8xf32>
    %31 = vector.shape_cast %27 : vector<8x8xf32> to vector<1x8x8xf32>
    %32 = tpu.concatenate %28, %29, %30, %31 in 0 : vector<1x8x8xf32>, vector<1x8x8xf32>, vector<1x8x8xf32>, vector<1x8x8xf32> -> vector<4x8x8xf32>
    %33 = vector.extract_strided_slice %23 {offsets = [0, 32], sizes = [8, 8], strides = [1, 1]} : vector<8x96xf32> to vector<8x8xf32>
    %34 = vector.extract_strided_slice %23 {offsets = [0, 40], sizes = [8, 8], strides = [1, 1]} : vector<8x96xf32> to vector<8x8xf32>
    %35 = vector.extract_strided_slice %23 {offsets = [0, 48], sizes = [8, 8], strides = [1, 1]} : vector<8x96xf32> to vector<8x8xf32>
    %36 = vector.extract_strided_slice %23 {offsets = [0, 56], sizes = [8, 8], strides = [1, 1]} : vector<8x96xf32> to vector<8x8xf32>
    %37 = vector.shape_cast %33 : vector<8x8xf32> to vector<1x8x8xf32>
    %38 = vector.shape_cast %34 : vector<8x8xf32> to vector<1x8x8xf32>
    %39 = vector.shape_cast %35 : vector<8x8xf32> to vector<1x8x8xf32>
    %40 = vector.shape_cast %36 : vector<8x8xf32> to vector<1x8x8xf32>
    %41 = tpu.concatenate %37, %38, %39, %40 in 0 : vector<1x8x8xf32>, vector<1x8x8xf32>, vector<1x8x8xf32>, vector<1x8x8xf32> -> vector<4x8x8xf32>
    %42 = vector.extract_strided_slice %23 {offsets = [0, 64], sizes = [8, 8], strides = [1, 1]} : vector<8x96xf32> to vector<8x8xf32>
    %43 = vector.extract_strided_slice %23 {offsets = [0, 72], sizes = [8, 8], strides = [1, 1]} : vector<8x96xf32> to vector<8x8xf32>
    %44 = vector.extract_strided_slice %23 {offsets = [0, 80], sizes = [8, 8], strides = [1, 1]} : vector<8x96xf32> to vector<8x8xf32>
    %45 = vector.extract_strided_slice %23 {offsets = [0, 88], sizes = [8, 8], strides = [1, 1]} : vector<8x96xf32> to vector<8x8xf32>
    %46 = vector.shape_cast %42 : vector<8x8xf32> to vector<1x8x8xf32>
    %47 = vector.shape_cast %43 : vector<8x8xf32> to vector<1x8x8xf32>
    %48 = vector.shape_cast %44 : vector<8x8xf32> to vector<1x8x8xf32>
    %49 = vector.shape_cast %45 : vector<8x8xf32> to vector<1x8x8xf32>
    %50 = tpu.concatenate %46, %47, %48, %49 in 0 : vector<1x8x8xf32>, vector<1x8x8xf32>, vector<1x8x8xf32>, vector<1x8x8xf32> -> vector<4x8x8xf32>
    %cst_19 = arith.constant 0.353553385 : f32
    %51 = vector.broadcast %cst_19 : f32 to vector<4x8x8xf32>
    %52 = arith.mulf %32, %51 : vector<4x8x8xf32>
    %53 = arith.truncf %52 : vector<4x8x8xf32> to vector<4x8x8xbf16>
    %54 = arith.truncf %41 : vector<4x8x8xf32> to vector<4x8x8xbf16>
    "tpu.trace_start"() <{level = 10 : i32, message = "hqd,hkd->hqk"}> : () -> ()
    %cst_20 = arith.constant dense<0.000000e+00> : vector<4x8x8xf32>
    %55 = tpu.matmul %53, %54, %cst_20 {dimension_numbers = #tpu.dot_dimension_numbers<[2], [2], [1], [1], [0, 0, 0, 1, 1, 1], [0], [0]>} : vector<4x8x8xbf16>, vector<4x8x8xbf16>, vector<4x8x8xf32> -> vector<4x8x8xf32>
    "tpu.trace_stop"() : () -> ()
    %56 = vector.shape_cast %10 : vector<8x8xf32> to vector<1x8x8xf32>
    %57 = vector.broadcast %56 : vector<1x8x8xf32> to vector<4x8x8xf32>
    %58 = arith.addf %55, %57 : vector<4x8x8xf32>
    %cst_21 = arith.constant dense<0xFF800000> : vector<4x8xf32>
    %59 = vector.multi_reduction <maximumf>, %58, %cst_21 [2] : vector<4x8x8xf32> to vector<4x8xf32>
    %60 = vector.shape_cast %59 : vector<4x8xf32> to vector<4x8x1xf32>
    %61 = vector.broadcast %60 : vector<4x8x1xf32> to vector<4x8x8xf32>
    %62 = arith.subf %58, %61 : vector<4x8x8xf32>
    %63 = math.exp %62 : vector<4x8x8xf32>
    %cst_22 = arith.constant dense<0.000000e+00> : vector<4x8xf32>
    %64 = vector.multi_reduction <add>, %63, %cst_22 [2] : vector<4x8x8xf32> to vector<4x8xf32>
    %65 = vector.shape_cast %64 : vector<4x8xf32> to vector<4x8x1xf32>
    %66 = arith.truncf %63 : vector<4x8x8xf32> to vector<4x8x8xbf16>
    %67 = arith.truncf %50 : vector<4x8x8xf32> to vector<4x8x8xbf16>
    "tpu.trace_start"() <{level = 10 : i32, message = "hqk,hkd->hqd"}> : () -> ()
    %cst_23 = arith.constant dense<0.000000e+00> : vector<4x8x8xf32>
    %68 = tpu.matmul %66, %67, %cst_23 {dimension_numbers = #tpu.dot_dimension_numbers<[2], [1], [1], [2], [0, 0, 0, 1, 1, 2], [0], [0]>} : vector<4x8x8xbf16>, vector<4x8x8xbf16>, vector<4x8x8xf32> -> vector<4x8x8xf32>
    "tpu.trace_stop"() : () -> ()
    %69 = tpu.reciprocal %65 {approx = true} : vector<4x8x1xf32> -> vector<4x8x1xf32>
    %70 = vector.broadcast %69 : vector<4x8x1xf32> to vector<4x8x8xf32>
    %71 = arith.mulf %68, %70 : vector<4x8x8xf32>
    %72 = vector.extract_strided_slice %71 {offsets = [0, 0, 0], sizes = [1, 8, 8], strides = [1, 1, 1]} : vector<4x8x8xf32> to vector<1x8x8xf32>
    %73 = vector.shape_cast %72 : vector<1x8x8xf32> to vector<8x8xf32>
    %74 = vector.extract_strided_slice %71 {offsets = [1, 0, 0], sizes = [1, 8, 8], strides = [1, 1, 1]} : vector<4x8x8xf32> to vector<1x8x8xf32>
    %75 = vector.shape_cast %74 : vector<1x8x8xf32> to vector<8x8xf32>
    %76 = vector.extract_strided_slice %71 {offsets = [2, 0, 0], sizes = [1, 8, 8], strides = [1, 1, 1]} : vector<4x8x8xf32> to vector<1x8x8xf32>
    %77 = vector.shape_cast %76 : vector<1x8x8xf32> to vector<8x8xf32>
    %78 = vector.extract_strided_slice %71 {offsets = [3, 0, 0], sizes = [1, 8, 8], strides = [1, 1, 1]} : vector<4x8x8xf32> to vector<1x8x8xf32>
    %79 = vector.shape_cast %78 : vector<1x8x8xf32> to vector<8x8xf32>
    %80 = tpu.concatenate %73, %75, %77, %79 in 1 : vector<8x8xf32>, vector<8x8xf32>, vector<8x8xf32>, vector<8x8xf32> -> vector<8x32xf32>
    %81 = arith.truncf %80 : vector<8x32xf32> to vector<8x32xbf16>
    %c0_24 = arith.constant 0 : index
    %c0_25 = arith.constant 0 : index
    %82 = vector.load %arg7[%c0_24, %c0_25] : memref<32x32xbf16, #tpu.memory_space<vmem>>, vector<32x32xbf16>
    %cst_26 = arith.constant dense<0.000000e+00> : vector<8x32xf32>
    %83 = tpu.matmul %81, %82, %cst_26 {dimension_numbers = #tpu.dot_dimension_numbers<[1], [0], [0], [1], [0, 0, 1, 1], [], []>} : vector<8x32xbf16>, vector<32x32xbf16>, vector<8x32xf32> -> vector<8x32xf32>
    %c0_27 = arith.constant 0 : index
    %c0_28 = arith.constant 0 : index
    %84 = vector.load %arg8[%c0_27, %c0_28] : memref<1x32xf32, #tpu.memory_space<vmem>>, vector<1x32xf32>
    %85 = vector.broadcast %84 : vector<1x32xf32> to vector<8x32xf32>
    %86 = arith.addf %83, %85 : vector<8x32xf32>
    %87 = arith.addf %1, %86 : vector<8x32xf32>
    %cst_29 = arith.constant dense<0.000000e+00> : vector<8xf32>
    %88 = vector.multi_reduction <add>, %87, %cst_29 [1] : vector<8x32xf32> to vector<8xf32>
    %89 = vector.shape_cast %88 : vector<8xf32> to vector<8x1xf32>
    %cst_30 = arith.constant 3.200000e+01 : f32
    %90 = vector.broadcast %cst_30 : f32 to vector<8x1xf32>
    %91 = arith.divf %89, %90 : vector<8x1xf32>
    %92 = vector.broadcast %91 : vector<8x1xf32> to vector<8x32xf32>
    %93 = arith.subf %87, %92 : vector<8x32xf32>
    %94 = arith.mulf %93, %93 : vector<8x32xf32>
    %cst_31 = arith.constant dense<0.000000e+00> : vector<8xf32>
    %95 = vector.multi_reduction <add>, %94, %cst_31 [1] : vector<8x32xf32> to vector<8xf32>
    %96 = vector.shape_cast %95 : vector<8xf32> to vector<8x1xf32>
    %cst_32 = arith.constant 3.200000e+01 : f32
    %97 = vector.broadcast %cst_32 : f32 to vector<8x1xf32>
    %98 = arith.divf %96, %97 : vector<8x1xf32>
    %cst_33 = arith.constant 9.99999974E-6 : f32
    %99 = vector.broadcast %cst_33 : f32 to vector<8x1xf32>
    %100 = arith.addf %98, %99 : vector<8x1xf32>
    %101 = math.rsqrt %100 : vector<8x1xf32>
    %102 = vector.broadcast %101 : vector<8x1xf32> to vector<8x32xf32>
    %103 = arith.mulf %93, %102 : vector<8x32xf32>
    %c0_34 = arith.constant 0 : index
    %c0_35 = arith.constant 0 : index
    %104 = vector.load %arg19[%c0_34, %c0_35] : memref<1x32xf32, #tpu.memory_space<vmem>>, vector<1x32xf32>
    %105 = vector.broadcast %104 : vector<1x32xf32> to vector<8x32xf32>
    %106 = arith.mulf %103, %105 : vector<8x32xf32>
    %c0_36 = arith.constant 0 : index
    %c0_37 = arith.constant 0 : index
    %107 = vector.load %arg20[%c0_36, %c0_37] : memref<1x32xf32, #tpu.memory_space<vmem>>, vector<1x32xf32>
    %108 = vector.broadcast %107 : vector<1x32xf32> to vector<8x32xf32>
    %109 = arith.addf %106, %108 : vector<8x32xf32>
    %110 = arith.truncf %109 : vector<8x32xf32> to vector<8x32xbf16>
    %c0_38 = arith.constant 0 : index
    %c0_39 = arith.constant 0 : index
    %111 = vector.load %arg9[%c0_38, %c0_39] : memref<32x32xbf16, #tpu.memory_space<vmem>>, vector<32x32xbf16>
    %cst_40 = arith.constant dense<0.000000e+00> : vector<8x32xf32>
    %112 = tpu.matmul %110, %111, %cst_40 {dimension_numbers = #tpu.dot_dimension_numbers<[1], [0], [0], [1], [0, 0, 1, 1], [], []>} : vector<8x32xbf16>, vector<32x32xbf16>, vector<8x32xf32> -> vector<8x32xf32>
    %c0_41 = arith.constant 0 : index
    %c0_42 = arith.constant 0 : index
    %113 = vector.load %arg10[%c0_41, %c0_42] : memref<1x32xf32, #tpu.memory_space<vmem>>, vector<1x32xf32>
    %114 = vector.broadcast %113 : vector<1x32xf32> to vector<8x32xf32>
    %115 = arith.addf %112, %114 : vector<8x32xf32>
    %116 = arith.truncf %3 : vector<8x32xf32> to vector<8x32xbf16>
    %c0_43 = arith.constant 0 : index
    %c0_44 = arith.constant 0 : index
    %117 = vector.load %arg11[%c0_43, %c0_44] : memref<32x64xbf16, #tpu.memory_space<vmem>>, vector<32x64xbf16>
    %cst_45 = arith.constant dense<0.000000e+00> : vector<8x64xf32>
    %118 = tpu.matmul %116, %117, %cst_45 {dimension_numbers = #tpu.dot_dimension_numbers<[1], [0], [0], [1], [0, 0, 1, 1], [], []>} : vector<8x32xbf16>, vector<32x64xbf16>, vector<8x64xf32> -> vector<8x64xf32>
    %c0_46 = arith.constant 0 : index
    %c0_47 = arith.constant 0 : index
    %119 = vector.load %arg12[%c0_46, %c0_47] : memref<1x64xf32, #tpu.memory_space<vmem>>, vector<1x64xf32>
    %120 = vector.broadcast %119 : vector<1x64xf32> to vector<8x64xf32>
    %121 = arith.addf %118, %120 : vector<8x64xf32>
    %122 = vector.extract_strided_slice %115 {offsets = [0, 0], sizes = [8, 8], strides = [1, 1]} : vector<8x32xf32> to vector<8x8xf32>
    %123 = vector.extract_strided_slice %115 {offsets = [0, 8], sizes = [8, 8], strides = [1, 1]} : vector<8x32xf32> to vector<8x8xf32>
    %124 = vector.extract_strided_slice %115 {offsets = [0, 16], sizes = [8, 8], strides = [1, 1]} : vector<8x32xf32> to vector<8x8xf32>
    %125 = vector.extract_strided_slice %115 {offsets = [0, 24], sizes = [8, 8], strides = [1, 1]} : vector<8x32xf32> to vector<8x8xf32>
    %126 = vector.shape_cast %122 : vector<8x8xf32> to vector<1x8x8xf32>
    %127 = vector.shape_cast %123 : vector<8x8xf32> to vector<1x8x8xf32>
    %128 = vector.shape_cast %124 : vector<8x8xf32> to vector<1x8x8xf32>
    %129 = vector.shape_cast %125 : vector<8x8xf32> to vector<1x8x8xf32>
    %130 = tpu.concatenate %126, %127, %128, %129 in 0 : vector<1x8x8xf32>, vector<1x8x8xf32>, vector<1x8x8xf32>, vector<1x8x8xf32> -> vector<4x8x8xf32>
    %131 = vector.extract_strided_slice %121 {offsets = [0, 0], sizes = [8, 8], strides = [1, 1]} : vector<8x64xf32> to vector<8x8xf32>
    %132 = vector.extract_strided_slice %121 {offsets = [0, 8], sizes = [8, 8], strides = [1, 1]} : vector<8x64xf32> to vector<8x8xf32>
    %133 = vector.extract_strided_slice %121 {offsets = [0, 16], sizes = [8, 8], strides = [1, 1]} : vector<8x64xf32> to vector<8x8xf32>
    %134 = vector.extract_strided_slice %121 {offsets = [0, 24], sizes = [8, 8], strides = [1, 1]} : vector<8x64xf32> to vector<8x8xf32>
    %135 = vector.shape_cast %131 : vector<8x8xf32> to vector<1x8x8xf32>
    %136 = vector.shape_cast %132 : vector<8x8xf32> to vector<1x8x8xf32>
    %137 = vector.shape_cast %133 : vector<8x8xf32> to vector<1x8x8xf32>
    %138 = vector.shape_cast %134 : vector<8x8xf32> to vector<1x8x8xf32>
    %139 = tpu.concatenate %135, %136, %137, %138 in 0 : vector<1x8x8xf32>, vector<1x8x8xf32>, vector<1x8x8xf32>, vector<1x8x8xf32> -> vector<4x8x8xf32>
    %140 = vector.extract_strided_slice %121 {offsets = [0, 32], sizes = [8, 8], strides = [1, 1]} : vector<8x64xf32> to vector<8x8xf32>
    %141 = vector.extract_strided_slice %121 {offsets = [0, 40], sizes = [8, 8], strides = [1, 1]} : vector<8x64xf32> to vector<8x8xf32>
    %142 = vector.extract_strided_slice %121 {offsets = [0, 48], sizes = [8, 8], strides = [1, 1]} : vector<8x64xf32> to vector<8x8xf32>
    %143 = vector.extract_strided_slice %121 {offsets = [0, 56], sizes = [8, 8], strides = [1, 1]} : vector<8x64xf32> to vector<8x8xf32>
    %144 = vector.shape_cast %140 : vector<8x8xf32> to vector<1x8x8xf32>
    %145 = vector.shape_cast %141 : vector<8x8xf32> to vector<1x8x8xf32>
    %146 = vector.shape_cast %142 : vector<8x8xf32> to vector<1x8x8xf32>
    %147 = vector.shape_cast %143 : vector<8x8xf32> to vector<1x8x8xf32>
    %148 = tpu.concatenate %144, %145, %146, %147 in 0 : vector<1x8x8xf32>, vector<1x8x8xf32>, vector<1x8x8xf32>, vector<1x8x8xf32> -> vector<4x8x8xf32>
    %cst_48 = arith.constant 0.353553385 : f32
    %149 = vector.broadcast %cst_48 : f32 to vector<4x8x8xf32>
    %150 = arith.mulf %130, %149 : vector<4x8x8xf32>
    %151 = arith.truncf %150 : vector<4x8x8xf32> to vector<4x8x8xbf16>
    %152 = arith.truncf %139 : vector<4x8x8xf32> to vector<4x8x8xbf16>
    "tpu.trace_start"() <{level = 10 : i32, message = "hqd,hkd->hqk"}> : () -> ()
    %cst_49 = arith.constant dense<0.000000e+00> : vector<4x8x8xf32>
    %153 = tpu.matmul %151, %152, %cst_49 {dimension_numbers = #tpu.dot_dimension_numbers<[2], [2], [1], [1], [0, 0, 0, 1, 1, 1], [0], [0]>} : vector<4x8x8xbf16>, vector<4x8x8xbf16>, vector<4x8x8xf32> -> vector<4x8x8xf32>
    "tpu.trace_stop"() : () -> ()
    %154 = vector.shape_cast %17 : vector<8x8xf32> to vector<1x8x8xf32>
    %155 = vector.broadcast %154 : vector<1x8x8xf32> to vector<4x8x8xf32>
    %156 = arith.addf %153, %155 : vector<4x8x8xf32>
    %cst_50 = arith.constant dense<0xFF800000> : vector<4x8xf32>
    %157 = vector.multi_reduction <maximumf>, %156, %cst_50 [2] : vector<4x8x8xf32> to vector<4x8xf32>
    %158 = vector.shape_cast %157 : vector<4x8xf32> to vector<4x8x1xf32>
    %159 = vector.broadcast %158 : vector<4x8x1xf32> to vector<4x8x8xf32>
    %160 = arith.subf %156, %159 : vector<4x8x8xf32>
    %161 = math.exp %160 : vector<4x8x8xf32>
    %cst_51 = arith.constant dense<0.000000e+00> : vector<4x8xf32>
    %162 = vector.multi_reduction <add>, %161, %cst_51 [2] : vector<4x8x8xf32> to vector<4x8xf32>
    %163 = vector.shape_cast %162 : vector<4x8xf32> to vector<4x8x1xf32>
    %164 = arith.truncf %161 : vector<4x8x8xf32> to vector<4x8x8xbf16>
    %165 = arith.truncf %148 : vector<4x8x8xf32> to vector<4x8x8xbf16>
    "tpu.trace_start"() <{level = 10 : i32, message = "hqk,hkd->hqd"}> : () -> ()
    %cst_52 = arith.constant dense<0.000000e+00> : vector<4x8x8xf32>
    %166 = tpu.matmul %164, %165, %cst_52 {dimension_numbers = #tpu.dot_dimension_numbers<[2], [1], [1], [2], [0, 0, 0, 1, 1, 2], [0], [0]>} : vector<4x8x8xbf16>, vector<4x8x8xbf16>, vector<4x8x8xf32> -> vector<4x8x8xf32>
    "tpu.trace_stop"() : () -> ()
    %167 = tpu.reciprocal %163 {approx = true} : vector<4x8x1xf32> -> vector<4x8x1xf32>
    %168 = vector.broadcast %167 : vector<4x8x1xf32> to vector<4x8x8xf32>
    %169 = arith.mulf %166, %168 : vector<4x8x8xf32>
    %170 = vector.extract_strided_slice %169 {offsets = [0, 0, 0], sizes = [1, 8, 8], strides = [1, 1, 1]} : vector<4x8x8xf32> to vector<1x8x8xf32>
    %171 = vector.shape_cast %170 : vector<1x8x8xf32> to vector<8x8xf32>
    %172 = vector.extract_strided_slice %169 {offsets = [1, 0, 0], sizes = [1, 8, 8], strides = [1, 1, 1]} : vector<4x8x8xf32> to vector<1x8x8xf32>
    %173 = vector.shape_cast %172 : vector<1x8x8xf32> to vector<8x8xf32>
    %174 = vector.extract_strided_slice %169 {offsets = [2, 0, 0], sizes = [1, 8, 8], strides = [1, 1, 1]} : vector<4x8x8xf32> to vector<1x8x8xf32>
    %175 = vector.shape_cast %174 : vector<1x8x8xf32> to vector<8x8xf32>
    %176 = vector.extract_strided_slice %169 {offsets = [3, 0, 0], sizes = [1, 8, 8], strides = [1, 1, 1]} : vector<4x8x8xf32> to vector<1x8x8xf32>
    %177 = vector.shape_cast %176 : vector<1x8x8xf32> to vector<8x8xf32>
    %178 = tpu.concatenate %171, %173, %175, %177 in 1 : vector<8x8xf32>, vector<8x8xf32>, vector<8x8xf32>, vector<8x8xf32> -> vector<8x32xf32>
    %179 = arith.truncf %178 : vector<8x32xf32> to vector<8x32xbf16>
    %c0_53 = arith.constant 0 : index
    %c0_54 = arith.constant 0 : index
    %180 = vector.load %arg13[%c0_53, %c0_54] : memref<32x32xbf16, #tpu.memory_space<vmem>>, vector<32x32xbf16>
    %cst_55 = arith.constant dense<0.000000e+00> : vector<8x32xf32>
    %181 = tpu.matmul %179, %180, %cst_55 {dimension_numbers = #tpu.dot_dimension_numbers<[1], [0], [0], [1], [0, 0, 1, 1], [], []>} : vector<8x32xbf16>, vector<32x32xbf16>, vector<8x32xf32> -> vector<8x32xf32>
    %c0_56 = arith.constant 0 : index
    %c0_57 = arith.constant 0 : index
    %182 = vector.load %arg14[%c0_56, %c0_57] : memref<1x32xf32, #tpu.memory_space<vmem>>, vector<1x32xf32>
    %183 = vector.broadcast %182 : vector<1x32xf32> to vector<8x32xf32>
    %184 = arith.addf %181, %183 : vector<8x32xf32>
    %185 = arith.addf %109, %184 : vector<8x32xf32>
    %cst_58 = arith.constant dense<0.000000e+00> : vector<8xf32>
    %186 = vector.multi_reduction <add>, %185, %cst_58 [1] : vector<8x32xf32> to vector<8xf32>
    %187 = vector.shape_cast %186 : vector<8xf32> to vector<8x1xf32>
    %cst_59 = arith.constant 3.200000e+01 : f32
    %188 = vector.broadcast %cst_59 : f32 to vector<8x1xf32>
    %189 = arith.divf %187, %188 : vector<8x1xf32>
    %190 = vector.broadcast %189 : vector<8x1xf32> to vector<8x32xf32>
    %191 = arith.subf %185, %190 : vector<8x32xf32>
    %192 = arith.mulf %191, %191 : vector<8x32xf32>
    %cst_60 = arith.constant dense<0.000000e+00> : vector<8xf32>
    %193 = vector.multi_reduction <add>, %192, %cst_60 [1] : vector<8x32xf32> to vector<8xf32>
    %194 = vector.shape_cast %193 : vector<8xf32> to vector<8x1xf32>
    %cst_61 = arith.constant 3.200000e+01 : f32
    %195 = vector.broadcast %cst_61 : f32 to vector<8x1xf32>
    %196 = arith.divf %194, %195 : vector<8x1xf32>
    %cst_62 = arith.constant 9.99999974E-6 : f32
    %197 = vector.broadcast %cst_62 : f32 to vector<8x1xf32>
    %198 = arith.addf %196, %197 : vector<8x1xf32>
    %199 = math.rsqrt %198 : vector<8x1xf32>
    %200 = vector.broadcast %199 : vector<8x1xf32> to vector<8x32xf32>
    %201 = arith.mulf %191, %200 : vector<8x32xf32>
    %c0_63 = arith.constant 0 : index
    %c0_64 = arith.constant 0 : index
    %202 = vector.load %arg21[%c0_63, %c0_64] : memref<1x32xf32, #tpu.memory_space<vmem>>, vector<1x32xf32>
    %203 = vector.broadcast %202 : vector<1x32xf32> to vector<8x32xf32>
    %204 = arith.mulf %201, %203 : vector<8x32xf32>
    %c0_65 = arith.constant 0 : index
    %c0_66 = arith.constant 0 : index
    %205 = vector.load %arg22[%c0_65, %c0_66] : memref<1x32xf32, #tpu.memory_space<vmem>>, vector<1x32xf32>
    %206 = vector.broadcast %205 : vector<1x32xf32> to vector<8x32xf32>
    %207 = arith.addf %204, %206 : vector<8x32xf32>
    %208 = arith.truncf %207 : vector<8x32xf32> to vector<8x32xbf16>
    %c0_67 = arith.constant 0 : index
    %c0_68 = arith.constant 0 : index
    %209 = vector.load %arg15[%c0_67, %c0_68] : memref<32x64xbf16, #tpu.memory_space<vmem>>, vector<32x64xbf16>
    %cst_69 = arith.constant dense<0.000000e+00> : vector<8x64xf32>
    %210 = tpu.matmul %208, %209, %cst_69 {dimension_numbers = #tpu.dot_dimension_numbers<[1], [0], [0], [1], [0, 0, 1, 1], [], []>} : vector<8x32xbf16>, vector<32x64xbf16>, vector<8x64xf32> -> vector<8x64xf32>
    %c0_70 = arith.constant 0 : index
    %c0_71 = arith.constant 0 : index
    %211 = vector.load %arg16[%c0_70, %c0_71] : memref<1x64xf32, #tpu.memory_space<vmem>>, vector<1x64xf32>
    %212 = vector.broadcast %211 : vector<1x64xf32> to vector<8x64xf32>
    %213 = arith.addf %210, %212 : vector<8x64xf32>
    %cst_72 = arith.constant 0.000000e+00 : f32
    %214 = vector.broadcast %cst_72 : f32 to vector<8x64xf32>
    %215 = arith.maximumf %213, %214 : vector<8x64xf32>
    %216 = arith.truncf %215 : vector<8x64xf32> to vector<8x64xbf16>
    %c0_73 = arith.constant 0 : index
    %c0_74 = arith.constant 0 : index
    %217 = vector.load %arg17[%c0_73, %c0_74] : memref<64x32xbf16, #tpu.memory_space<vmem>>, vector<64x32xbf16>
    %cst_75 = arith.constant dense<0.000000e+00> : vector<8x32xf32>
    %218 = tpu.matmul %216, %217, %cst_75 {dimension_numbers = #tpu.dot_dimension_numbers<[1], [0], [0], [1], [0, 0, 1, 1], [], []>} : vector<8x64xbf16>, vector<64x32xbf16>, vector<8x32xf32> -> vector<8x32xf32>
    %c0_76 = arith.constant 0 : index
    %c0_77 = arith.constant 0 : index
    %219 = vector.load %arg18[%c0_76, %c0_77] : memref<1x32xf32, #tpu.memory_space<vmem>>, vector<1x32xf32>
    %220 = vector.broadcast %219 : vector<1x32xf32> to vector<8x32xf32>
    %221 = arith.addf %218, %220 : vector<8x32xf32>
    %222 = arith.addf %207, %221 : vector<8x32xf32>
    %cst_78 = arith.constant dense<0.000000e+00> : vector<8xf32>
    %223 = vector.multi_reduction <add>, %222, %cst_78 [1] : vector<8x32xf32> to vector<8xf32>
    %224 = vector.shape_cast %223 : vector<8xf32> to vector<8x1xf32>
    %cst_79 = arith.constant 3.200000e+01 : f32
    %225 = vector.broadcast %cst_79 : f32 to vector<8x1xf32>
    %226 = arith.divf %224, %225 : vector<8x1xf32>
    %227 = vector.broadcast %226 : vector<8x1xf32> to vector<8x32xf32>
    %228 = arith.subf %222, %227 : vector<8x32xf32>
    %229 = arith.mulf %228, %228 : vector<8x32xf32>
    %cst_80 = arith.constant dense<0.000000e+00> : vector<8xf32>
    %230 = vector.multi_reduction <add>, %229, %cst_80 [1] : vector<8x32xf32> to vector<8xf32>
    %231 = vector.shape_cast %230 : vector<8xf32> to vector<8x1xf32>
    %cst_81 = arith.constant 3.200000e+01 : f32
    %232 = vector.broadcast %cst_81 : f32 to vector<8x1xf32>
    %233 = arith.divf %231, %232 : vector<8x1xf32>
    %cst_82 = arith.constant 9.99999974E-6 : f32
    %234 = vector.broadcast %cst_82 : f32 to vector<8x1xf32>
    %235 = arith.addf %233, %234 : vector<8x1xf32>
    %236 = math.rsqrt %235 : vector<8x1xf32>
    %237 = vector.broadcast %236 : vector<8x1xf32> to vector<8x32xf32>
    %238 = arith.mulf %228, %237 : vector<8x32xf32>
    %c0_83 = arith.constant 0 : index
    %c0_84 = arith.constant 0 : index
    %239 = vector.load %arg23[%c0_83, %c0_84] : memref<1x32xf32, #tpu.memory_space<vmem>>, vector<1x32xf32>
    %240 = vector.broadcast %239 : vector<1x32xf32> to vector<8x32xf32>
    %241 = arith.mulf %238, %240 : vector<8x32xf32>
    %c0_85 = arith.constant 0 : index
    %c0_86 = arith.constant 0 : index
    %242 = vector.load %arg24[%c0_85, %c0_86] : memref<1x32xf32, #tpu.memory_space<vmem>>, vector<1x32xf32>
    %243 = vector.broadcast %242 : vector<1x32xf32> to vector<8x32xf32>
    %244 = arith.addf %241, %243 : vector<8x32xf32>
    %c0_87 = arith.constant 0 : index
    %c0_88 = arith.constant 0 : index
    %c0_89 = arith.constant 0 : index
    %245 = vector.load %arg25[%c0_87, %c0_88, %c0_89] : memref<1x8x32xf32, #tpu.memory_space<vmem>>, vector<1x8x32xf32>
    %246 = vector.shape_cast %245 : vector<1x8x32xf32> to vector<8x32xf32>
    %247 = vector.shape_cast %244 : vector<8x32xf32> to vector<1x8x32xf32>
    tpu.vector_store %arg25[%c0_87, %c0_88, %c0_89], %247 {strides = array<i32>} : memref<1x8x32xf32, #tpu.memory_space<vmem>>, vector<1x8x32xf32>,
    return
  }
  func.func @transform_0(%arg0: i32) -> (i32, i32, i32) {
    %c0_i32 = arith.constant 0 : i32
    %c0_i32_0 = arith.constant 0 : i32
    %c0_i32_1 = arith.constant 0 : i32
    return %arg0, %c0_i32, %c0_i32_0 : i32, i32, i32
  }
  func.func @transform_1(%arg0: i32) -> (i32, i32, i32) {
    %c0_i32 = arith.constant 0 : i32
    %c0_i32_0 = arith.constant 0 : i32
    %c0_i32_1 = arith.constant 0 : i32
    return %arg0, %c0_i32, %c0_i32_0 : i32, i32, i32
  }
  func.func @transform_2(%arg0: i32) -> (i32, i32, i32) {
    %c0_i32 = arith.constant 0 : i32
    %c0_i32_0 = arith.constant 0 : i32
    %c0_i32_1 = arith.constant 0 : i32
    return %arg0, %c0_i32, %c0_i32_0 : i32, i32, i32
  }
  func.func @transform_3(%arg0: i32) -> (i32, i32, i32) {
    %c0_i32 = arith.constant 0 : i32
    %c0_i32_0 = arith.constant 0 : i32
    %c0_i32_1 = arith.constant 0 : i32
    return %arg0, %c0_i32, %c0_i32_0 : i32, i32, i32
  }
  func.func @transform_4(%arg0: i32) -> (i32, i32) {
    %c0_i32 = arith.constant 0 : i32
    %c0_i32_0 = arith.constant 0 : i32
    %c0_i32_1 = arith.constant 0 : i32
    return %c0_i32, %c0_i32_0 : i32, i32
  }
  func.func @transform_5(%arg0: i32) -> (i32, i32) {
    %c0_i32 = arith.constant 0 : i32
    %c0_i32_0 = arith.constant 0 : i32
    %c0_i32_1 = arith.constant 0 : i32
    return %c0_i32, %c0_i32_0 : i32, i32
  }
  func.func @transform_6(%arg0: i32) -> (i32, i32) {
    %c0_i32 = arith.constant 0 : i32
    %c0_i32_0 = arith.constant 0 : i32
    %c0_i32_1 = arith.constant 0 : i32
    return %c0_i32, %c0_i32_0 : i32, i32
  }
  func.func @transform_7(%arg0: i32) -> (i32, i32) {
    %c0_i32 = arith.constant 0 : i32
    %c0_i32_0 = arith.constant 0 : i32
    %c0_i32_1 = arith.constant 0 : i32
    return %c0_i32, %c0_i32_0 : i32, i32
  }
  func.func @transform_8(%arg0: i32) -> (i32, i32) {
    %c0_i32 = arith.constant 0 : i32
    %c0_i32_0 = arith.constant 0 : i32
    %c0_i32_1 = arith.constant 0 : i32
    return %c0_i32, %c0_i32_0 : i32, i32
  }
  func.func @transform_9(%arg0: i32) -> (i32, i32) {
    %c0_i32 = arith.constant 0 : i32
    %c0_i32_0 = arith.constant 0 : i32
    %c0_i32_1 = arith.constant 0 : i32
    return %c0_i32, %c0_i32_0 : i32, i32
  }
  func.func @transform_10(%arg0: i32) -> (i32, i32) {
    %c0_i32 = arith.constant 0 : i32
    %c0_i32_0 = arith.constant 0 : i32
    %c0_i32_1 = arith.constant 0 : i32
    return %c0_i32, %c0_i32_0 : i32, i32
  }
  func.func @transform_11(%arg0: i32) -> (i32, i32) {
    %c0_i32 = arith.constant 0 : i32
    %c0_i32_0 = arith.constant 0 : i32
    %c0_i32_1 = arith.constant 0 : i32
    return %c0_i32, %c0_i32_0 : i32, i32
  }
  func.func @transform_12(%arg0: i32) -> (i32, i32) {
    %c0_i32 = arith.constant 0 : i32
    %c0_i32_0 = arith.constant 0 : i32
    %c0_i32_1 = arith.constant 0 : i32
    return %c0_i32, %c0_i32_0 : i32, i32
  }
  func.func @transform_13(%arg0: i32) -> (i32, i32) {
    %c0_i32 = arith.constant 0 : i32
    %c0_i32_0 = arith.constant 0 : i32
    %c0_i32_1 = arith.constant 0 : i32
    return %c0_i32, %c0_i32_0 : i32, i32
  }
  func.func @transform_14(%arg0: i32) -> (i32, i32) {
    %c0_i32 = arith.constant 0 : i32
    %c0_i32_0 = arith.constant 0 : i32
    %c0_i32_1 = arith.constant 0 : i32
    return %c0_i32, %c0_i32_0 : i32, i32
  }
  func.func @transform_15(%arg0: i32) -> (i32, i32) {
    %c0_i32 = arith.constant 0 : i32
    %c0_i32_0 = arith.constant 0 : i32
    %c0_i32_1 = arith.constant 0 : i32
    return %c0_i32, %c0_i32_0 : i32, i32
  }
  func.func @transform_16(%arg0: i32) -> (i32, i32) {
    %c0_i32 = arith.constant 0 : i32
    %c0_i32_0 = arith.constant 0 : i32
    %c0_i32_1 = arith.constant 0 : i32
    return %c0_i32, %c0_i32_0 : i32, i32
  }
  func.func @transform_17(%arg0: i32) -> (i32, i32) {
    %c0_i32 = arith.constant 0 : i32
    %c0_i32_0 = arith.constant 0 : i32
    %c0_i32_1 = arith.constant 0 : i32
    return %c0_i32, %c0_i32_0 : i32, i32
  }
  func.func @transform_18(%arg0: i32) -> (i32, i32) {
    %c0_i32 = arith.constant 0 : i32
    %c0_i32_0 = arith.constant 0 : i32
    %c0_i32_1 = arith.constant 0 : i32
    return %c0_i32, %c0_i32_0 : i32, i32
  }
  func.func @transform_19(%arg0: i32) -> (i32, i32) {
    %c0_i32 = arith.constant 0 : i32
    %c0_i32_0 = arith.constant 0 : i32
    %c0_i32_1 = arith.constant 0 : i32
    return %c0_i32, %c0_i32_0 : i32, i32
  }
  func.func @transform_20(%arg0: i32) -> (i32, i32) {
    %c0_i32 = arith.constant 0 : i32
    %c0_i32_0 = arith.constant 0 : i32
    %c0_i32_1 = arith.constant 0 : i32
    return %c0_i32, %c0_i32_0 : i32, i32
  }
  func.func @transform_21(%arg0: i32) -> (i32, i32) {
    %c0_i32 = arith.constant 0 : i32
    %c0_i32_0 = arith.constant 0 : i32
    %c0_i32_1 = arith.constant 0 : i32
    return %c0_i32, %c0_i32_0 : i32, i32
  }
  func.func @transform_22(%arg0: i32) -> (i32, i32) {
    %c0_i32 = arith.constant 0 : i32
    %c0_i32_0 = arith.constant 0 : i32
    %c0_i32_1 = arith.constant 0 : i32
    return %c0_i32, %c0_i32_0 : i32, i32
  }
  func.func @transform_23(%arg0: i32) -> (i32, i32) {
    %c0_i32 = arith.constant 0 : i32
    %c0_i32_0 = arith.constant 0 : i32
    %c0_i32_1 = arith.constant 0 : i32
    return %c0_i32, %c0_i32_0 : i32, i32
  }
  func.func @transform_24(%arg0: i32) -> (i32, i32, i32) {
    %c0_i32 = arith.constant 0 : i32
    %c0_i32_0 = arith.constant 0 : i32
    %c0_i32_1 = arith.constant 0 : i32
    return %arg0, %c0_i32, %c0_i32_0 : i32, i32, i32
  }
}

</mosaic_0001>

<bundles_post_ra>
// kernel: tpu_custom_call.1
= control target key start
LH: loop header
LB: loop body
LE: loop exit
PB: predicated region body
PF: predicated region fallthrough
CT: control target
= control target key end

     0   :  { %s4033_s0 = inlined_call_operand.vmem [shape: f32[2,8,32], index: 0, kind: input, shape index: {}]   ;;  %s4034_s1 = inlined_call_operand.vmem [shape: f32[2,8,32], index: 1, kind: input, shape index: {}]   ;;  %s4035_s2 = inlined_call_operand.hbm [shape: bf16[2,8,8], index: 2, kind: input, shape index: {}]   ;;  %s4036_s3 = inlined_call_operand.hbm [shape: bf16[2,8,8], index: 3, kind: input, shape index: {}]   ;;  %s4037_s4 = inlined_call_operand.vmem [shape: bf16[32,96], index: 4, kind: input, shape index: {}]   ;;  %s4038_s5 = inlined_call_operand.vmem [shape: f32[1,96], index: 5, kind: input, shape index: {}]   ;;  %s4039_s6 = inlined_call_operand.hbm [shape: bf16[32,32], index: 6, kind: input, shape index: {}]   ;;  %s4040_s7 = inlined_call_operand.vmem [shape: f32[1,32], index: 7, kind: input, shape index: {}]   ;;  %s4041_s8 = inlined_call_operand.hbm [shape: bf16[32,32], index: 8, kind: input, shape index: {}]   ;;  %s4042_s9 = inlined_call_operand.vmem [shape: f32[1,32], index: 9, kind: input, shape index: {}]   ;;  %s4043_s10 = inlined_call_operand.hbm [shape: bf16[32,64], index: 10, kind: input, shape index: {}]   ;;  %s4044_s11 = inlined_call_operand.vmem [shape: f32[1,64], index: 11, kind: input, shape index: {}]   ;;  %s4045_s12 = inlined_call_operand.hbm [shape: bf16[32,32], index: 12, kind: input, shape index: {}]   ;;  %s4046_s13 = inlined_call_operand.vmem [shape: f32[1,32], index: 13, kind: input, shape index: {}]   ;;  %s4047_s14 = inlined_call_operand.hbm [shape: bf16[32,64], index: 14, kind: input, shape index: {}]   ;;  %s4048_s15 = inlined_call_operand.vmem [shape: f32[1,64], index: 15, kind: input, shape index: {}]   ;;  %s4049_s16 = inlined_call_operand.vmem [shape: bf16[64,32], index: 16, kind: input, shape index: {}]   ;;  %s4050_s17 = inlined_call_operand.vmem [shape: f32[1,32], index: 17, kind: input, shape index: {}]   ;;  %s4051_s18 = inlined_call_operand.vmem [shape: f32[1,32], index: 18, kind: input, shape index: {}]   ;;  %s4052_s19 = inlined_call_operand.vmem [shape: f32[1,32], index: 19, kind: input, shape index: {}]   ;;  %s4053_s20 = inlined_call_operand.vmem [shape: f32[1,32], index: 20, kind: input, shape index: {}]   ;;  %s4054_s21 = inlined_call_operand.vmem [shape: f32[1,32], index: 21, kind: input, shape index: {}]   ;;  %s4055_s22 = inlined_call_operand.vmem [shape: f32[1,32], index: 22, kind: input, shape index: {}]   ;;  %s4056_s23 = inlined_call_operand.vmem [shape: f32[1,32], index: 23, kind: input, shape index: {}]   ;;  %s4057_s24 = inlined_call_operand.hbm [shape: f32[2,8,32], index: 24, kind: output, shape index: {}]  }
   0x1   :  { %4073 = sst [smem:[#allocation27_spill]] %s4033_s0 }
   0x2   :  { %4074 = sst [smem:[#allocation28_spill]] %s4034_s1 }
   0x3   :  { %4075 = sst [smem:[#allocation29_spill]] %s4035_s2 }
   0x4   :  { %4076 = sst [smem:[#allocation30_spill]] %s4036_s3 }
   0x5   :  { %4077 = sst [smem:[#allocation31_spill]] %s4037_s4 }
   0x6   :  { %4078 = sst [smem:[#allocation32_spill]] %s4038_s5 }
   0x7   :  { %4079 = sst [smem:[#allocation33_spill]] %s4039_s6 }
   0x8   :  { %4080 = sst [smem:[#allocation34_spill]] %s4040_s7 }
   0x9   :  { %4081 = sst [smem:[#allocation35_spill]] %s4041_s8 }
   0xa   :  { %4082 = sst [smem:[#allocation36_spill]] %s4043_s10 }
   0xb   :  { %4083 = sst [smem:[#allocation37_spill]] %s4045_s12 }
   0xc   :  { %4084 = sst [smem:[#allocation38_spill]] %s4047_s14 }
   0xd   :  { %4085 = sst [smem:[#allocation39_spill]] %s4048_s15 }
   0xe   :  { %4086 = sst [smem:[#allocation40_spill]] %s4050_s17 }
   0xf   :  { %4087 = sst [smem:[#allocation41_spill]] %s4055_s22 }
  0x10   :  { %4088 = sst [smem:[#allocation42_spill]] %s4056_s23 }
  0x11   :  { %4089 = sst [smem:[#allocation43_spill]] %s4057_s24 }
  0x12   :  { %29 = vsyncpa [#allocation3], 0 }
  0x13   :  { %31 = vsyncpa [#allocation3 + $0x1], 0 }
  0x14   :  { %32 = vsyncpa [#allocation6], 0 }
  0x15   :  { %34 = vsyncpa [#allocation6 + $0x1], 0 }
  0x16   :  { %35 = vsyncpa [#allocation9], 0 }
  0x17   :  { %36 = vsyncpa [#allocation12], 0 }
  0x18   :  { %37 = vsyncpa [#allocation4], 0 }
  0x19   :  { %39 = vsyncpa [#allocation4 + $0x1], 0  ;;  %s3490_s5 = smov 0   ;;  %s3492_s26 = smov 0  }
  0x1a   :  { %s3494_s27 = smov 0   ;;  %s3496_s28 = smov 0  }
  0x1b LB: > { %4090 = sst [smem:[#allocation21_spill]] %s3331_s5  ;;  %s3345_s6 = smov [#allocation7]   ;;  %s3343_s28 = sphi %s3496_s28, %s4134_s28   ;;  %s3339_s27 = sphi %s3494_s27, %s4136_s27   ;;  %s3335_s26 = sphi %s3492_s26, %s4138_s26   ;;  %s3331_s5 = sphi %s3490_s5, %s4137_s5  }
  0x1c   : > { %4091 = sst [smem:[#allocation22_spill]] %s3339_s27  ;;  %s618_s2 = sshll.u32 %s3345_s6, 4  ;;  %s619_s2 = int_to_ptr.vmem [resolvable:$true] %s618_s2 }
  0x1d   : > { %s3511_s29 = sadd.s32 4294967295, %s3343_s28   ;;  %p2618_p0 = scmp.ge.s32.totalorder %s3343_s28, 1 }
  0x1e   : > { %p4069_p1 = scmp.eq.s32.totalorder %s3511_s29, 0  ;;  %p600_p2 = scmp.lt.s32.totalorder %s3343_s28, 3 }
  0x1f   : > { %s3346_s7 = smov [#allocation8]   ;;  %s3347_s25 = smov [#allocation11]  }
  0x20   : > { %p3516_p3 = pnand %p2618_p0, %p600_p2  ;;  %s634_s30 = sshll.u32 %s3346_s7, 4  ;;  %s3529_s30 = int_to_ptr.vmem [resolvable:$true] %s634_s30 }
  0x21   : > { %s666_s8 = sshll.u32 %s3347_s25, 4  ;;  %s3088_s1 = scalar_lea.vmem %s619_s2, 256  ;;  %s3531_s8 = int_to_ptr.vmem [resolvable:$true] %s666_s8 }
  0x22   : > { %s4092_s0 = scalar_select %p3516_p3, 1, 0 }
  0x23   : > { %p2935_p5 = pneg %p3516_p3  ;;  %p3089_p8 = scmp.ne.s32.totalorder %s619_s2, %s3088_s1 }
  0x24   : > { %p3096_p11 = scmp.lt.s32.totalorder %s619_s2, %s619_s2  ;;  %p3097_p12 = scmp.lt.s32.totalorder %s3088_s1, %s3088_s1 }
  0x25   : > { %p3525_p6 = pnand %p2935_p5, %p4069_p1 }
  0x26   : > { %p3098_p13 = por %p3097_p12, %p3096_p11 }
  0x27   : > { %p3535_p7 = pneg %p3525_p6 }
  0x29   : > { %p3091_p9 = pnand %p3089_p8, %p3535_p7 }
  0x2b   : > { %p3092_p10 = pneg %p3091_p9 }
  0x2d   : > { %p3099_p0 = pnand %p3098_p13, %p3092_p10 }
  0x2f   : > { %3102 = shalt.err (!%p3099_p0)
}
  0x30   : > { %s3348_s6 = smov 64   ;;  %s3349_s7 = smov 4  }
  0x31   : > { %s4095_s23 = sld [smem:[#allocation33_spill]]  ;;  %s3114_s22 = scalar_lea.vmem %s3529_s30, 256 }
  0x32   : > { %p3115_p2 = scmp.ne.s32.totalorder %s3529_s30, %s3114_s22  ;;  %p3122_p9 = scmp.lt.s32.totalorder %s3529_s30, %s3529_s30 }
  0x33   : > { %p3123_p10 = scmp.lt.s32.totalorder %s3114_s22, %s3114_s22 }
  0x34   : > { %p3117_p5 = pnand %p3115_p2, %p3535_p7 }
  0x35   : > { %p3124_p11 = por %p3123_p10, %p3122_p9 }
  0x36   : > { %p3118_p8 = pneg %p3117_p5 }
  0x37   : > { %2938 = dma.hbm_to_vmem [thread:$0]  (!%p3525_p6), %s4095_s23, 256, %s619_s2, [#allocation6], %s3348_s6, %s3348_s6, %s3349_s7  }
  0x38   : > { %p3125_p12 = pnand %p3124_p11, %p3118_p8 }
  0x3a   : > { %3128 = shalt.err (!%p3125_p12)
}
  0x3b   : > { %s4096_s23 = sld [smem:[#allocation35_spill]]  ;;  %s3140_s2 = scalar_lea.vmem %s3531_s8, 256 }
  0x3c   : > { %p3141_p13 = scmp.ne.s32.totalorder %s3531_s8, %s3140_s2  ;;  %p3148_p5 = scmp.lt.s32.totalorder %s3531_s8, %s3531_s8 }
  0x3d   : > { %p3149_p8 = scmp.lt.s32.totalorder %s3140_s2, %s3140_s2 }
  0x3e   : > { %p3143_p0 = pnand %p3141_p13, %p3535_p7 }
  0x3f   : > { %p3150_p9 = por %p3149_p8, %p3148_p5 }
  0x40   : > { %p3144_p2 = pneg %p3143_p0 }
  0x41   : > { %2941 = dma.hbm_to_vmem [thread:$0]  (!%p3525_p6), %s4096_s23, 256, %s3529_s30, [#allocation9], %s3348_s6, %s3348_s6, %s3349_s7  }
  0x42   : > { %p3151_p10 = pnand %p3150_p9, %p3144_p2 }
  0x44   : > { %3154 = shalt.err (!%p3151_p10)
}
  0x45   : > { %s4097_s12 = sld [smem:[#allocation37_spill]]  ;;  %s3350_s30 = smov [#allocation10]  }
  0x46   : > { %s650_s1 = sshll.u32 %s3350_s30, 4  ;;  %s3351_s24 = smov [#allocation13]   ;;  %s651_s1 = int_to_ptr.vmem [resolvable:$true] %s650_s1 }
  0x47   : > { %s682_s23 = sshll.u32 %s3351_s24, 4  ;;  %s3166_s2 = scalar_lea.vmem %s651_s1, 256  ;;  %s683_s23 = int_to_ptr.vmem [resolvable:$true] %s682_s23 }
  0x48   : > { %p3167_p11 = scmp.ne.s32.totalorder %s651_s1, %s3166_s2  ;;  %p3174_p0 = scmp.lt.s32.totalorder %s651_s1, %s651_s1 }
  0x49   : > { %p3175_p2 = scmp.lt.s32.totalorder %s3166_s2, %s3166_s2 }
  0x4a   : > { %p3169_p12 = pnand %p3167_p11, %p3535_p7 }
  0x4b   : > { %2947 = dma.hbm_to_vmem [thread:$0]  (!%p3525_p6), %s4097_s12, 256, %s3531_s8, [#allocation12], %s3348_s6, %s3348_s6, %s3349_s7  }
  0x4c   : > { %p3170_p13 = pneg %p3169_p12  ;;  %p3176_p5 = por %p3175_p2, %p3174_p0 }
  0x4e   : > { %p3177_p8 = pnand %p3176_p5, %p3170_p13 }
  0x50   : > { %3180 = shalt.err (!%p3177_p8)
}
  0x51   : > { %s4098_s10 = sld [smem:[#allocation36_spill]]  ;;  %s3192_s25 = scalar_lea.vmem %s683_s23, 256 }
  0x52   : > { %p3193_p9 = scmp.ne.s32.totalorder %s683_s23, %s3192_s25  ;;  %p3200_p12 = scmp.lt.s32.totalorder %s683_s23, %s683_s23 }
  0x53   : > { %p3201_p0 = scmp.lt.s32.totalorder %s3192_s25, %s3192_s25 }
  0x54   : > { %p3195_p10 = pnand %p3193_p9, %p3535_p7 }
  0x55   : > { %p3202_p13 = por %p3201_p0, %p3200_p12 }
  0x56   : > { %p3196_p11 = pneg %p3195_p10 }
  0x57   : > { %2944 = dma.hbm_to_vmem [thread:$0]  (!%p3525_p6), %s4098_s10, 256, %s651_s1, [#allocation9], %s3348_s6, %s3348_s6, %s3349_s7  }
  0x58   : > { %p3203_p2 = pnand %p3202_p13, %p3196_p11 }
  0x5a   : > { %3206 = shalt.err (!%p3203_p2)
}
  0x5b   : > { %s4099_s14 = sld [smem:[#allocation38_spill]]  ;;  %s2617_s3 = sadd.s32 4294967294, %s3343_s28  }
  0x5c   : > { %s3601_s4 = sadd.s32 1, %s3343_s28   ;;  %s104_s1 = sadd.s32 1, %s3339_s27 }
  0x5d   : > { %4100 = sst [smem:[#allocation23_spill]] %s3601_s4  ;;  %s101_s2 = ssub.s32 %s3343_s28, %s3601_s4 }
  0x5e   : > { %p111_p7 = scmp.ne.s32.totalorder %s3339_s27, %s3335_s26  ;;  %p102_p5 = scmp.eq.s32.totalorder %s101_s2, 0 }
  0x5f   : > { %p112_p8 = scmp.eq.s32.totalorder %s3343_s28, 0  ;;  %p117_p9 = scmp.ne.s32.totalorder %s3335_s26, %s3331_s5 }
  0x60   : > { %p587_p10 = scmp.eq.s32.totalorder %s3511_s29, 1  ;;  %p593_p0 = scmp.eq.s32.totalorder %s2617_s3, 1 }
  0x61   : > { %2950 = dma.hbm_to_vmem [thread:$0]  (!%p3525_p6), %s4099_s14, 256, %s683_s23, [#allocation12], %s3348_s6, %s3348_s6, %s3349_s7  }
  0x62   : > { %s3613_s8 = scalar_select %p102_p5, %s3339_s27, %s104_s1  }
  0x63   : > { %p113_p11 = por %p112_p8, %p111_p7  ;;  %p3617_p12 = por %p4069_p1, %p117_p9 }
  0x64   : > { %4101 = sst [smem:[#allocation24_spill]] %s3613_s8  ;;  %p3621_p6 = por %p587_p10, %p111_p7 }
  0x65   : > { %s4102_s22 = scalar_select %p3617_p12, 1, 0 }
  0x66   : > { %s4103_s6 = scalar_select %p3621_p6, 1, 0 }
  0x67   : > { %p2967_p13 = scmp.lt.s32.totalorder %s3343_s28, 2  ;;  %s737_s7 = sand.u32 1, %s3339_s27  }
  0x68   : > { %4104 = sst [smem:[#allocation25_spill]] %s4103_s6  ;;  %p3627_p2 = por %p593_p0, %p117_p9 }
  0x69   : > { %s3631_s25 = sshll.u32 %s737_s7, 2  ;;  %s2626_s30 = sshll.u32 %s3343_s28, 6 }
  0x6a   : > { %s4105_s23 = scalar_select %p3627_p2, 1, 0 }
  0x6b   : > { %s4107_s2 = sld [smem:[#allocation29_spill]]  ;;  %s741_s12 = scalar_lea.vmem [#allocation2], %s3631_s25 }
  0x6c   : > { %4106 = sst [smem:[#allocation26_spill]] %s4105_s23  ;;  %s748_s3 = sshll.u32 %s741_s12, 4  ;;  %s749_s3 = int_to_ptr.vmem [resolvable:$true] %s748_s3 }
  0x6d   : > { %p3640_p7 = pnand %p2967_p13, %p113_p11  ;;  %s4109_s4 = sld [smem:[#allocation30_spill]] }
  0x6e   : > { %s738_s24 = scalar_lea.sflag [#allocation3], %s737_s7 }
  0x6f   : > { %p3209_p8 = pneg %p3640_p7 }
  0x71   : > { %s3637_s10 = scalar_lea.hbm %s4107_s2, %s2626_s30  ;;  %s3212_s6 = scalar_lea.hbm %s4107_s2, 128 }
  0x72   : > { %s3207_s1 = scalar_lea.hbm %s3637_s10, 64  ;;  %p3213_p11 = scmp.lt.s32.totalorder %s3637_s10, %s4107_s2 }
  0x73   : > { %s3647_s23 = scalar_lea.hbm %s4109_s4, %s2626_s30  ;;  %p3208_p5 = scmp.ne.s32.totalorder %s3637_s10, %s3207_s1 }
  0x74   : > { %p3214_p0 = scmp.lt.s32.totalorder %s3212_s6, %s3207_s1 }
  0x75   : > { %p3210_p9 = pnand %p3209_p8, %p3208_p5 }
  0x76   : > { %p3215_p13 = por %p3214_p0, %p3213_p11 }
  0x77   : > { %p3211_p10 = pneg %p3210_p9 }
  0x79   : > { %p3216_p4 = pnand %p3215_p13, %p3211_p10 }
  0x7b   : > { %3219 = shalt.err (!%p3216_p4)
}
  0x7c   : > { %s3220_s27 = scalar_lea.vmem %s749_s3, 64  ;;  %s3352_s8 = smov [#allocation2]  }
  0x7d   : > { %p3221_p1 = scmp.ne.s32.totalorder %s749_s3, %s3220_s27  ;;  %s3225_s7 = sshll.u32 %s3352_s8, 4  ;;  %s3226_s7 = int_to_ptr.vmem [resolvable:$false] %s3225_s7 }
  0x7e   : > { %s3227_s5 = scalar_lea.vmem %s3226_s7, 128  ;;  %p3228_p9 = scmp.lt.s32.totalorder %s749_s3, %s3226_s7 }
  0x7f   : > { %p3223_p2 = pnand %p3221_p1, %p3209_p8  ;;  %p3229_p6 = scmp.lt.s32.totalorder %s3227_s5, %s3220_s27 }
  0x81   : > { %p3224_p5 = pneg %p3223_p2  ;;  %p3230_p12 = por %p3229_p6, %p3228_p9 }
  0x83   : > { %p3231_p3 = pnand %p3230_p12, %p3224_p5 }
  0x85   : > { %3234 = shalt.err (!%p3231_p3)
}
  0x86   : > { %2954 = dma.hbm_to_vmem [thread:$0]  (!%p3640_p7), %s3637_s10, 64, %s749_s3, %s738_s24  }
  0x87   : > { %s755_s15 = sand.u32 1, %s3343_s28   ;;  %s759_s17 = scalar_lea.vmem [#allocation5], %s3631_s25 }
  0x88   : > { %s766_s6 = sshll.u32 %s759_s17, 4  ;;  %s756_s30 = scalar_lea.sflag [#allocation6], %s755_s15  ;;  %s767_s6 = int_to_ptr.vmem [resolvable:$true] %s766_s6 }
  0x89   : > { %s3235_s1 = scalar_lea.hbm %s3647_s23, 64  ;;  %s3240_s8 = scalar_lea.hbm %s4109_s4, 128 }
  0x8a   : > { %p3236_p1 = scmp.ne.s32.totalorder %s3647_s23, %s3235_s1  ;;  %p3241_p12 = scmp.lt.s32.totalorder %s3647_s23, %s4109_s4 }
  0x8b   : > { %p3242_p6 = scmp.lt.s32.totalorder %s3240_s8, %s3235_s1 }
  0x8c   : > { %p3238_p3 = pnand %p3236_p1, %p3209_p8 }
  0x8d   : > { %p3243_p2 = por %p3242_p6, %p3241_p12 }
  0x8e   : > { %p3239_p4 = pneg %p3238_p3 }
  0x90   : > { %p3244_p10 = pnand %p3243_p2, %p3239_p4 }
  0x92   : > { %3247 = shalt.err (!%p3244_p10)
}
  0x93   : > { %s3248_s10 = scalar_lea.vmem %s767_s6, 64  ;;  %s3353_s25 = smov [#allocation5]  }
  0x94   : > { %p3249_p11 = scmp.ne.s32.totalorder %s767_s6, %s3248_s10  ;;  %s3253_s3 = sshll.u32 %s3353_s25, 4  ;;  %s3254_s3 = int_to_ptr.vmem [resolvable:$false] %s3253_s3 }
  0x95   : > { %s3255_s24 = scalar_lea.vmem %s3254_s3, 128  ;;  %p3256_p5 = scmp.lt.s32.totalorder %s767_s6, %s3254_s3 }
  0x96   : > { %p3251_p0 = pnand %p3249_p11, %p3209_p8  ;;  %p3257_p9 = scmp.lt.s32.totalorder %s3255_s24, %s3248_s10 }
  0x98   : > { %p3252_p13 = pneg %p3251_p0  ;;  %p3258_p1 = por %p3257_p9, %p3256_p5 }
  0x9a   : > { %p3259_p3 = pnand %p3258_p1, %p3252_p13 }
  0x9c   : > { %3262 = shalt.err (!%p3259_p3)
}
  0x9d   : > { %2957 = dma.hbm_to_vmem [thread:$0]  (!%p3640_p7), %s3647_s23, 64, %s767_s6, %s756_s30  }
  0x9e   : > { %p4110_p4 = scmp.ne.s32.totalorder %s4092_s0, 0 }
  0x9f   : > { %s3692_s15 = sand.u32 (!%p4110_p4), 1, %s3335_s26   ;;  %p4111_p8 = scmp.ne.s32.totalorder (!%p4110_p4), %s4102_s22, 0 }
  0xa0   : > { %775 = sbr.rel (%p4110_p4) target bundleno = 4075 (0xfeb), region = 116  ;;  %s2630_s17 = sshll.u32 (!%p4110_p4), %s3692_s15, 2 }
  0xa1   : > { %s778_s1 = scalar_lea.sflag (!%p4110_p4), [#allocation3], %s3692_s15  ;;  %s3696_s12 = scalar_lea.vmem (!%p4110_p4), [#allocation2], %s2630_s17 }
  0xa5   : > { %3306 = dma.done.wait (%p4111_p8), %s778_s1, 64  }
  0xa6   : > { %3308 = vsyncadd (%p4111_p8), %s778_s1, 4294967232  ;;  %s786_s14 = sand.u32 1, %s3511_s29   ;;  %s3703_s23 = scalar_lea.vmem [#allocation5], %s2630_s17 }
  0xa7   : > { %s787_s0 = scalar_lea.sflag [#allocation6], %s786_s14 }
  0xa8   : > { %3310 = dma.done.wait (%p4111_p8), %s787_s0, 64  }
  0xa9   : > { %3312 = vsyncadd (%p4111_p8), %s787_s0, 4294967232  ;;  %p4112_p7 = scmp.eq.s32.totalorder %s3511_s29, 0 }
  0xab   : > { %3314 = dma.done.wait (%p4112_p7), [#allocation6], 256   ;;  %p4113_p12 = pmov %p4112_p7 }
  0xac   : > { %p4114_p6 = pmov %p4112_p7 }
  0xad   : > { %3316 = vsyncadd (%p4113_p12), [#allocation6], 4294967040 }
  0xae   : > { %3318 = dma.done.wait (%p4114_p6), [#allocation9], 512   ;;  %p4115_p2 = pmov %p4114_p6 }
  0xb0   : > { %3320 = vsyncadd (%p4115_p2), [#allocation9], 4294966784  ;;  %p4116_p10 = pmov %p4115_p2 }
  0xb1   : > { %p4117_p11 = pmov %p4115_p2 }
  0xb2   : > { %3322 = dma.done.wait (%p4116_p10), [#allocation12], 512  }
  0xb3   : > { %3324 = vsyncadd (%p4117_p11), [#allocation12], 4294966784  ;;  %p888_p0 = scmp.lt.s32.totalorder %s3511_s29, 1  ;;  %v3354_v0 = vmov 0.0   ;;  %vm3355_vm0 = vmmov 0   ;;  %s4118_s8 = sld [smem:[#allocation27_spill]] }
  0xb4   : > { %2753 = vmatprep.subr.bf16.mxu1 %v3354_v0  ;;  %2757 = vmatprep.mubr.msk.bf16.mxu1 %vm3355_vm0, %v3354_v0  ;;  %s4119_s25 = sld [smem:[#allocation31_spill]]  ;;  %vm931_vm1 = vcmask 261120   ;;  %s3356_s0 = smov 104   ;;  %vm1000_vm2 = vcmask 64512   ;;  %v899_v34 = vld [vmem:[%s3696_s12] sm:$0xf] }
  0xb5   : > { %s3726_s22 = scalar_select %p888_p0, %s3511_s29, 1  ;;  %2767 = vmatprep.subr.bf16.mxu0 %v3354_v0  ;;  %2769 = vmatprep.mubr.msk.bf16.mxu0 %vm3355_vm0, %v3354_v0  ;;  %v900_v35 = vunpack.c.l.bf16 %v899_v34  ;;  %vm1239_vm3 = vcmask 1043456   ;;  %vm1448_vm4 = vcmask 130048   ;;  %vm1450_vm5 = vcmask 195584  }
  0xb6   : > { %s4120_s14 = sld [smem:[#allocation32_spill]]  ;;  %s3357_s30 = smov 120   ;;  %vm2364_vm6 = vcmask 523264  }
  0xb7   : > { %s2638_s6 = sshll.u32 %s3726_s22, 3  ;;  %s3358_s27 = smov 112   ;;  %v2640_v36 = vadd.f32 -1.0, %v900_v35 }
  0xb8   : > { %s3361_s12 = smov 8   ;;  %s3362_s5 = smov 16  }
  0xb9   : > { %s891_s7 = scalar_lea.vmem %s4118_s8, %s2638_s6  ;;  %s3359_s8 = smov 96   ;;  %v902_v37 = vmul.f32 1e+09, %v2640_v36 }
  0xba   : > { %v3023_v1 = vld [vmem:[%s4119_s25 + $0x8] sm:$0xff]   ;;  %v3024_v2 = vld [vmem:[%s4119_s25] sm:$0xff]   ;;  %s3363_s10 = smov 24   ;;  %s4121_s17 = sld [smem:[#allocation34_spill]] }
  0xbb   : > { %2754 = vmatpush3.bf16.msra.mxu1 %v3023_v1  ;;  %v3743_v3 = vld [vmem:[%s891_s7] sm:$0xff]  ;;  %s3360_s7 = smov 64   ;;  %s4126_s22 = sld [smem:[#allocation41_spill]] }
  0xbc   : > { %2755 = vmatprep.subr.bf16.mxu1 %v3354_v0  ;;  %v907_v4 = vpack.c.bf16 %v3743_v3, %v3743_v3  ;;  %v2642_v5 = vld [vmem:[%s4120_s14] ss:$0 sm:$0xff]  ;;  %s2695_s1 = sshll.u32 %s3511_s29, 7 }
  0xbf   : > { %2756 = vmatpush3.bf16.msra.mxu1 %v3024_v2 }
  0xc0   : > { %2761 = vmatprep.subr.bf16.mxu1 %v3354_v0 }
  0xc2   : > { %2758 = vmatmul.mubr.msk.bf16.vlgmr.msra.gmra.mxu1 %vm931_vm1, %v907_v4 }
  0xc3   : > { %2763 = vmatprep.mubr.msk.bf16.mxu1 %vm3355_vm0, %v3354_v0 }
 0x182   : > { %v969_v6 = vpop.f32.mrf.mxu1 }
 0x183   : > { %v970_v7 = vadd.f32 %v2642_v5, %v969_v6 }
 0x184   : > { %v2759_v8 = vpop.f32.mrf.mxu1 }
 0x185   : > { %982 = vrot.lane.b32.xlu1 %v970_v7, %s3356_s0  ;;  %976 = vrot.lane.b32.xlu0 %v970_v7, %s3357_s30  ;;  %v3757_v10 = vpack.c.bf16 %v970_v7, %v970_v7  ;;  %v985_v20 = vmul.f32 0.35355338, %v970_v7 }
 0x186   : > { %v972_v9 = vpop.f32.mrf.mxu1 }
 0x187   : > { %v989_v21 = vpack.c.bf16 %v985_v20, %v985_v20 }
 0x188   : > { %v2760_v11 = vpop.f32.mrf.mxu1 }
 0x189   : > { %979 = vrot.lane.b32.xlu0 %v970_v7, %s3358_s27  ;;  %998 = vrot.lane.b32.xlu1 %v3757_v10, %s3359_s8 }
 0x1f7   : > { %v983_v12 = vpop.permute.xlu1 %982  ;;  %v977_v13 = vpop.permute.xlu0 %976 }
 0x1f8   : > { %v994_v14 = vpack.c.bf16 %v977_v13, %v977_v13  ;;  %v3763_v17 = vpack.c.bf16 %v983_v12, %v983_v12  ;;  %v986_v24 = vmul.f32 0.35355338, %v977_v13  ;;  %v988_v31 = vmul.f32 0.35355338, %v983_v12 }
 0x1fa   : > { %1048 = vrot.lane.b32.xlu0 %v994_v14, %s3359_s8  ;;  %v990_v28 = vpack.c.bf16 %v986_v24, %v986_v24  ;;  %v992_v33 = vpack.c.bf16 %v988_v31, %v988_v31 }
 0x1fb   : > { %v980_v15 = vpop.permute.xlu0 %979  ;;  %v999_v16 = vpop.permute.xlu1 %998 }
 0x1fc   : > { %v3765_v18 = vpack.c.bf16 %v980_v15, %v980_v15  ;;  %v1005_v19 = vsel %vm1000_vm2, %v999_v16, 0  ;;  %v987_v29 = vmul.f32 0.35355338, %v980_v15 }
 0x1fd   : > { %2762 = vmatpush3.bf16.xpose.msra.mxu1 %v1005_v19 }
 0x1fe   : > { %1146 = vrot.lane.b32.xlu0 %v3763_v17, %s3359_s8  ;;  %1097 = vrot.lane.b32.xlu1 %v3765_v18, %s3359_s8  ;;  %v991_v32 = vpack.c.bf16 %v987_v29, %v987_v29 }
 0x1ff   : > { %2773 = vmatprep.subr.bf16.mxu1 %v3354_v0 }
 0x204   : > { %2764 = vmatmul.mubr.msk.bf16.vlgmr.msra.gmra.mxu1 %vm1000_vm2, %v989_v21 }
 0x205   : > { %2775 = vmatprep.mubr.msk.bf16.mxu1 %vm3355_vm0, %v3354_v0 }
 0x26c   : > { %v1049_v22 = vpop.permute.xlu0 %1048 }
 0x26d   : > { %v1054_v23 = vsel %vm1000_vm2, %v1049_v22, 0 }
 0x26e   : > { %2768 = vmatpush3.bf16.xpose.msra.mxu0 %v1054_v23 }
 0x26f   : > { %2779 = vmatprep.subr.bf16.mxu0 %v3354_v0 }
 0x270   : > { %v1098_v25 = vpop.permute.xlu1 %1097  ;;  %v1147_v27 = vpop.permute.xlu0 %1146 }
 0x271   : > { %v1103_v26 = vsel %vm1000_vm2, %v1098_v25, 0  ;;  %v1152_v30 = vsel %vm1000_vm2, %v1147_v27, 0 }
 0x272   : > { %2774 = vmatpush3.bf16.xpose.msra.mxu1 %v1103_v26 }
 0x273   : > { %2785 = vmatprep.subr.bf16.mxu1 %v3354_v0 }
 0x275   : > { %2770 = vmatmul.mubr.msk.bf16.vlgmr.msra.gmra.mxu0 %vm1000_vm2, %v990_v28 }
 0x276   : > { %2780 = vmatpush3.bf16.xpose.msra.mxu0 %v1152_v30  ;;  %2781 = vmatprep.mubr.msk.bf16.mxu0 %vm3355_vm0, %v3354_v0 }
 0x277   : > { %2791 = vmatprep.subr.bf16.mxu0 %v3354_v0 }
 0x279   : > { %2776 = vmatmul.mubr.msk.bf16.vlgmr.msra.gmra.mxu1 %vm1000_vm2, %v991_v32 }
 0x27a   : > { %2787 = vmatprep.mubr.msk.bf16.mxu1 %vm3355_vm0, %v3354_v0 }
 0x27d   : > { %2782 = vmatmul.mubr.msk.bf16.vlgmr.msra.gmra.mxu0 %vm1000_vm2, %v992_v33 }
 0x27e   : > { %2793 = vmatprep.mubr.msk.bf16.mxu0 %vm3355_vm0, %v3354_v0 }
 0x2c4   : > { %v1041_v38 = vpop.f32.mrf.mxu1 }
 0x2c5   : > { %v1042_v39 = vadd.f32 %v1041_v38, %v902_v37 }
 0x2c6   : > { %v2765_v40 = vpop.f32.mrf.mxu1 }
 0x2c7   : > { %v1194_v41 = vsel %vm1000_vm2, %v1042_v39, -inf }
 0x2c8   : > { %1195 = vmax.xlane.f32.xlu1 %v1194_v41  ;;  %v1044_v42 = vpop.f32.mrf.mxu1 }
 0x2ca   : > { %v2766_v43 = vpop.f32.mrf.mxu1 }
 0x2d9   : > { %1283 = vrot.lane.b32.xlu1 %v994_v14, %s3360_s7 }
 0x335   : > { %v1090_v44 = vpop.f32.mrf.mxu0 }
 0x336   : > { %v1091_v45 = vadd.f32 %v1090_v44, %v902_v37 }
 0x337   : > { %v2771_v46 = vpop.f32.mrf.mxu0 }
 0x338   : > { %v1197_v47 = vsel %vm1000_vm2, %v1091_v45, -inf  ;;  %v3025_v46 = vld [vmem:[#allocation7 + $0x8] sm:$0xff]  }
 0x339   : > { %1198 = vmax.xlane.f32.xlu0 %v1197_v47  ;;  %v1093_v48 = vpop.f32.mrf.mxu0  ;;  %v1139_v49 = vpop.f32.mrf.mxu1 }
 0x33a   : > { %v1140_v63 = vadd.f32 %v1139_v49, %v902_v37  ;;  %v3026_v49 = vld [vmem:[#allocation7] sm:$0xff]  }
 0x33b   : > { %v2772_v50 = vpop.f32.mrf.mxu0  ;;  %v2777_v51 = vpop.f32.mrf.mxu1 }
 0x33c   : > { %v1200_v1 = vsel %vm1000_vm2, %v1140_v63, -inf }
 0x33d   : > { %v1142_v52 = vpop.f32.mrf.mxu1  ;;  %v1188_v53 = vpop.f32.mrf.mxu0 }
 0x33e   : > { %v1189_v54 = vadd.f32 %v1188_v53, %v902_v37 }
 0x33f   : > { %v2778_v55 = vpop.f32.mrf.mxu1  ;;  %v2783_v56 = vpop.f32.mrf.mxu0 }
 0x340   : > { %v1203_v57 = vsel %vm1000_vm2, %v1189_v54, -inf }
 0x341   : > { %v1191_v58 = vpop.f32.mrf.mxu0  ;;  %1204 = vmax.xlane.f32.xlu1 %v1203_v57 }
 0x343   : > { %v2784_v59 = vpop.f32.mrf.mxu0 }
 0x34f   : > { %1234 = vrot.lane.b32.xlu0 %v3757_v10, %s3360_s7 }
 0x351   : > { %v1196_v60 = vpop.xlane.xlu1 %1195 }
 0x352   : > { %1331 = vrot.lane.b32.xlu1 %v3765_v18, %s3360_s7  ;;  %v1206_v2 = vsub.f32 %v1042_v39, %v1196_v60 }
 0x354   : > { %v1210_v4 = vmul.f32 1.442695, %v1206_v2 }
 0x355   : > { %v1284_v61 = vpop.permute.xlu1 %1283 }
 0x356   : > { %v1289_v62 = vsel %vm1239_vm3, %v1284_v61, 0  ;;  %3039 = vpow2.f32 %v1210_v4 }
 0x357   : > { %2792 = vmatpush3.bf16.msra.mxu0 %v1289_v62 }
 0x358   : > { %2803 = vmatprep.subr.bf16.mxu0 %v3354_v0 }
 0x363   : > { %v3040_v8 = vpop.eup %3039 }
 0x364   : > { %v1230_v11 = vpack.c.bf16 %v3040_v8, %v3040_v8  ;;  %v1218_v18 = vsel %vm1000_vm2, %v3040_v8, 0.0 }
 0x36e   : > { %1201 = vmax.xlane.f32.xlu0 %v1200_v1 }
 0x384   : > { %1379 = vrot.lane.b32.xlu0 %v3763_v17, %s3360_s7  ;;  %s4122_s7 = sld [smem:[#allocation28_spill]] }
 0x38a   : > { %s895_s3 = scalar_lea.vmem %s4122_s7, %s2638_s6 }
 0x3c2   : > { %v1199_v5 = vpop.xlane.xlu0 %1198 }
 0x3c3   : > { %v1207_v6 = vsub.f32 %v1091_v45, %v1199_v5 }
 0x3c5   : > { %v1212_v7 = vmul.f32 1.442695, %v1207_v6 }
 0x3c6   : > { %v1235_v9 = vpop.permute.xlu0 %1234 }
 0x3c7   : > { %3041 = vpow2.f32 %v1212_v7  ;;  %v1241_v10 = vsel %vm1239_vm3, %v1235_v9, 0  ;;  %v2654_v7 = vld [vmem:[%s4121_s17] ss:$0 sm:$0xff]  ;;  %s4127_s17 = sld [smem:[#allocation42_spill]] }
 0x3c8   : > { %2786 = vmatpush3.bf16.msra.mxu1 %v1241_v10 }
 0x3c9   : > { %2797 = vmatprep.subr.bf16.mxu1 %v3354_v0 }
 0x3ca   : > { %v1205_v12 = vpop.xlane.xlu1 %1204 }
 0x3cb   : > { %2788 = vmatmul.mubr.msk.bf16.vlgmr.msra.gmra.mxu1 %vm1000_vm2, %v1230_v11  ;;  %v1209_v19 = vsub.f32 %v1189_v54, %v1205_v12 }
 0x3cc   : > { %2799 = vmatprep.mubr.msk.bf16.mxu1 %vm3355_vm0, %v3354_v0 }
 0x3cd   : > { %v1216_v20 = vmul.f32 1.442695, %v1209_v19 }
 0x3ce   : > { %v1332_v13 = vpop.permute.xlu1 %1331 }
 0x3cf   : > { %v1337_v14 = vsel %vm1239_vm3, %v1332_v13, 0  ;;  %3043 = vpow2.f32 %v1216_v20  ;;  %v3027_v20 = vld [vmem:[#allocation10 + $0x8] sm:$0xff]  }
 0x3d0   : > { %2798 = vmatpush3.bf16.msra.mxu1 %v1337_v14 }
 0x3d1   : > { %2809 = vmatprep.subr.bf16.mxu1 %v3354_v0 }
 0x3d4   : > { %v3042_v15 = vpop.eup %3041 }
 0x3d5   : > { %v1221_v16 = vsel %vm1000_vm2, %v3042_v15, 0.0  ;;  %v1231_v17 = vpack.c.bf16 %v3042_v15, %v3042_v15 }
 0x3d6   : > { %1222 = vadd.xlane.f32.xlu1 %v1221_v16 }
 0x3d7   : > { %2794 = vmatmul.mubr.msk.bf16.vlgmr.msra.gmra.mxu0 %vm1000_vm2, %v1231_v17 }
 0x3d8   : > { %2805 = vmatprep.mubr.msk.bf16.mxu0 %vm3355_vm0, %v3354_v0 }
 0x3da   : > { %1219 = vadd.xlane.f32.xlu1 %v1218_v18 }
 0x3dc   : > { %v3044_v24 = vpop.eup %3043 }
 0x3dd   : > { %v1233_v27 = vpack.c.bf16 %v3044_v24, %v3044_v24  ;;  %v1227_v31 = vsel %vm1000_vm2, %v3044_v24, 0.0  ;;  %v3030_v24 = vld [vmem:[#allocation8] sm:$0xff]  }
 0x3f7   : > { %v1202_v21 = vpop.xlane.xlu0 %1201 }
 0x3f8   : > { %v1208_v22 = vsub.f32 %v1140_v63, %v1202_v21  ;;  %v898_v21 = vld [vmem:[%s895_s3] sm:$0xff] }
 0x3fa   : > { %v1214_v23 = vmul.f32 1.442695, %v1208_v22  ;;  %v1617_v22 = vpack.c.bf16 %v898_v21, %v898_v21 }
 0x3fb   : > { %v1380_v25 = vpop.permute.xlu0 %1379 }
 0x3fc   : > { %3045 = vpow2.f32 %v1214_v23  ;;  %v1385_v26 = vsel %vm1239_vm3, %v1380_v25, 0  ;;  %v3029_v23 = vld [vmem:[#allocation8 + $0x8] sm:$0xff]  }
 0x3fd   : > { %2804 = vmatpush3.bf16.msra.mxu0 %v1385_v26 }
 0x3fe   : > { %2817 = vmatprep.subr.bf16.mxu0 %v3354_v0 }
 0x400   : > { %2806 = vmatmul.mubr.msk.bf16.vlgmr.msra.gmra.mxu0 %vm1000_vm2, %v1233_v27 }
 0x401   : > { %2821 = vmatprep.mubr.msk.bf16.mxu0 %vm3355_vm0, %v3354_v0  ;;  %2818 = vmatpush3.bf16.msra.mxu0 %v3029_v23 }
 0x402   : > { %2819 = vmatprep.subr.bf16.mxu0 %v3354_v0 }
 0x405   : > { %2820 = vmatpush3.bf16.msra.mxu0 %v3030_v24 }
 0x406   : > { %2833 = vmatprep.subr.bf16.mxu0 %v3354_v0 }
 0x409   : > { %v3046_v28 = vpop.eup %3045 }
 0x40a   : > { %v1224_v29 = vsel %vm1000_vm2, %v3046_v28, 0.0  ;;  %v1232_v30 = vpack.c.bf16 %v3046_v28, %v3046_v28 }
 0x40b   : > { %1225 = vadd.xlane.f32.xlu0 %v1224_v29  ;;  %v2658_v29 = vld [vmem:[%s4051_s18] ss:$0 sm:$0xff] }
 0x40c   : > { %2800 = vmatmul.mubr.msk.bf16.vlgmr.msra.gmra.mxu1 %vm1000_vm2, %v1232_v30 }
 0x40d   : > { %2813 = vmatprep.mubr.msk.bf16.mxu1 %vm3355_vm0, %v3354_v0  ;;  %2810 = vmatpush3.bf16.msra.mxu1 %v3025_v46  ;;  %v2660_v46 = vld [vmem:[%s4042_s9] ss:$0 sm:$0xff] }
 0x40e   : > { %2811 = vmatprep.subr.bf16.mxu1 %v3354_v0 }
 0x40f   : > { %1228 = vadd.xlane.f32.xlu0 %v1227_v31  ;;  %v2659_v31 = vld [vmem:[%s4052_s19] ss:$0 sm:$0xff] }
 0x411   : > { %2812 = vmatpush3.bf16.msra.mxu1 %v3026_v49 }
 0x412   : > { %2825 = vmatprep.subr.bf16.mxu1 %v3354_v0 }
 0x45f   : > { %v1223_v32 = vpop.xlane.xlu1 %1222 }
 0x460   : > { %3047 = vrcp.f32 %v1223_v32 }
 0x463   : > { %v1220_v59 = vpop.xlane.xlu1 %1219 }
 0x46d   : > { %v3048_v37 = vpop.eup %3047 }
 0x48b   : > { %v1277_v33 = vpop.f32.mrf.mxu1 }
 0x48d   : > { %v2789_v34 = vpop.f32.mrf.mxu1 }
 0x48f   : > { %v1280_v35 = vpop.f32.mrf.mxu1 }
 0x490   : > { %v2664_v35 = vld [vmem:[%s4044_s11] ss:$0 sm:$0xff] }
 0x491   : > { %v2790_v36 = vpop.f32.mrf.mxu1 }
 0x494   : > { %v1226_v43 = vpop.xlane.xlu0 %1225 }
 0x495   : > { %3049 = vrcp.f32 %v1226_v43 }
 0x497   : > { %v1325_v38 = vpop.f32.mrf.mxu0 }
 0x498   : > { %v1432_v39 = vmul.f32 %v3048_v37, %v1325_v38  ;;  %v1229_v44 = vpop.xlane.xlu0 %1228 }
 0x499   : > { %v2795_v40 = vpop.f32.mrf.mxu0  ;;  %3051 = vrcp.f32 %v1229_v44 }
 0x49a   : > { %1436 = vrot.lane.b32.xlu0 %v1432_v39, %s3361_s12  ;;  %3053 = vrcp.f32 %v1220_v59 }
 0x49b   : > { %v1328_v41 = vpop.f32.mrf.mxu0 }
 0x49d   : > { %v2796_v42 = vpop.f32.mrf.mxu0 }
 0x4a2   : > { %v3050_v51 = vpop.eup %3049 }
 0x4a6   : > { %v3052_v55 = vpop.eup %3051 }
 0x4a7   : > { %v3054_v60 = vpop.eup %3053 }
 0x4a8   : > { %v1431_v63 = vmul.f32 %v3054_v60, %v1277_v33 }
 0x4c0   : > { %v1421_v45 = vpop.f32.mrf.mxu0 }
 0x4c1   : > { %v1434_v57 = vmul.f32 %v3052_v55, %v1421_v45 }
 0x4c2   : > { %v2807_v47 = vpop.f32.mrf.mxu0 }
 0x4c4   : > { %v1424_v48 = vpop.f32.mrf.mxu0 }
 0x4c6   : > { %v2808_v50 = vpop.f32.mrf.mxu0 }
 0x4cc   : > { %v1373_v52 = vpop.f32.mrf.mxu1 }
 0x4cd   : > { %v1433_v53 = vmul.f32 %v3050_v51, %v1373_v52 }
 0x4ce   : > { %v2801_v54 = vpop.f32.mrf.mxu1 }
 0x4cf   : > { %1440 = vrot.lane.b32.xlu1 %v1433_v53, %s3362_s5 }
 0x4d0   : > { %v1376_v56 = vpop.f32.mrf.mxu1 }
 0x4d2   : > { %v2802_v58 = vpop.f32.mrf.mxu1 }
 0x4d3   : > { %1444 = vrot.lane.b32.xlu1 %v1434_v57, %s3363_s10 }
 0x50c   : > { %v1437_v61 = vpop.permute.xlu0 %1436 }
 0x50d   : > { %v1447_v1 = vsel %vm1000_vm2, %v1431_v63, %v1437_v61 }
 0x541   : > { %v1441_v62 = vpop.permute.xlu1 %1440 }
 0x542   : > { %v1449_v2 = vsel %vm1448_vm4, %v1447_v1, %v1441_v62 }
 0x545   : > { %v1445_v4 = vpop.permute.xlu1 %1444 }
 0x546   : > { %v1451_v5 = vsel %vm1450_vm5, %v1449_v2, %v1445_v4 }
 0x547   : > { %v1452_v6 = vpack.c.bf16 %v1451_v5, %v1451_v5 }
 0x549   : > { %2814 = vmatmul.mubr.msk.bf16.vlgmr.msra.gmra.mxu1 %vm931_vm1, %v1452_v6 }
 0x54a   : > { %2829 = vmatprep.mubr.msk.bf16.mxu1 %vm3355_vm0, %v3354_v0  ;;  %2826 = vmatpush3.bf16.msra.mxu1 %v3027_v20 }
 0x54b   : > { %2827 = vmatprep.subr.bf16.mxu1 %v3354_v0 }
 0x609   : > { %v1513_v8 = vpop.f32.mrf.mxu1 }
 0x60a   : > { %v1514_v9 = vadd.f32 %v2654_v7, %v1513_v8 }
 0x60b   : > { %v2815_v10 = vpop.f32.mrf.mxu1 }
 0x60c   : > { %v1519_v11 = vadd.f32 %v1514_v9, %v3743_v3  ;;  %v3028_v3 = vld [vmem:[#allocation10] sm:$0xff]   ;;  %v903_v9 = vld [vmem:[%s3703_s23] sm:$0xf]  ;;  %s4123_s23 = sld [smem:[#allocation39_spill]] }
 0x60d   : > { %v1516_v12 = vpop.f32.mrf.mxu1  ;;  %2828 = vmatpush3.bf16.msra.mxu1 %v3028_v3  ;;  %v904_v10 = vunpack.c.l.bf16 %v903_v9 }
 0x60e   : > { %v1520_v13 = vsel %vm931_vm1, %v1519_v11, 0.0  ;;  %2839 = vmatprep.subr.bf16.mxu1 %v3354_v0 }
 0x60f   : > { %1521 = vadd.xlane.f32.xlu0 %v1520_v13  ;;  %v2816_v14 = vpop.f32.mrf.mxu1 }
 0x610   : > { %2830 = vmatmul.mubr.msk.bf16.vlgmr.msra.gmra.mxu1 %vm931_vm1, %v1617_v22 }
 0x611   : > { %2841 = vmatprep.mubr.msk.bf16.mxu1 %vm3355_vm0, %v3354_v0 }
 0x698   : > { %v1522_v15 = vpop.xlane.xlu0 %1521 }
 0x699   : > { %v1524_v16 = vmul.f32 0.03125, %v1522_v15 }
 0x69b   : > { %v1525_v17 = vsub.f32 %v1519_v11, %v1524_v16  ;;  %v2641_v11 = vadd.f32 -1.0, %v904_v10 }
 0x69d   : > { %v1526_v18 = vmul.f32 %v1525_v17, %v1525_v17  ;;  %v906_v12 = vmul.f32 1e+09, %v2641_v11  ;;  %v3031_v11 = vld [vmem:[#allocation11 + $0x8] sm:$0xff]  }
 0x69f   : > { %v1527_v19 = vsel %vm931_vm1, %v1526_v18, 0.0 }
 0x6a0   : > { %1528 = vadd.xlane.f32.xlu1 %v1527_v19 }
 0x6d0   : > { %v1678_v36 = vpop.f32.mrf.mxu1 }
 0x6d1   : > { %v1679_v37 = vadd.f32 %v2664_v35, %v1678_v36 }
 0x6d2   : > { %v2831_v38 = vpop.f32.mrf.mxu1 }
 0x6d3   : > { %1695 = vrot.lane.b32.xlu0 %v1679_v37, %s3357_s30  ;;  %v1712_v41 = vpack.c.bf16 %v1679_v37, %v1679_v37 }
 0x6d4   : > { %v1681_v39 = vpop.f32.mrf.mxu1 }
 0x6d5   : > { %v1720_v42 = vsel %vm1000_vm2, %v1712_v41, 0 }
 0x6d6   : > { %v2832_v40 = vpop.f32.mrf.mxu1 }
 0x6d7   : > { %1698 = vrot.lane.b32.xlu0 %v1679_v37, %s3358_s27 }
 0x729   : > { %v1529_v25 = vpop.xlane.xlu1 %1528 }
 0x72a   : > { %v1530_v26 = vmul.f32 0.03125, %v1529_v25 }
 0x72c   : > { %v1531_v27 = vadd.f32 1e-05, %v1530_v26 }
 0x72e   : > { %3055 = vrsqrt.f32 %v1531_v27 }
 0x73b   : > { %v3056_v28 = vpop.eup %3055 }
 0x73c   : > { %v1533_v30 = vmul.f32 %v3056_v28, %v1525_v17 }
 0x73e   : > { %v1541_v32 = vmul.f32 %v2658_v29, %v1533_v30 }
 0x740   : > { %v3862_v33 = vadd.f32 %v2659_v31, %v1541_v32 }
 0x742   : > { %v1550_v34 = vpack.c.bf16 %v3862_v33, %v3862_v33 }
 0x744   : > { %2822 = vmatmul.mubr.msk.bf16.vlgmr.msra.gmra.mxu0 %vm931_vm1, %v1550_v34 }
 0x745   : > { %2835 = vmatprep.mubr.msk.bf16.mxu0 %vm3355_vm0, %v3354_v0  ;;  %2834 = vmatpush3.bf16.xpose.msra.mxu0 %v1720_v42  ;;  %v1696_v43 = vpop.permute.xlu0 %1695 }
 0x746   : > { %2845 = vmatprep.subr.bf16.mxu0 %v3354_v0  ;;  %v3876_v44 = vpack.c.bf16 %v1696_v43, %v1696_v43 }
 0x748   : > { %v1766_v45 = vsel %vm1000_vm2, %v3876_v44, 0 }
 0x749   : > { %2840 = vmatpush3.bf16.xpose.msra.mxu1 %v1766_v45  ;;  %v1699_v47 = vpop.permute.xlu0 %1698 }
 0x74a   : > { %2851 = vmatprep.subr.bf16.mxu1 %v3354_v0  ;;  %v3884_v50 = vpack.c.bf16 %v1699_v47, %v1699_v47 }
 0x74c   : > { %v1812_v55 = vsel %vm1000_vm2, %v3884_v50, 0 }
 0x804   : > { %v1611_v48 = vpop.f32.mrf.mxu0 }
 0x805   : > { %v1612_v49 = vadd.f32 %v2660_v46, %v1611_v48 }
 0x806   : > { %v2823_v51 = vpop.f32.mrf.mxu0 }
 0x807   : > { %v1704_v52 = vmul.f32 0.35355338, %v1612_v49  ;;  %1685 = vrot.lane.b32.xlu1 %v1612_v49, %s3357_s30  ;;  %1688 = vrot.lane.b32.xlu0 %v1612_v49, %s3358_s27  ;;  %s4124_s27 = sld [smem:[#allocation40_spill]] }
 0x808   : > { %v1614_v53 = vpop.f32.mrf.mxu0 }
 0x809   : > { %v1708_v54 = vpack.c.bf16 %v1704_v52, %v1704_v52 }
 0x80a   : > { %v2824_v56 = vpop.f32.mrf.mxu0 }
 0x80b   : > { %1701 = vrot.lane.b32.xlu1 %v1679_v37, %s3356_s0  ;;  %2836 = vmatmul.mubr.msk.bf16.vlgmr.msra.gmra.mxu0 %vm1000_vm2, %v1708_v54 }
 0x80c   : > { %2846 = vmatpush3.bf16.xpose.msra.mxu0 %v1812_v55  ;;  %2847 = vmatprep.mubr.msk.bf16.mxu0 %vm3355_vm0, %v3354_v0 }
 0x80d   : > { %2857 = vmatprep.subr.bf16.mxu0 %v3354_v0 }
 0x80f   : > { %1691 = vrot.lane.b32.xlu1 %v1612_v49, %s3356_s0  ;;  %s4128_s0 = sld [smem:[#allocation43_spill]] }
 0x813   : > { %1941 = vrot.lane.b32.xlu1 %v1712_v41, %s3359_s8 }
 0x815   : > { %s2451_s30 = scalar_lea.hbm %s4128_s0, %s2695_s1 }
 0x879   : > { %v1686_v57 = vpop.permute.xlu1 %1685  ;;  %v1689_v58 = vpop.permute.xlu0 %1688 }
 0x87a   : > { %v1705_v59 = vmul.f32 0.35355338, %v1686_v57  ;;  %v1706_v60 = vmul.f32 0.35355338, %v1689_v58 }
 0x87c   : > { %v1709_v61 = vpack.c.bf16 %v1705_v59, %v1705_v59  ;;  %v1710_v62 = vpack.c.bf16 %v1706_v60, %v1706_v60 }
 0x87d   : > { %v1702_v63 = vpop.permute.xlu1 %1701 }
 0x87e   : > { %v1715_v1 = vpack.c.bf16 %v1702_v63, %v1702_v63  ;;  %2842 = vmatmul.mubr.msk.bf16.vlgmr.msra.gmra.mxu1 %vm1000_vm2, %v1709_v61  ;;  %2848 = vmatmul.mubr.msk.bf16.vlgmr.msra.gmra.mxu0 %vm1000_vm2, %v1710_v62 }
 0x87f   : > { %2853 = vmatprep.mubr.msk.bf16.mxu1 %vm3355_vm0, %v3354_v0  ;;  %2859 = vmatprep.mubr.msk.bf16.mxu0 %vm3355_vm0, %v3354_v0 }
 0x880   : > { %v1858_v2 = vsel %vm1000_vm2, %v1715_v1, 0 }
 0x881   : > { %v1692_v4 = vpop.permute.xlu1 %1691  ;;  %2852 = vmatpush3.bf16.xpose.msra.mxu1 %v1858_v2 }
 0x882   : > { %v1707_v5 = vmul.f32 0.35355338, %v1692_v4  ;;  %2863 = vmatprep.subr.bf16.mxu1 %v3354_v0 }
 0x884   : > { %v1711_v7 = vpack.c.bf16 %v1707_v5, %v1707_v5 }
 0x885   : > { %v1942_v6 = vpop.permute.xlu1 %1941 }
 0x886   : > { %v1947_v8 = vsel %vm1239_vm3, %v1942_v6, 0 }
 0x887   : > { %2858 = vmatpush3.bf16.msra.mxu0 %v1947_v8 }
 0x888   : > { %2854 = vmatmul.mubr.msk.bf16.vlgmr.msra.gmra.mxu1 %vm1000_vm2, %v1711_v7  ;;  %2869 = vmatprep.subr.bf16.mxu0 %v3354_v0 }
 0x889   : > { %2865 = vmatprep.mubr.msk.bf16.mxu1 %vm3355_vm0, %v3354_v0 }
 0x8cb   : > { %v1756_v13 = vpop.f32.mrf.mxu0 }
 0x8cc   : > { %v1757_v14 = vadd.f32 %v1756_v13, %v906_v12 }
 0x8cd   : > { %v2837_v15 = vpop.f32.mrf.mxu0 }
 0x8ce   : > { %v1900_v16 = vsel %vm1000_vm2, %v1757_v14, -inf  ;;  %v3032_v15 = vld [vmem:[#allocation11] sm:$0xff]  }
 0x8cf   : > { %1901 = vmax.xlane.f32.xlu0 %v1900_v16  ;;  %v1759_v17 = vpop.f32.mrf.mxu0 }
 0x8d1   : > { %v2838_v18 = vpop.f32.mrf.mxu0 }
 0x93e   : > { %v1802_v19 = vpop.f32.mrf.mxu1  ;;  %v1848_v20 = vpop.f32.mrf.mxu0 }
 0x93f   : > { %v1803_v3 = vadd.f32 %v1802_v19, %v906_v12  ;;  %v1849_v21 = vadd.f32 %v1848_v20, %v906_v12 }
 0x940   : > { %v2843_v22 = vpop.f32.mrf.mxu1  ;;  %v2849_v23 = vpop.f32.mrf.mxu0 }
 0x941   : > { %v1906_v24 = vsel %vm1000_vm2, %v1849_v21, -inf  ;;  %v1903_v25 = vsel %vm1000_vm2, %v1803_v3, -inf }
 0x942   : > { %1907 = vmax.xlane.f32.xlu0 %v1906_v24  ;;  %v1851_v26 = vpop.f32.mrf.mxu0  ;;  %1904 = vmax.xlane.f32.xlu1 %v1903_v25  ;;  %v1805_v27 = vpop.f32.mrf.mxu1 }
 0x944   : > { %v2844_v28 = vpop.f32.mrf.mxu1  ;;  %v2850_v29 = vpop.f32.mrf.mxu0 }
 0x948   : > { %v1894_v30 = vpop.f32.mrf.mxu1 }
 0x949   : > { %v1895_v31 = vadd.f32 %v1894_v30, %v906_v12 }
 0x94a   : > { %v2855_v32 = vpop.f32.mrf.mxu1 }
 0x94b   : > { %v1909_v34 = vsel %vm1000_vm2, %v1895_v31, -inf }
 0x94c   : > { %1910 = vmax.xlane.f32.xlu0 %v1909_v34  ;;  %v1897_v35 = vpop.f32.mrf.mxu1 }
 0x94e   : > { %v2856_v36 = vpop.f32.mrf.mxu1 }
 0x953   : > { %2039 = vrot.lane.b32.xlu1 %v3884_v50, %s3359_s8 }
 0x957   : > { %2088 = vrot.lane.b32.xlu1 %v1715_v1, %s3359_s8 }
 0x958   : > { %v1902_v37 = vpop.xlane.xlu0 %1901 }
 0x959   : > { %v1912_v38 = vsub.f32 %v1757_v14, %v1902_v37 }
 0x95b   : > { %v1916_v39 = vmul.f32 1.442695, %v1912_v38 }
 0x95d   : > { %3057 = vpow2.f32 %v1916_v39 }
 0x962   : > { %1990 = vrot.lane.b32.xlu0 %v3876_v44, %s3359_s8  ;;  %s2637_s8 = sshll.u32 %s3692_s15, 3 }
 0x963   : > { %s887_s14 = scalar_lea.vmem [#allocation14], %s2637_s8 }
 0x964   : > { %s2453_s7 = sshll.u32 %s887_s14, 4  ;;  %s2454_s7 = int_to_ptr.vmem [resolvable:$true] %s2453_s7 }
 0x96a   : > { %v3058_v40 = vpop.eup %3057 }
 0x96b   : > { %v1936_v41 = vpack.c.bf16 %v3058_v40, %v3058_v40  ;;  %v1924_v4 = vsel %vm1000_vm2, %v3058_v40, 0.0 }
 0x96d   : > { %2860 = vmatmul.mubr.msk.bf16.vlgmr.msra.gmra.mxu0 %vm1000_vm2, %v1936_v41 }
 0x96e   : > { %2871 = vmatprep.mubr.msk.bf16.mxu0 %vm3355_vm0, %v3354_v0 }
 0x9cb   : > { %v1908_v42 = vpop.xlane.xlu0 %1907  ;;  %v1905_v43 = vpop.xlane.xlu1 %1904 }
 0x9cc   : > { %v1914_v45 = vsub.f32 %v1849_v21, %v1908_v42  ;;  %v1913_v46 = vsub.f32 %v1803_v3, %v1905_v43  ;;  %v2676_v42 = vld [vmem:[%s4046_s13] ss:$0 sm:$0xff] }
 0x9ce   : > { %v1920_v47 = vmul.f32 1.442695, %v1914_v45  ;;  %v1918_v48 = vmul.f32 1.442695, %v1913_v46 }
 0x9cf   : > { %v2040_v49 = vpop.permute.xlu1 %2039 }
 0x9d0   : > { %3059 = vpow2.f32 %v1920_v47  ;;  %v2045_v50 = vsel %vm1239_vm3, %v2040_v49, 0 }
 0x9d1   : > { %3061 = vpow2.f32 %v1918_v48  ;;  %2870 = vmatpush3.bf16.msra.mxu0 %v2045_v50 }
 0x9d2   : > { %2881 = vmatprep.subr.bf16.mxu0 %v3354_v0 }
 0x9d3   : > { %v2089_v57 = vpop.permute.xlu1 %2088 }
 0x9d4   : > { %v2094_v62 = vsel %vm1239_vm3, %v2089_v57, 0  ;;  %v3036_v57 = vld [vmem:[%s4049_s16 + $0x10] sm:$0xff]  }
 0x9d5   : > { %v1911_v44 = vpop.xlane.xlu0 %1910 }
 0x9d6   : > { %v1915_v51 = vsub.f32 %v1895_v31, %v1911_v44 }
 0x9d8   : > { %v1922_v52 = vmul.f32 1.442695, %v1915_v51 }
 0x9d9   : > { %v1991_v53 = vpop.permute.xlu0 %1990 }
 0x9da   : > { %3063 = vpow2.f32 %v1922_v52  ;;  %v1996_v54 = vsel %vm1239_vm3, %v1991_v53, 0 }
 0x9db   : > { %2864 = vmatpush3.bf16.msra.mxu1 %v1996_v54 }
 0x9dc   : > { %2875 = vmatprep.subr.bf16.mxu1 %v3354_v0 }
 0x9dd   : > { %v3060_v55 = vpop.eup %3059 }
 0x9de   : > { %v3062_v56 = vpop.eup %3061  ;;  %v1930_v58 = vsel %vm1000_vm2, %v3060_v55, 0.0  ;;  %v1938_v59 = vpack.c.bf16 %v3060_v55, %v3060_v55  ;;  %v3033_v55 = vld [vmem:[#allocation13 + $0x8] sm:$0xff]  }
 0x9df   : > { %1931 = vadd.xlane.f32.xlu1 %v1930_v58  ;;  %v1927_v60 = vsel %vm1000_vm2, %v3062_v56, 0.0  ;;  %v1937_v61 = vpack.c.bf16 %v3062_v56, %v3062_v56  ;;  %v3034_v56 = vld [vmem:[#allocation13] sm:$0xff]  }
 0x9e0   : > { %1928 = vadd.xlane.f32.xlu0 %v1927_v60  ;;  %2872 = vmatmul.mubr.msk.bf16.vlgmr.msra.gmra.mxu0 %vm1000_vm2, %v1938_v59 }
 0x9e1   : > { %2866 = vmatmul.mubr.msk.bf16.vlgmr.msra.gmra.mxu1 %vm1000_vm2, %v1937_v61  ;;  %2885 = vmatprep.mubr.msk.bf16.mxu0 %vm3355_vm0, %v3354_v0 }
 0x9e2   : > { %2876 = vmatpush3.bf16.msra.mxu1 %v2094_v62  ;;  %2877 = vmatprep.mubr.msk.bf16.mxu1 %vm3355_vm0, %v3354_v0  ;;  %v2680_v62 = vld [vmem:[%s4053_s20] ss:$0 sm:$0xff] }
 0x9e3   : > { %2889 = vmatprep.subr.bf16.mxu1 %v3354_v0  ;;  %2882 = vmatpush3.bf16.msra.mxu0 %v3031_v11 }
 0x9e4   : > { %2883 = vmatprep.subr.bf16.mxu0 %v3354_v0 }
 0x9e7   : > { %v3064_v63 = vpop.eup %3063  ;;  %2884 = vmatpush3.bf16.msra.mxu0 %v3032_v15 }
 0x9e8   : > { %v1933_v1 = vsel %vm1000_vm2, %v3064_v63, 0.0  ;;  %v1939_v2 = vpack.c.bf16 %v3064_v63, %v3064_v63  ;;  %2897 = vmatprep.subr.bf16.mxu0 %v3354_v0 }
 0x9e9   : > { %1934 = vadd.xlane.f32.xlu0 %v1933_v1  ;;  %v2681_v1 = vld [vmem:[%s4054_s21] ss:$0 sm:$0xff] }
 0x9ea   : > { %2878 = vmatmul.mubr.msk.bf16.vlgmr.msra.gmra.mxu1 %vm1000_vm2, %v1939_v2 }
 0x9eb   : > { %2893 = vmatprep.mubr.msk.bf16.mxu1 %vm3355_vm0, %v3354_v0  ;;  %2890 = vmatpush3.bf16.msra.mxu1 %v3033_v55 }
 0x9ec   : > { %2891 = vmatprep.subr.bf16.mxu1 %v3354_v0 }
 0x9ed   : > { %1925 = vadd.xlane.f32.xlu0 %v1924_v4 }
 0x9ef   : > { %2892 = vmatpush3.bf16.msra.mxu1 %v3034_v56 }
 0xa2d   : > { %v1983_v5 = vpop.f32.mrf.mxu0 }
 0xa2f   : > { %v2861_v6 = vpop.f32.mrf.mxu0 }
 0xa30   : > { %v3037_v6 = vld [vmem:[%s4049_s16 + $0x8] sm:$0xff]  }
 0xa31   : > { %v1986_v7 = vpop.f32.mrf.mxu0 }
 0xa32   : > { %v3038_v7 = vld [vmem:[%s4049_s16] sm:$0xff]  }
 0xa33   : > { %v2862_v8 = vpop.f32.mrf.mxu0 }
 0xa34   : > { %v2682_v8 = vld [vmem:[%s4123_s23] ss:$0 sm:$0xff] }
 0xa68   : > { %v1932_v9 = vpop.xlane.xlu1 %1931 }
 0xa69   : > { %v1929_v10 = vpop.xlane.xlu0 %1928  ;;  %3065 = vrcp.f32 %v1932_v9 }
 0xa6a   : > { %3067 = vrcp.f32 %v1929_v10 }
 0xa72   : > { %v1935_v12 = vpop.xlane.xlu0 %1934 }
 0xa73   : > { %3069 = vrcp.f32 %v1935_v12 }
 0xa76   : > { %v3066_v13 = vpop.eup %3065  ;;  %v1926_v31 = vpop.xlane.xlu0 %1925 }
 0xa77   : > { %v3068_v16 = vpop.eup %3067  ;;  %3071 = vrcp.f32 %v1926_v31  ;;  %v2692_v31 = vld [vmem:[%s4126_s22] ss:$0 sm:$0xff] }
 0xa80   : > { %v3070_v25 = vpop.eup %3069 }
 0xa84   : > { %v3072_v32 = vpop.eup %3071 }
 0xa85   : > { %v2140_v35 = vmul.f32 %v3072_v32, %v1983_v5 }
 0xaa0   : > { %v2081_v14 = vpop.f32.mrf.mxu0 }
 0xaa1   : > { %v2032_v17 = vpop.f32.mrf.mxu1  ;;  %v2142_v18 = vmul.f32 %v3066_v13, %v2081_v14 }
 0xaa2   : > { %v2141_v19 = vmul.f32 %v3068_v16, %v2032_v17  ;;  %v2873_v20 = vpop.f32.mrf.mxu0 }
 0xaa3   : > { %v2867_v3 = vpop.f32.mrf.mxu1  ;;  %2149 = vrot.lane.b32.xlu0 %v2142_v18, %s3362_s5  ;;  %s3263_s5 = scalar_lea.vmem %s2454_s7, 128 }
 0xaa4   : > { %2145 = vrot.lane.b32.xlu1 %v2141_v19, %s3361_s12  ;;  %v2084_v21 = vpop.f32.mrf.mxu0  ;;  %s4125_s12 = sld [smem:[#allocation25_spill]]  ;;  %p3264_p13 = scmp.ne.s32.totalorder %s2454_s7, %s3263_s5 }
 0xaa5   : > { %v2035_v22 = vpop.f32.mrf.mxu1 }
 0xaa6   : > { %v2874_v23 = vpop.f32.mrf.mxu0 }
 0xaa7   : > { %v2868_v24 = vpop.f32.mrf.mxu1 }
 0xaaa   : > { %v2130_v26 = vpop.f32.mrf.mxu1  ;;  %p4129_p5 = scmp.ne.s32.totalorder %s4125_s12, 0 }
 0xaab   : > { %v2143_v27 = vmul.f32 %v3070_v25, %v2130_v26 }
 0xaac   : > { %v2879_v28 = vpop.f32.mrf.mxu1  ;;  %p3265_p9 = pnand %p3264_p13, %p4129_p5 }
 0xaad   : > { %2153 = vrot.lane.b32.xlu1 %v2143_v27, %s3363_s10  ;;  %s3364_s10 = smov [#allocation14]  }
 0xaae   : > { %v2133_v29 = vpop.f32.mrf.mxu1  ;;  %p3266_p1 = pneg %p3265_p9  ;;  %s3267_s22 = sshll.u32 %s3364_s10, 4  ;;  %s3268_s22 = int_to_ptr.vmem [resolvable:$false] %s3267_s22 }
 0xaaf   : > { %s3269_s29 = scalar_lea.vmem %s3268_s22, 256  ;;  %p3270_p3 = scmp.lt.s32.totalorder %s2454_s7, %s3268_s22 }
 0xab0   : > { %v2880_v30 = vpop.f32.mrf.mxu1  ;;  %p3271_p4 = scmp.lt.s32.totalorder %s3269_s29, %s3263_s5 }
 0xab2   : > { %p3272_p8 = por %p3271_p4, %p3270_p3 }
 0xab4   : > { %p3273_p7 = pnand %p3272_p8, %p3266_p1 }
 0xb15   : > { %v2150_v36 = vpop.permute.xlu0 %2149 }
 0xb16   : > { %v2146_v34 = vpop.permute.xlu1 %2145 }
 0xb17   : > { %v2156_v37 = vsel %vm1000_vm2, %v2140_v35, %v2146_v34  ;;  %v2693_v34 = vld [vmem:[%s4127_s17] ss:$0 sm:$0xff] }
 0xb18   : > { %v2157_v38 = vsel %vm1448_vm4, %v2156_v37, %v2150_v36 }
 0xb1f   : > { %v2154_v39 = vpop.permute.xlu1 %2153 }
 0xb20   : > { %v2158_v40 = vsel %vm1450_vm5, %v2157_v38, %v2154_v39 }
 0xb21   : > { %v2159_v41 = vpack.c.bf16 %v2158_v40, %v2158_v40 }
 0xb23   : > { %2886 = vmatmul.mubr.msk.bf16.vlgmr.msra.gmra.mxu0 %vm931_vm1, %v2159_v41 }
 0xb24   : > { %2905 = vmatprep.mubr.msk.bf16.mxu0 %vm3355_vm0, %v3354_v0 }
 0xbe3   : > { %v2220_v43 = vpop.f32.mrf.mxu0 }
 0xbe4   : > { %v2221_v45 = vadd.f32 %v2676_v42, %v2220_v43 }
 0xbe5   : > { %v2887_v46 = vpop.f32.mrf.mxu0 }
 0xbe6   : > { %v2226_v47 = vadd.f32 %v2221_v45, %v3862_v33  ;;  %v3035_v33 = vld [vmem:[%s4049_s16 + $0x18] sm:$0xff]  }
 0xbe7   : > { %v2223_v48 = vpop.f32.mrf.mxu0  ;;  %2898 = vmatpush3.bf16.msra.mxu0 %v3035_v33 }
 0xbe8   : > { %v2227_v49 = vsel %vm931_vm1, %v2226_v47, 0.0  ;;  %2899 = vmatprep.subr.bf16.mxu0 %v3354_v0 }
 0xbe9   : > { %2228 = vadd.xlane.f32.xlu1 %v2227_v49  ;;  %v2888_v50 = vpop.f32.mrf.mxu0 }
 0xbeb   : > { %2900 = vmatpush3.bf16.msra.mxu0 %v3036_v57 }
 0xbec   : > { %2901 = vmatprep.subr.bf16.mxu0 %v3354_v0 }
 0xbef   : > { %2902 = vmatpush3.bf16.msra.mxu0 %v3037_v6 }
 0xbf0   : > { %2903 = vmatprep.subr.bf16.mxu0 %v3354_v0  ;;  %v2686_v0 = vld [vmem:[%s4124_s27] ss:$0 sm:$0xff]  ;;  %s2440_s27 = scalar_lea.sflag [#allocation4], %s3692_s15 }
 0xbf3   : > { %2904 = vmatpush3.bf16.msra.mxu0 %v3038_v7 }
 0xc72   : > { %v2229_v44 = vpop.xlane.xlu1 %2228 }
 0xc73   : > { %v2230_v51 = vmul.f32 0.03125, %v2229_v44 }
 0xc75   : > { %v2231_v52 = vsub.f32 %v2226_v47, %v2230_v51 }
 0xc77   : > { %v2232_v53 = vmul.f32 %v2231_v52, %v2231_v52 }
 0xc79   : > { %v2233_v54 = vsel %vm931_vm1, %v2232_v53, 0.0 }
 0xc7a   : > { %2234 = vadd.xlane.f32.xlu0 %v2233_v54 }
 0xd03   : > { %v2235_v58 = vpop.xlane.xlu0 %2234 }
 0xd04   : > { %v2236_v59 = vmul.f32 0.03125, %v2235_v58 }
 0xd06   : > { %v2237_v60 = vadd.f32 1e-05, %v2236_v59 }
 0xd08   : > { %3073 = vrsqrt.f32 %v2237_v60 }
 0xd15   : > { %v3074_v61 = vpop.eup %3073 }
 0xd16   : > { %v2239_v63 = vmul.f32 %v3074_v61, %v2231_v52 }
 0xd18   : > { %v2247_v2 = vmul.f32 %v2680_v62, %v2239_v63 }
 0xd1a   : > { %v2255_v4 = vadd.f32 %v2681_v1, %v2247_v2 }
 0xd1c   : > { %v2256_v5 = vpack.c.bf16 %v2255_v4, %v2255_v4 }
 0xd1e   : > { %2894 = vmatmul.mubr.msk.bf16.vlgmr.msra.gmra.mxu1 %vm931_vm1, %v2256_v5 }
 0xdde   : > { %v2317_v9 = vpop.f32.mrf.mxu1 }
 0xddf   : > { %v2318_v10 = vadd.f32 %v2682_v8, %v2317_v9 }
 0xde0   : > { %v2895_v11 = vpop.f32.mrf.mxu1 }
 0xde1   : > { %v2323_v12 = vmax.f32 %v2318_v10, 0.0 }
 0xde2   : > { %v2320_v13 = vpop.f32.mrf.mxu1 }
 0xde3   : > { %v2324_v14 = vpack.c.bf16 %v2323_v12, %v2323_v12 }
 0xde4   : > { %v2896_v15 = vpop.f32.mrf.mxu1 }
 0xde5   : > { %2906 = vmatmul.mubr.msk.bf16.vlgmr.msra.gmra.mxu0 %vm2364_vm6, %v2324_v14 }
 0xea5   : > { %v2402_v16 = vpop.f32.mrf.mxu0 }
 0xea6   : > { %v2403_v17 = vadd.f32 %v2686_v0, %v2402_v16 }
 0xea7   : > { %v2907_v18 = vpop.f32.mrf.mxu0 }
 0xea8   : > { %v2408_v19 = vadd.f32 %v2403_v17, %v2255_v4 }
 0xea9   : > { %v2405_v20 = vpop.f32.mrf.mxu0 }
 0xeaa   : > { %v2409_v3 = vsel %vm931_vm1, %v2408_v19, 0.0 }
 0xeab   : > { %2410 = vadd.xlane.f32.xlu0 %v2409_v3  ;;  %v2908_v21 = vpop.f32.mrf.mxu0 }
 0xf34   : > { %v2411_v22 = vpop.xlane.xlu0 %2410 }
 0xf35   : > { %v2412_v23 = vmul.f32 0.03125, %v2411_v22 }
 0xf37   : > { %v2413_v24 = vsub.f32 %v2408_v19, %v2412_v23 }
 0xf39   : > { %v2414_v25 = vmul.f32 %v2413_v24, %v2413_v24 }
 0xf3b   : > { %v2415_v26 = vsel %vm931_vm1, %v2414_v25, 0.0 }
 0xf3c   : > { %2416 = vadd.xlane.f32.xlu1 %v2415_v26 }
 0xfc5   : > { %v2417_v27 = vpop.xlane.xlu1 %2416 }
 0xfc6   : > { %v2418_v28 = vmul.f32 0.03125, %v2417_v27 }
 0xfc8   : > { %v2419_v29 = vadd.f32 1e-05, %v2418_v28 }
 0xfca   : > { %3075 = vrsqrt.f32 %v2419_v29 }
 0xfd7   : > { %v3076_v30 = vpop.eup %3075 }
 0xfd8   : > { %v2421_v32 = vmul.f32 %v3076_v30, %v2413_v24 }
 0xfda   : > { %v2429_v35 = vmul.f32 %v2692_v31, %v2421_v32 }
 0xfdc   : > { %v2437_v36 = vadd.f32 %v2693_v34, %v2429_v35 }
 0xfde   : > { %2438 = vst.msk [vmem:[%s887_s14] sm:$0xff] %vm931_vm1, %v2437_v36 }
 0xfdf   : > { %3276 = shalt.err (!%p3273_p7)
}
 0xfe0   : > { %s3277_s8 = scalar_lea.hbm %s2451_s30, 128  ;;  %s3281_s24 = scalar_lea.hbm %s4128_s0, 256 }
 0xfe1   : > { %p3278_p12 = scmp.ne.s32.totalorder %s2451_s30, %s3277_s8  ;;  %p3282_p10 = scmp.lt.s32.totalorder %s2451_s30, %s4128_s0 }
 0xfe2   : > { %p3283_p11 = scmp.lt.s32.totalorder %s3281_s24, %s3277_s8 }
 0xfe3   : > { %p3279_p6 = pnand %p3278_p12, %p4129_p5 }
 0xfe4   : > { %p3284_p0 = por %p3283_p11, %p3282_p10 }
 0xfe5   : > { %p3280_p2 = pneg %p3279_p6 }
 0xfe7   : > { %p3285_p13 = pnand %p3284_p0, %p3280_p2 }
 0xfe9   : > { %3288 = shalt.err (!%p3285_p13)
}
 0xfea   : > { %2933 = dma.vmem_to_hbm [thread:$0]  (%p4129_p5), %s2454_s7, 128, %s2451_s30, %s2440_s27  }
 0xfeb PF: > { %s4130_s14 = sld [smem:[#allocation21_spill]]  ;;  %p4133_p1 = scmp.ge.s32.totalorder %s3343_s28, 2 }
 0xfec   : > { %s4131_s3 = sld [smem:[#allocation26_spill]] }
 0xff1   : > { %s2465_s23 = sand.u32 1, %s4130_s14  }
 0xff2   : > { %p4132_p9 = scmp.ne.s32.totalorder %s4131_s3, 0  ;;  %s2466_s5 = scalar_lea.sflag [#allocation4], %s2465_s23 }
 0xff4   : > { %p2959_p3 = pnand %p4133_p1, %p4132_p9 }
 0xff6   : > { %p2960_p4 = pneg %p2959_p3 }
 0xff8   : > { %3326 = dma.done.wait (%p2960_p4), %s2466_s5, 128  }
 0xff9   : > { %3328 = vsyncadd (%p2960_p4), %s2466_s5, 4294967168  ;;  %s4134_s28 = sld [smem:[#allocation23_spill]]  ;;  %s4137_s5 = smov %s3335_s26 }
 0xffa   : > { %s4135_s10 = sld [smem:[#allocation22_spill]] }
 0xffb   : > { %s4136_s27 = sld [smem:[#allocation24_spill]] }
 0xfff   : > { %p42_p8 = scmp.ge.s32.totalorder %s4134_s28, 4  }
0x1000   : > { %s4138_s26 = smov %s4135_s10 }
0x1001   :  { %44 = sbr.rel (!%p42_p8) target bundleno = 27 (0x1b), region = 200 }
0x1006   :  { %2471 = vsyncpa [#allocation3], 1 }
0x1007   :  { %2473 = vsyncpa [#allocation3 + $0x1], 1 }
0x1008   :  { %2474 = vsyncpa [#allocation6], 1 }
0x1009   :  { %2476 = vsyncpa [#allocation6 + $0x1], 1 }
0x100a   :  { %2477 = vsyncpa [#allocation9], 1 }
0x100b   :  { %2478 = vsyncpa [#allocation12], 1 }
0x100c   :  { %2479 = vsyncpa [#allocation4], 1 }
0x100d   :  { %2481 = vsyncpa [#allocation4 + $0x1], 1 }

// kernel: tpu_custom_call.1
= control target key start
LH: loop header
LB: loop body
LE: loop exit
PB: predicated region body
PF: predicated region fallthrough
CT: control target
= control target key end

     0   :  { %s4033_s0 = inlined_call_operand.vmem [shape: f32[2,8,32], index: 0, kind: input, shape index: {}]   ;;  %s4034_s1 = inlined_call_operand.vmem [shape: f32[2,8,32], index: 1, kind: input, shape index: {}]   ;;  %s4035_s2 = inlined_call_operand.hbm [shape: bf16[2,8,8], index: 2, kind: input, shape index: {}]   ;;  %s4036_s3 = inlined_call_operand.hbm [shape: bf16[2,8,8], index: 3, kind: input, shape index: {}]   ;;  %s4037_s4 = inlined_call_operand.vmem [shape: bf16[32,96], index: 4, kind: input, shape index: {}]   ;;  %s4038_s5 = inlined_call_operand.vmem [shape: f32[1,96], index: 5, kind: input, shape index: {}]   ;;  %s4039_s6 = inlined_call_operand.hbm [shape: bf16[32,32], index: 6, kind: input, shape index: {}]   ;;  %s4040_s7 = inlined_call_operand.vmem [shape: f32[1,32], index: 7, kind: input, shape index: {}]   ;;  %s4041_s8 = inlined_call_operand.hbm [shape: bf16[32,32], index: 8, kind: input, shape index: {}]   ;;  %s4042_s9 = inlined_call_operand.vmem [shape: f32[1,32], index: 9, kind: input, shape index: {}]   ;;  %s4043_s10 = inlined_call_operand.hbm [shape: bf16[32,64], index: 10, kind: input, shape index: {}]   ;;  %s4044_s11 = inlined_call_operand.vmem [shape: f32[1,64], index: 11, kind: input, shape index: {}]   ;;  %s4045_s12 = inlined_call_operand.hbm [shape: bf16[32,32], index: 12, kind: input, shape index: {}]   ;;  %s4046_s13 = inlined_call_operand.vmem [shape: f32[1,32], index: 13, kind: input, shape index: {}]   ;;  %s4047_s14 = inlined_call_operand.hbm [shape: bf16[32,64], index: 14, kind: input, shape index: {}]   ;;  %s4048_s15 = inlined_call_operand.vmem [shape: f32[1,64], index: 15, kind: input, shape index: {}]   ;;  %s4049_s16 = inlined_call_operand.vmem [shape: bf16[64,32], index: 16, kind: input, shape index: {}]   ;;  %s4050_s17 = inlined_call_operand.vmem [shape: f32[1,32], index: 17, kind: input, shape index: {}]   ;;  %s4051_s18 = inlined_call_operand.vmem [shape: f32[1,32], index: 18, kind: input, shape index: {}]   ;;  %s4052_s19 = inlined_call_operand.vmem [shape: f32[1,32], index: 19, kind: input, shape index: {}]   ;;  %s4053_s20 = inlined_call_operand.vmem [shape: f32[1,32], index: 20, kind: input, shape index: {}]   ;;  %s4054_s21 = inlined_call_operand.vmem [shape: f32[1,32], index: 21, kind: input, shape index: {}]   ;;  %s4055_s22 = inlined_call_operand.vmem [shape: f32[1,32], index: 22, kind: input, shape index: {}]   ;;  %s4056_s23 = inlined_call_operand.vmem [shape: f32[1,32], index: 23, kind: input, shape index: {}]   ;;  %s4057_s24 = inlined_call_operand.hbm [shape: f32[2,8,32], index: 24, kind: output, shape index: {}]  }
   0x1   :  { %4073 = sst [smem:[#allocation27_spill]] %s4033_s0 }
   0x2   :  { %4074 = sst [smem:[#allocation28_spill]] %s4034_s1 }
   0x3   :  { %4075 = sst [smem:[#allocation29_spill]] %s4035_s2 }
   0x4   :  { %4076 = sst [smem:[#allocation30_spill]] %s4036_s3 }
   0x5   :  { %4077 = sst [smem:[#allocation31_spill]] %s4037_s4 }
   0x6   :  { %4078 = sst [smem:[#allocation32_spill]] %s4038_s5 }
   0x7   :  { %4079 = sst [smem:[#allocation33_spill]] %s4039_s6 }
   0x8   :  { %4080 = sst [smem:[#allocation34_spill]] %s4040_s7 }
   0x9   :  { %4081 = sst [smem:[#allocation35_spill]] %s4041_s8 }
   0xa   :  { %4082 = sst [smem:[#allocation36_spill]] %s4043_s10 }
   0xb   :  { %4083 = sst [smem:[#allocation37_spill]] %s4045_s12 }
   0xc   :  { %4084 = sst [smem:[#allocation38_spill]] %s4047_s14 }
   0xd   :  { %4085 = sst [smem:[#allocation39_spill]] %s4048_s15 }
   0xe   :  { %4086 = sst [smem:[#allocation40_spill]] %s4050_s17 }
   0xf   :  { %4087 = sst [smem:[#allocation41_spill]] %s4055_s22 }
  0x10   :  { %4088 = sst [smem:[#allocation42_spill]] %s4056_s23 }
  0x11   :  { %4089 = sst [smem:[#allocation43_spill]] %s4057_s24 }
  0x12   :  { %29 = vsyncpa [#allocation3], 0 }
  0x13   :  { %31 = vsyncpa [#allocation3 + $0x1], 0 }
  0x14   :  { %32 = vsyncpa [#allocation6], 0 }
  0x15   :  { %34 = vsyncpa [#allocation6 + $0x1], 0 }
  0x16   :  { %35 = vsyncpa [#allocation9], 0 }
  0x17   :  { %36 = vsyncpa [#allocation12], 0 }
  0x18   :  { %37 = vsyncpa [#allocation4], 0 }
  0x19   :  { %39 = vsyncpa [#allocation4 + $0x1], 0  ;;  %s3490_s5 = smov 0   ;;  %s3492_s26 = smov 0  }
  0x1a   :  { %s3494_s27 = smov 0   ;;  %s3496_s28 = smov 0  }
  0x1b LB: > { %4090 = sst [smem:[#allocation21_spill]] %s3331_s5  ;;  %s3345_s6 = smov [#allocation7]   ;;  %s3343_s28 = sphi %s3496_s28, %s4134_s28   ;;  %s3339_s27 = sphi %s3494_s27, %s4136_s27   ;;  %s3335_s26 = sphi %s3492_s26, %s4138_s26   ;;  %s3331_s5 = sphi %s3490_s5, %s4137_s5  }
  0x1c   : > { %4091 = sst [smem:[#allocation22_spill]] %s3339_s27  ;;  %s618_s2 = sshll.u32 %s3345_s6, 4  ;;  %s619_s2 = int_to_ptr.vmem [resolvable:$true] %s618_s2 }
  0x1d   : > { %s3511_s29 = sadd.s32 4294967295, %s3343_s28   ;;  %p2618_p0 = scmp.ge.s32.totalorder %s3343_s28, 1 }
  0x1e   : > { %p4069_p1 = scmp.eq.s32.totalorder %s3511_s29, 0  ;;  %p600_p2 = scmp.lt.s32.totalorder %s3343_s28, 3 }
  0x1f   : > { %s3346_s7 = smov [#allocation8]   ;;  %s3347_s25 = smov [#allocation11]  }
  0x20   : > { %p3516_p3 = pnand %p2618_p0, %p600_p2  ;;  %s634_s30 = sshll.u32 %s3346_s7, 4  ;;  %s3529_s30 = int_to_ptr.vmem [resolvable:$true] %s634_s30 }
  0x21   : > { %s666_s8 = sshll.u32 %s3347_s25, 4  ;;  %s3088_s1 = scalar_lea.vmem %s619_s2, 256  ;;  %s3531_s8 = int_to_ptr.vmem [resolvable:$true] %s666_s8 }
  0x22   : > { %s4092_s0 = scalar_select %p3516_p3, 1, 0 }
  0x23   : > { %p2935_p5 = pneg %p3516_p3  ;;  %p3089_p8 = scmp.ne.s32.totalorder %s619_s2, %s3088_s1 }
  0x24   : > { %p3096_p11 = scmp.lt.s32.totalorder %s619_s2, %s619_s2  ;;  %p3097_p12 = scmp.lt.s32.totalorder %s3088_s1, %s3088_s1 }
  0x25   : > { %p3525_p6 = pnand %p2935_p5, %p4069_p1 }
  0x26   : > { %p3098_p13 = por %p3097_p12, %p3096_p11 }
  0x27   : > { %p3535_p7 = pneg %p3525_p6 }
  0x29   : > { %p3091_p9 = pnand %p3089_p8, %p3535_p7 }
  0x2b   : > { %p3092_p10 = pneg %p3091_p9 }
  0x2d   : > { %p3099_p0 = pnand %p3098_p13, %p3092_p10 }
  0x2f   : > { %3102 = shalt.err (!%p3099_p0)
}
  0x30   : > { %s3348_s6 = smov 64   ;;  %s3349_s7 = smov 4  }
  0x31   : > { %s4095_s23 = sld [smem:[#allocation33_spill]]  ;;  %s3114_s22 = scalar_lea.vmem %s3529_s30, 256 }
  0x32   : > { %p3115_p2 = scmp.ne.s32.totalorder %s3529_s30, %s3114_s22  ;;  %p3122_p9 = scmp.lt.s32.totalorder %s3529_s30, %s3529_s30 }
  0x33   : > { %p3123_p10 = scmp.lt.s32.totalorder %s3114_s22, %s3114_s22 }
  0x34   : > { %p3117_p5 = pnand %p3115_p2, %p3535_p7 }
  0x35   : > { %p3124_p11 = por %p3123_p10, %p3122_p9 }
  0x36   : > { %p3118_p8 = pneg %p3117_p5 }
  0x37   : > { %2938 = dma.hbm_to_vmem [thread:$0]  (!%p3525_p6), %s4095_s23, 256, %s619_s2, [#allocation6], %s3348_s6, %s3348_s6, %s3349_s7  }
  0x38   : > { %p3125_p12 = pnand %p3124_p11, %p3118_p8 }
  0x3a   : > { %3128 = shalt.err (!%p3125_p12)
}
  0x3b   : > { %s4096_s23 = sld [smem:[#allocation35_spill]]  ;;  %s3140_s2 = scalar_lea.vmem %s3531_s8, 256 }
  0x3c   : > { %p3141_p13 = scmp.ne.s32.totalorder %s3531_s8, %s3140_s2  ;;  %p3148_p5 = scmp.lt.s32.totalorder %s3531_s8, %s3531_s8 }
  0x3d   : > { %p3149_p8 = scmp.lt.s32.totalorder %s3140_s2, %s3140_s2 }
  0x3e   : > { %p3143_p0 = pnand %p3141_p13, %p3535_p7 }
  0x3f   : > { %p3150_p9 = por %p3149_p8, %p3148_p5 }
  0x40   : > { %p3144_p2 = pneg %p3143_p0 }
  0x41   : > { %2941 = dma.hbm_to_vmem [thread:$0]  (!%p3525_p6), %s4096_s23, 256, %s3529_s30, [#allocation9], %s3348_s6, %s3348_s6, %s3349_s7  }
  0x42   : > { %p3151_p10 = pnand %p3150_p9, %p3144_p2 }
  0x44   : > { %3154 = shalt.err (!%p3151_p10)
}
  0x45   : > { %s4097_s12 = sld [smem:[#allocation37_spill]]  ;;  %s3350_s30 = smov [#allocation10]  }
  0x46   : > { %s650_s1 = sshll.u32 %s3350_s30, 4  ;;  %s3351_s24 = smov [#allocation13]   ;;  %s651_s1 = int_to_ptr.vmem [resolvable:$true] %s650_s1 }
  0x47   : > { %s682_s23 = sshll.u32 %s3351_s24, 4  ;;  %s3166_s2 = scalar_lea.vmem %s651_s1, 256  ;;  %s683_s23 = int_to_ptr.vmem [resolvable:$true] %s682_s23 }
  0x48   : > { %p3167_p11 = scmp.ne.s32.totalorder %s651_s1, %s3166_s2  ;;  %p3174_p0 = scmp.lt.s32.totalorder %s651_s1, %s651_s1 }
  0x49   : > { %p3175_p2 = scmp.lt.s32.totalorder %s3166_s2, %s3166_s2 }
  0x4a   : > { %p3169_p12 = pnand %p3167_p11, %p3535_p7 }
  0x4b   : > { %2947 = dma.hbm_to_vmem [thread:$0]  (!%p3525_p6), %s4097_s12, 256, %s3531_s8, [#allocation12], %s3348_s6, %s3348_s6, %s3349_s7  }
  0x4c   : > { %p3170_p13 = pneg %p3169_p12  ;;  %p3176_p5 = por %p3175_p2, %p3174_p0 }
  0x4e   : > { %p3177_p8 = pnand %p3176_p5, %p3170_p13 }
  0x50   : > { %3180 = shalt.err (!%p3177_p8)
}
  0x51   : > { %s4098_s10 = sld [smem:[#allocation36_spill]]  ;;  %s3192_s25 = scalar_lea.vmem %s683_s23, 256 }
  0x52   : > { %p3193_p9 = scmp.ne.s32.totalorder %s683_s23, %s3192_s25  ;;  %p3200_p12 = scmp.lt.s32.totalorder %s683_s23, %s683_s23 }
  0x53   : > { %p3201_p0 = scmp.lt.s32.totalorder %s3192_s25, %s3192_s25 }
  0x54   : > { %p3195_p10 = pnand %p3193_p9, %p3535_p7 }
  0x55   : > { %p3202_p13 = por %p3201_p0, %p3200_p12 }
  0x56   : > { %p3196_p11 = pneg %p3195_p10 }
  0x57   : > { %2944 = dma.hbm_to_vmem [thread:$0]  (!%p3525_p6), %s4098_s10, 256, %s651_s1, [#allocation9], %s3348_s6, %s3348_s6, %s3349_s7  }
  0x58   : > { %p3203_p2 = pnand %p3202_p13, %p3196_p11 }
  0x5a   : > { %3206 = shalt.err (!%p3203_p2)
}
  0x5b   : > { %s4099_s14 = sld [smem:[#allocation38_spill]]  ;;  %s2617_s3 = sadd.s32 4294967294, %s3343_s28  }
  0x5c   : > { %s3601_s4 = sadd.s32 1, %s3343_s28   ;;  %s104_s1 = sadd.s32 1, %s3339_s27 }
  0x5d   : > { %4100 = sst [smem:[#allocation23_spill]] %s3601_s4  ;;  %s101_s2 = ssub.s32 %s3343_s28, %s3601_s4 }
  0x5e   : > { %p111_p7 = scmp.ne.s32.totalorder %s3339_s27, %s3335_s26  ;;  %p102_p5 = scmp.eq.s32.totalorder %s101_s2, 0 }
  0x5f   : > { %p112_p8 = scmp.eq.s32.totalorder %s3343_s28, 0  ;;  %p117_p9 = scmp.ne.s32.totalorder %s3335_s26, %s3331_s5 }
  0x60   : > { %p587_p10 = scmp.eq.s32.totalorder %s3511_s29, 1  ;;  %p593_p0 = scmp.eq.s32.totalorder %s2617_s3, 1 }
  0x61   : > { %2950 = dma.hbm_to_vmem [thread:$0]  (!%p3525_p6), %s4099_s14, 256, %s683_s23, [#allocation12], %s3348_s6, %s3348_s6, %s3349_s7  }
  0x62   : > { %s3613_s8 = scalar_select %p102_p5, %s3339_s27, %s104_s1  }
  0x63   : > { %p113_p11 = por %p112_p8, %p111_p7  ;;  %p3617_p12 = por %p4069_p1, %p117_p9 }
  0x64   : > { %4101 = sst [smem:[#allocation24_spill]] %s3613_s8  ;;  %p3621_p6 = por %p587_p10, %p111_p7 }
  0x65   : > { %s4102_s22 = scalar_select %p3617_p12, 1, 0 }
  0x66   : > { %s4103_s6 = scalar_select %p3621_p6, 1, 0 }
  0x67   : > { %p2967_p13 = scmp.lt.s32.totalorder %s3343_s28, 2  ;;  %s737_s7 = sand.u32 1, %s3339_s27  }
  0x68   : > { %4104 = sst [smem:[#allocation25_spill]] %s4103_s6  ;;  %p3627_p2 = por %p593_p0, %p117_p9 }
  0x69   : > { %s3631_s25 = sshll.u32 %s737_s7, 2  ;;  %s2626_s30 = sshll.u32 %s3343_s28, 6 }
  0x6a   : > { %s4105_s23 = scalar_select %p3627_p2, 1, 0 }
  0x6b   : > { %s4107_s2 = sld [smem:[#allocation29_spill]]  ;;  %s741_s12 = scalar_lea.vmem [#allocation2], %s3631_s25 }
  0x6c   : > { %4106 = sst [smem:[#allocation26_spill]] %s4105_s23  ;;  %s748_s3 = sshll.u32 %s741_s12, 4  ;;  %s749_s3 = int_to_ptr.vmem [resolvable:$true] %s748_s3 }
  0x6d   : > { %p3640_p7 = pnand %p2967_p13, %p113_p11  ;;  %s4109_s4 = sld [smem:[#allocation30_spill]] }
  0x6e   : > { %s738_s24 = scalar_lea.sflag [#allocation3], %s737_s7 }
  0x6f   : > { %p3209_p8 = pneg %p3640_p7 }
  0x71   : > { %s3637_s10 = scalar_lea.hbm %s4107_s2, %s2626_s30  ;;  %s3212_s6 = scalar_lea.hbm %s4107_s2, 128 }
  0x72   : > { %s3207_s1 = scalar_lea.hbm %s3637_s10, 64  ;;  %p3213_p11 = scmp.lt.s32.totalorder %s3637_s10, %s4107_s2 }
  0x73   : > { %s3647_s23 = scalar_lea.hbm %s4109_s4, %s2626_s30  ;;  %p3208_p5 = scmp.ne.s32.totalorder %s3637_s10, %s3207_s1 }
  0x74   : > { %p3214_p0 = scmp.lt.s32.totalorder %s3212_s6, %s3207_s1 }
  0x75   : > { %p3210_p9 = pnand %p3209_p8, %p3208_p5 }
  0x76   : > { %p3215_p13 = por %p3214_p0, %p3213_p11 }
  0x77   : > { %p3211_p10 = pneg %p3210_p9 }
  0x79   : > { %p3216_p4 = pnand %p3215_p13, %p3211_p10 }
  0x7b   : > { %3219 = shalt.err (!%p3216_p4)
}
  0x7c   : > { %s3220_s27 = scalar_lea.vmem %s749_s3, 64  ;;  %s3352_s8 = smov [#allocation2]  }
  0x7d   : > { %p3221_p1 = scmp.ne.s32.totalorder %s749_s3, %s3220_s27  ;;  %s3225_s7 = sshll.u32 %s3352_s8, 4  ;;  %s3226_s7 = int_to_ptr.vmem [resolvable:$false] %s3225_s7 }
  0x7e   : > { %s3227_s5 = scalar_lea.vmem %s3226_s7, 128  ;;  %p3228_p9 = scmp.lt.s32.totalorder %s749_s3, %s3226_s7 }
  0x7f   : > { %p3223_p2 = pnand %p3221_p1, %p3209_p8  ;;  %p3229_p6 = scmp.lt.s32.totalorder %s3227_s5, %s3220_s27 }
  0x81   : > { %p3224_p5 = pneg %p3223_p2  ;;  %p3230_p12 = por %p3229_p6, %p3228_p9 }
  0x83   : > { %p3231_p3 = pnand %p3230_p12, %p3224_p5 }
  0x85   : > { %3234 = shalt.err (!%p3231_p3)
}
  0x86   : > { %2954 = dma.hbm_to_vmem [thread:$0]  (!%p3640_p7), %s3637_s10, 64, %s749_s3, %s738_s24  }
  0x87   : > { %s755_s15 = sand.u32 1, %s3343_s28   ;;  %s759_s17 = scalar_lea.vmem [#allocation5], %s3631_s25 }
  0x88   : > { %s766_s6 = sshll.u32 %s759_s17, 4  ;;  %s756_s30 = scalar_lea.sflag [#allocation6], %s755_s15  ;;  %s767_s6 = int_to_ptr.vmem [resolvable:$true] %s766_s6 }
  0x89   : > { %s3235_s1 = scalar_lea.hbm %s3647_s23, 64  ;;  %s3240_s8 = scalar_lea.hbm %s4109_s4, 128 }
  0x8a   : > { %p3236_p1 = scmp.ne.s32.totalorder %s3647_s23, %s3235_s1  ;;  %p3241_p12 = scmp.lt.s32.totalorder %s3647_s23, %s4109_s4 }
  0x8b   : > { %p3242_p6 = scmp.lt.s32.totalorder %s3240_s8, %s3235_s1 }
  0x8c   : > { %p3238_p3 = pnand %p3236_p1, %p3209_p8 }
  0x8d   : > { %p3243_p2 = por %p3242_p6, %p3241_p12 }
  0x8e   : > { %p3239_p4 = pneg %p3238_p3 }
  0x90   : > { %p3244_p10 = pnand %p3243_p2, %p3239_p4 }
  0x92   : > { %3247 = shalt.err (!%p3244_p10)
}
  0x93   : > { %s3248_s10 = scalar_lea.vmem %s767_s6, 64  ;;  %s3353_s25 = smov [#allocation5]  }
  0x94   : > { %p3249_p11 = scmp.ne.s32.totalorder %s767_s6, %s3248_s10  ;;  %s3253_s3 = sshll.u32 %s3353_s25, 4  ;;  %s3254_s3 = int_to_ptr.vmem [resolvable:$false] %s3253_s3 }
  0x95   : > { %s3255_s24 = scalar_lea.vmem %s3254_s3, 128  ;;  %p3256_p5 = scmp.lt.s32.totalorder %s767_s6, %s3254_s3 }
  0x96   : > { %p3251_p0 = pnand %p3249_p11, %p3209_p8  ;;  %p3257_p9 = scmp.lt.s32.totalorder %s3255_s24, %s3248_s10 }
  0x98   : > { %p3252_p13 = pneg %p3251_p0  ;;  %p3258_p1 = por %p3257_p9, %p3256_p5 }
  0x9a   : > { %p3259_p3 = pnand %p3258_p1, %p3252_p13 }
  0x9c   : > { %3262 = shalt.err (!%p3259_p3)
}
  0x9d   : > { %2957 = dma.hbm_to_vmem [thread:$0]  (!%p3640_p7), %s3647_s23, 64, %s767_s6, %s756_s30  }
  0x9e   : > { %p4110_p4 = scmp.ne.s32.totalorder %s4092_s0, 0 }
  0x9f   : > { %s3692_s15 = sand.u32 (!%p4110_p4), 1, %s3335_s26   ;;  %p4111_p8 = scmp.ne.s32.totalorder (!%p4110_p4), %s4102_s22, 0 }
  0xa0   : > { %775 = sbr.rel (%p4110_p4) target bundleno = 4075 (0xfeb), region = 116  ;;  %s2630_s17 = sshll.u32 (!%p4110_p4), %s3692_s15, 2 }
  0xa1   : > { %s778_s1 = scalar_lea.sflag (!%p4110_p4), [#allocation3], %s3692_s15  ;;  %s3696_s12 = scalar_lea.vmem (!%p4110_p4), [#allocation2], %s2630_s17 }
  0xa5   : > { %3306 = dma.done.wait (%p4111_p8), %s778_s1, 64  }
  0xa6   : > { %3308 = vsyncadd (%p4111_p8), %s778_s1, 4294967232  ;;  %s786_s14 = sand.u32 1, %s3511_s29   ;;  %s3703_s23 = scalar_lea.vmem [#allocation5], %s2630_s17 }
  0xa7   : > { %s787_s0 = scalar_lea.sflag [#allocation6], %s786_s14 }
  0xa8   : > { %3310 = dma.done.wait (%p4111_p8), %s787_s0, 64  }
  0xa9   : > { %3312 = vsyncadd (%p4111_p8), %s787_s0, 4294967232  ;;  %p4112_p7 = scmp.eq.s32.totalorder %s3511_s29, 0 }
  0xab   : > { %3314 = dma.done.wait (%p4112_p7), [#allocation6], 256   ;;  %p4113_p12 = pmov %p4112_p7 }
  0xac   : > { %p4114_p6 = pmov %p4112_p7 }
  0xad   : > { %3316 = vsyncadd (%p4113_p12), [#allocation6], 4294967040 }
  0xae   : > { %3318 = dma.done.wait (%p4114_p6), [#allocation9], 512   ;;  %p4115_p2 = pmov %p4114_p6 }
  0xb0   : > { %3320 = vsyncadd (%p4115_p2), [#allocation9], 4294966784  ;;  %p4116_p10 = pmov %p4115_p2 }
  0xb1   : > { %p4117_p11 = pmov %p4115_p2 }
  0xb2   : > { %3322 = dma.done.wait (%p4116_p10), [#allocation12], 512  }
  0xb3   : > { %3324 = vsyncadd (%p4117_p11), [#allocation12], 4294966784  ;;  %p888_p0 = scmp.lt.s32.totalorder %s3511_s29, 1  ;;  %v3354_v0 = vmov 0.0   ;;  %vm3355_vm0 = vmmov 0   ;;  %s4118_s8 = sld [smem:[#allocation27_spill]] }
  0xb4   : > { %2753 = vmatprep.subr.bf16.mxu1 %v3354_v0  ;;  %2757 = vmatprep.mubr.msk.bf16.mxu1 %vm3355_vm0, %v3354_v0  ;;  %s4119_s25 = sld [smem:[#allocation31_spill]]  ;;  %vm931_vm1 = vcmask 261120   ;;  %s3356_s0 = smov 104   ;;  %vm1000_vm2 = vcmask 64512   ;;  %v899_v34 = vld [vmem:[%s3696_s12] sm:$0xf] }
  0xb5   : > { %s3726_s22 = scalar_select %p888_p0, %s3511_s29, 1  ;;  %2767 = vmatprep.subr.bf16.mxu0 %v3354_v0  ;;  %2769 = vmatprep.mubr.msk.bf16.mxu0 %vm3355_vm0, %v3354_v0  ;;  %v900_v35 = vunpack.c.l.bf16 %v899_v34  ;;  %vm1239_vm3 = vcmask 1043456   ;;  %vm1448_vm4 = vcmask 130048   ;;  %vm1450_vm5 = vcmask 195584  }
  0xb6   : > { %s4120_s14 = sld [smem:[#allocation32_spill]]  ;;  %s3357_s30 = smov 120   ;;  %vm2364_vm6 = vcmask 523264  }
  0xb7   : > { %s2638_s6 = sshll.u32 %s3726_s22, 3  ;;  %s3358_s27 = smov 112   ;;  %v2640_v36 = vadd.f32 -1.0, %v900_v35 }
  0xb8   : > { %s3361_s12 = smov 8   ;;  %s3362_s5 = smov 16  }
  0xb9   : > { %s891_s7 = scalar_lea.vmem %s4118_s8, %s2638_s6  ;;  %s3359_s8 = smov 96   ;;  %v902_v37 = vmul.f32 1e+09, %v2640_v36 }
  0xba   : > { %v3023_v1 = vld [vmem:[%s4119_s25 + $0x8] sm:$0xff]   ;;  %v3024_v2 = vld [vmem:[%s4119_s25] sm:$0xff]   ;;  %s3363_s10 = smov 24   ;;  %s4121_s17 = sld [smem:[#allocation34_spill]] }
  0xbb   : > { %2754 = vmatpush3.bf16.msra.mxu1 %v3023_v1  ;;  %v3743_v3 = vld [vmem:[%s891_s7] sm:$0xff]  ;;  %s3360_s7 = smov 64   ;;  %s4126_s22 = sld [smem:[#allocation41_spill]] }
  0xbc   : > { %2755 = vmatprep.subr.bf16.mxu1 %v3354_v0  ;;  %v907_v4 = vpack.c.bf16 %v3743_v3, %v3743_v3  ;;  %v2642_v5 = vld [vmem:[%s4120_s14] ss:$0 sm:$0xff]  ;;  %s2695_s1 = sshll.u32 %s3511_s29, 7 }
  0xbf   : > { %2756 = vmatpush3.bf16.msra.mxu1 %v3024_v2 }
  0xc0   : > { %2761 = vmatprep.subr.bf16.mxu1 %v3354_v0 }
  0xc2   : > { %2758 = vmatmul.mubr.msk.bf16.vlgmr.msra.gmra.mxu1 %vm931_vm1, %v907_v4 }
  0xc3   : > { %2763 = vmatprep.mubr.msk.bf16.mxu1 %vm3355_vm0, %v3354_v0 }
 0x182   : > { %v969_v6 = vpop.f32.mrf.mxu1 }
 0x183   : > { %v970_v7 = vadd.f32 %v2642_v5, %v969_v6 }
 0x184   : > { %v2759_v8 = vpop.f32.mrf.mxu1 }
 0x185   : > { %982 = vrot.lane.b32.xlu1 %v970_v7, %s3356_s0  ;;  %976 = vrot.lane.b32.xlu0 %v970_v7, %s3357_s30  ;;  %v3757_v10 = vpack.c.bf16 %v970_v7, %v970_v7  ;;  %v985_v20 = vmul.f32 0.35355338, %v970_v7 }
 0x186   : > { %v972_v9 = vpop.f32.mrf.mxu1 }
 0x187   : > { %v989_v21 = vpack.c.bf16 %v985_v20, %v985_v20 }
 0x188   : > { %v2760_v11 = vpop.f32.mrf.mxu1 }
 0x189   : > { %979 = vrot.lane.b32.xlu0 %v970_v7, %s3358_s27  ;;  %998 = vrot.lane.b32.xlu1 %v3757_v10, %s3359_s8 }
 0x1f7   : > { %v983_v12 = vpop.permute.xlu1 %982  ;;  %v977_v13 = vpop.permute.xlu0 %976 }
 0x1f8   : > { %v994_v14 = vpack.c.bf16 %v977_v13, %v977_v13  ;;  %v3763_v17 = vpack.c.bf16 %v983_v12, %v983_v12  ;;  %v986_v24 = vmul.f32 0.35355338, %v977_v13  ;;  %v988_v31 = vmul.f32 0.35355338, %v983_v12 }
 0x1fa   : > { %1048 = vrot.lane.b32.xlu0 %v994_v14, %s3359_s8  ;;  %v990_v28 = vpack.c.bf16 %v986_v24, %v986_v24  ;;  %v992_v33 = vpack.c.bf16 %v988_v31, %v988_v31 }
 0x1fb   : > { %v980_v15 = vpop.permute.xlu0 %979  ;;  %v999_v16 = vpop.permute.xlu1 %998 }
 0x1fc   : > { %v3765_v18 = vpack.c.bf16 %v980_v15, %v980_v15  ;;  %v1005_v19 = vsel %vm1000_vm2, %v999_v16, 0  ;;  %v987_v29 = vmul.f32 0.35355338, %v980_v15 }
 0x1fd   : > { %2762 = vmatpush3.bf16.xpose.msra.mxu1 %v1005_v19 }
 0x1fe   : > { %1146 = vrot.lane.b32.xlu0 %v3763_v17, %s3359_s8  ;;  %1097 = vrot.lane.b32.xlu1 %v3765_v18, %s3359_s8  ;;  %v991_v32 = vpack.c.bf16 %v987_v29, %v987_v29 }
 0x1ff   : > { %2773 = vmatprep.subr.bf16.mxu1 %v3354_v0 }
 0x204   : > { %2764 = vmatmul.mubr.msk.bf16.vlgmr.msra.gmra.mxu1 %vm1000_vm2, %v989_v21 }
 0x205   : > { %2775 = vmatprep.mubr.msk.bf16.mxu1 %vm3355_vm0, %v3354_v0 }
 0x26c   : > { %v1049_v22 = vpop.permute.xlu0 %1048 }
 0x26d   : > { %v1054_v23 = vsel %vm1000_vm2, %v1049_v22, 0 }
 0x26e   : > { %2768 = vmatpush3.bf16.xpose.msra.mxu0 %v1054_v23 }
 0x26f   : > { %2779 = vmatprep.subr.bf16.mxu0 %v3354_v0 }
 0x270   : > { %v1098_v25 = vpop.permute.xlu1 %1097  ;;  %v1147_v27 = vpop.permute.xlu0 %1146 }
 0x271   : > { %v1103_v26 = vsel %vm1000_vm2, %v1098_v25, 0  ;;  %v1152_v30 = vsel %vm1000_vm2, %v1147_v27, 0 }
 0x272   : > { %2774 = vmatpush3.bf16.xpose.msra.mxu1 %v1103_v26 }
 0x273   : > { %2785 = vmatprep.subr.bf16.mxu1 %v3354_v0 }
 0x275   : > { %2770 = vmatmul.mubr.msk.bf16.vlgmr.msra.gmra.mxu0 %vm1000_vm2, %v990_v28 }
 0x276   : > { %2780 = vmatpush3.bf16.xpose.msra.mxu0 %v1152_v30  ;;  %2781 = vmatprep.mubr.msk.bf16.mxu0 %vm3355_vm0, %v3354_v0 }
 0x277   : > { %2791 = vmatprep.subr.bf16.mxu0 %v3354_v0 }
 0x279   : > { %2776 = vmatmul.mubr.msk.bf16.vlgmr.msra.gmra.mxu1 %vm1000_vm2, %v991_v32 }
 0x27a   : > { %2787 = vmatprep.mubr.msk.bf16.mxu1 %vm3355_vm0, %v3354_v0 }
 0x27d   : > { %2782 = vmatmul.mubr.msk.bf16.vlgmr.msra.gmra.mxu0 %vm1000_vm2, %v992_v33 }
 0x27e   : > { %2793 = vmatprep.mubr.msk.bf16.mxu0 %vm3355_vm0, %v3354_v0 }
 0x2c4   : > { %v1041_v38 = vpop.f32.mrf.mxu1 }
 0x2c5   : > { %v1042_v39 = vadd.f32 %v1041_v38, %v902_v37 }
 0x2c6   : > { %v2765_v40 = vpop.f32.mrf.mxu1 }
 0x2c7   : > { %v1194_v41 = vsel %vm1000_vm2, %v1042_v39, -inf }
 0x2c8   : > { %1195 = vmax.xlane.f32.xlu1 %v1194_v41  ;;  %v1044_v42 = vpop.f32.mrf.mxu1 }
 0x2ca   : > { %v2766_v43 = vpop.f32.mrf.mxu1 }
 0x2d9   : > { %1283 = vrot.lane.b32.xlu1 %v994_v14, %s3360_s7 }
 0x335   : > { %v1090_v44 = vpop.f32.mrf.mxu0 }
 0x336   : > { %v1091_v45 = vadd.f32 %v1090_v44, %v902_v37 }
 0x337   : > { %v2771_v46 = vpop.f32.mrf.mxu0 }
 0x338   : > { %v1197_v47 = vsel %vm1000_vm2, %v1091_v45, -inf  ;;  %v3025_v46 = vld [vmem:[#allocation7 + $0x8] sm:$0xff]  }
 0x339   : > { %1198 = vmax.xlane.f32.xlu0 %v1197_v47  ;;  %v1093_v48 = vpop.f32.mrf.mxu0  ;;  %v1139_v49 = vpop.f32.mrf.mxu1 }
 0x33a   : > { %v1140_v63 = vadd.f32 %v1139_v49, %v902_v37  ;;  %v3026_v49 = vld [vmem:[#allocation7] sm:$0xff]  }
 0x33b   : > { %v2772_v50 = vpop.f32.mrf.mxu0  ;;  %v2777_v51 = vpop.f32.mrf.mxu1 }
 0x33c   : > { %v1200_v1 = vsel %vm1000_vm2, %v1140_v63, -inf }
 0x33d   : > { %v1142_v52 = vpop.f32.mrf.mxu1  ;;  %v1188_v53 = vpop.f32.mrf.mxu0 }
 0x33e   : > { %v1189_v54 = vadd.f32 %v1188_v53, %v902_v37 }
 0x33f   : > { %v2778_v55 = vpop.f32.mrf.mxu1  ;;  %v2783_v56 = vpop.f32.mrf.mxu0 }
 0x340   : > { %v1203_v57 = vsel %vm1000_vm2, %v1189_v54, -inf }
 0x341   : > { %v1191_v58 = vpop.f32.mrf.mxu0  ;;  %1204 = vmax.xlane.f32.xlu1 %v1203_v57 }
 0x343   : > { %v2784_v59 = vpop.f32.mrf.mxu0 }
 0x34f   : > { %1234 = vrot.lane.b32.xlu0 %v3757_v10, %s3360_s7 }
 0x351   : > { %v1196_v60 = vpop.xlane.xlu1 %1195 }
 0x352   : > { %1331 = vrot.lane.b32.xlu1 %v3765_v18, %s3360_s7  ;;  %v1206_v2 = vsub.f32 %v1042_v39, %v1196_v60 }
 0x354   : > { %v1210_v4 = vmul.f32 1.442695, %v1206_v2 }
 0x355   : > { %v1284_v61 = vpop.permute.xlu1 %1283 }
 0x356   : > { %v1289_v62 = vsel %vm1239_vm3, %v1284_v61, 0  ;;  %3039 = vpow2.f32 %v1210_v4 }
 0x357   : > { %2792 = vmatpush3.bf16.msra.mxu0 %v1289_v62 }
 0x358   : > { %2803 = vmatprep.subr.bf16.mxu0 %v3354_v0 }
 0x363   : > { %v3040_v8 = vpop.eup %3039 }
 0x364   : > { %v1230_v11 = vpack.c.bf16 %v3040_v8, %v3040_v8  ;;  %v1218_v18 = vsel %vm1000_vm2, %v3040_v8, 0.0 }
 0x36e   : > { %1201 = vmax.xlane.f32.xlu0 %v1200_v1 }
 0x384   : > { %1379 = vrot.lane.b32.xlu0 %v3763_v17, %s3360_s7  ;;  %s4122_s7 = sld [smem:[#allocation28_spill]] }
 0x38a   : > { %s895_s3 = scalar_lea.vmem %s4122_s7, %s2638_s6 }
 0x3c2   : > { %v1199_v5 = vpop.xlane.xlu0 %1198 }
 0x3c3   : > { %v1207_v6 = vsub.f32 %v1091_v45, %v1199_v5 }
 0x3c5   : > { %v1212_v7 = vmul.f32 1.442695, %v1207_v6 }
 0x3c6   : > { %v1235_v9 = vpop.permute.xlu0 %1234 }
 0x3c7   : > { %3041 = vpow2.f32 %v1212_v7  ;;  %v1241_v10 = vsel %vm1239_vm3, %v1235_v9, 0  ;;  %v2654_v7 = vld [vmem:[%s4121_s17] ss:$0 sm:$0xff]  ;;  %s4127_s17 = sld [smem:[#allocation42_spill]] }
 0x3c8   : > { %2786 = vmatpush3.bf16.msra.mxu1 %v1241_v10 }
 0x3c9   : > { %2797 = vmatprep.subr.bf16.mxu1 %v3354_v0 }
 0x3ca   : > { %v1205_v12 = vpop.xlane.xlu1 %1204 }
 0x3cb   : > { %2788 = vmatmul.mubr.msk.bf16.vlgmr.msra.gmra.mxu1 %vm1000_vm2, %v1230_v11  ;;  %v1209_v19 = vsub.f32 %v1189_v54, %v1205_v12 }
 0x3cc   : > { %2799 = vmatprep.mubr.msk.bf16.mxu1 %vm3355_vm0, %v3354_v0 }
 0x3cd   : > { %v1216_v20 = vmul.f32 1.442695, %v1209_v19 }
 0x3ce   : > { %v1332_v13 = vpop.permute.xlu1 %1331 }
 0x3cf   : > { %v1337_v14 = vsel %vm1239_vm3, %v1332_v13, 0  ;;  %3043 = vpow2.f32 %v1216_v20  ;;  %v3027_v20 = vld [vmem:[#allocation10 + $0x8] sm:$0xff]  }
 0x3d0   : > { %2798 = vmatpush3.bf16.msra.mxu1 %v1337_v14 }
 0x3d1   : > { %2809 = vmatprep.subr.bf16.mxu1 %v3354_v0 }
 0x3d4   : > { %v3042_v15 = vpop.eup %3041 }
 0x3d5   : > { %v1221_v16 = vsel %vm1000_vm2, %v3042_v15, 0.0  ;;  %v1231_v17 = vpack.c.bf16 %v3042_v15, %v3042_v15 }
 0x3d6   : > { %1222 = vadd.xlane.f32.xlu1 %v1221_v16 }
 0x3d7   : > { %2794 = vmatmul.mubr.msk.bf16.vlgmr.msra.gmra.mxu0 %vm1000_vm2, %v1231_v17 }
 0x3d8   : > { %2805 = vmatprep.mubr.msk.bf16.mxu0 %vm3355_vm0, %v3354_v0 }
 0x3da   : > { %1219 = vadd.xlane.f32.xlu1 %v1218_v18 }
 0x3dc   : > { %v3044_v24 = vpop.eup %3043 }
 0x3dd   : > { %v1233_v27 = vpack.c.bf16 %v3044_v24, %v3044_v24  ;;  %v1227_v31 = vsel %vm1000_vm2, %v3044_v24, 0.0  ;;  %v3030_v24 = vld [vmem:[#allocation8] sm:$0xff]  }
 0x3f7   : > { %v1202_v21 = vpop.xlane.xlu0 %1201 }
 0x3f8   : > { %v1208_v22 = vsub.f32 %v1140_v63, %v1202_v21  ;;  %v898_v21 = vld [vmem:[%s895_s3] sm:$0xff] }
 0x3fa   : > { %v1214_v23 = vmul.f32 1.442695, %v1208_v22  ;;  %v1617_v22 = vpack.c.bf16 %v898_v21, %v898_v21 }
 0x3fb   : > { %v1380_v25 = vpop.permute.xlu0 %1379 }
 0x3fc   : > { %3045 = vpow2.f32 %v1214_v23  ;;  %v1385_v26 = vsel %vm1239_vm3, %v1380_v25, 0  ;;  %v3029_v23 = vld [vmem:[#allocation8 + $0x8] sm:$0xff]  }
 0x3fd   : > { %2804 = vmatpush3.bf16.msra.mxu0 %v1385_v26 }
 0x3fe   : > { %2817 = vmatprep.subr.bf16.mxu0 %v3354_v0 }
 0x400   : > { %2806 = vmatmul.mubr.msk.bf16.vlgmr.msra.gmra.mxu0 %vm1000_vm2, %v1233_v27 }
 0x401   : > { %2821 = vmatprep.mubr.msk.bf16.mxu0 %vm3355_vm0, %v3354_v0  ;;  %2818 = vmatpush3.bf16.msra.mxu0 %v3029_v23 }
 0x402   : > { %2819 = vmatprep.subr.bf16.mxu0 %v3354_v0 }
 0x405   : > { %2820 = vmatpush3.bf16.msra.mxu0 %v3030_v24 }
 0x406   : > { %2833 = vmatprep.subr.bf16.mxu0 %v3354_v0 }
 0x409   : > { %v3046_v28 = vpop.eup %3045 }
 0x40a   : > { %v1224_v29 = vsel %vm1000_vm2, %v3046_v28, 0.0  ;;  %v1232_v30 = vpack.c.bf16 %v3046_v28, %v3046_v28 }
 0x40b   : > { %1225 = vadd.xlane.f32.xlu0 %v1224_v29  ;;  %v2658_v29 = vld [vmem:[%s4051_s18] ss:$0 sm:$0xff] }
 0x40c   : > { %2800 = vmatmul.mubr.msk.bf16.vlgmr.msra.gmra.mxu1 %vm1000_vm2, %v1232_v30 }
 0x40d   : > { %2813 = vmatprep.mubr.msk.bf16.mxu1 %vm3355_vm0, %v3354_v0  ;;  %2810 = vmatpush3.bf16.msra.mxu1 %v3025_v46  ;;  %v2660_v46 = vld [vmem:[%s4042_s9] ss:$0 sm:$0xff] }
 0x40e   : > { %2811 = vmatprep.subr.bf16.mxu1 %v3354_v0 }
 0x40f   : > { %1228 = vadd.xlane.f32.xlu0 %v1227_v31  ;;  %v2659_v31 = vld [vmem:[%s4052_s19] ss:$0 sm:$0xff] }
 0x411   : > { %2812 = vmatpush3.bf16.msra.mxu1 %v3026_v49 }
 0x412   : > { %2825 = vmatprep.subr.bf16.mxu1 %v3354_v0 }
 0x45f   : > { %v1223_v32 = vpop.xlane.xlu1 %1222 }
 0x460   : > { %3047 = vrcp.f32 %v1223_v32 }
 0x463   : > { %v1220_v59 = vpop.xlane.xlu1 %1219 }
 0x46d   : > { %v3048_v37 = vpop.eup %3047 }
 0x48b   : > { %v1277_v33 = vpop.f32.mrf.mxu1 }
 0x48d   : > { %v2789_v34 = vpop.f32.mrf.mxu1 }
 0x48f   : > { %v1280_v35 = vpop.f32.mrf.mxu1 }
 0x490   : > { %v2664_v35 = vld [vmem:[%s4044_s11] ss:$0 sm:$0xff] }
 0x491   : > { %v2790_v36 = vpop.f32.mrf.mxu1 }
 0x494   : > { %v1226_v43 = vpop.xlane.xlu0 %1225 }
 0x495   : > { %3049 = vrcp.f32 %v1226_v43 }
 0x497   : > { %v1325_v38 = vpop.f32.mrf.mxu0 }
 0x498   : > { %v1432_v39 = vmul.f32 %v3048_v37, %v1325_v38  ;;  %v1229_v44 = vpop.xlane.xlu0 %1228 }
 0x499   : > { %v2795_v40 = vpop.f32.mrf.mxu0  ;;  %3051 = vrcp.f32 %v1229_v44 }
 0x49a   : > { %1436 = vrot.lane.b32.xlu0 %v1432_v39, %s3361_s12  ;;  %3053 = vrcp.f32 %v1220_v59 }
 0x49b   : > { %v1328_v41 = vpop.f32.mrf.mxu0 }
 0x49d   : > { %v2796_v42 = vpop.f32.mrf.mxu0 }
 0x4a2   : > { %v3050_v51 = vpop.eup %3049 }
 0x4a6   : > { %v3052_v55 = vpop.eup %3051 }
 0x4a7   : > { %v3054_v60 = vpop.eup %3053 }
 0x4a8   : > { %v1431_v63 = vmul.f32 %v3054_v60, %v1277_v33 }
 0x4c0   : > { %v1421_v45 = vpop.f32.mrf.mxu0 }
 0x4c1   : > { %v1434_v57 = vmul.f32 %v3052_v55, %v1421_v45 }
 0x4c2   : > { %v2807_v47 = vpop.f32.mrf.mxu0 }
 0x4c4   : > { %v1424_v48 = vpop.f32.mrf.mxu0 }
 0x4c6   : > { %v2808_v50 = vpop.f32.mrf.mxu0 }
 0x4cc   : > { %v1373_v52 = vpop.f32.mrf.mxu1 }
 0x4cd   : > { %v1433_v53 = vmul.f32 %v3050_v51, %v1373_v52 }
 0x4ce   : > { %v2801_v54 = vpop.f32.mrf.mxu1 }
 0x4cf   : > { %1440 = vrot.lane.b32.xlu1 %v1433_v53, %s3362_s5 }
 0x4d0   : > { %v1376_v56 = vpop.f32.mrf.mxu1 }
 0x4d2   : > { %v2802_v58 = vpop.f32.mrf.mxu1 }
 0x4d3   : > { %1444 = vrot.lane.b32.xlu1 %v1434_v57, %s3363_s10 }
 0x50c   : > { %v1437_v61 = vpop.permute.xlu0 %1436 }
 0x50d   : > { %v1447_v1 = vsel %vm1000_vm2, %v1431_v63, %v1437_v61 }
 0x541   : > { %v1441_v62 = vpop.permute.xlu1 %1440 }
 0x542   : > { %v1449_v2 = vsel %vm1448_vm4, %v1447_v1, %v1441_v62 }
 0x545   : > { %v1445_v4 = vpop.permute.xlu1 %1444 }
 0x546   : > { %v1451_v5 = vsel %vm1450_vm5, %v1449_v2, %v1445_v4 }
 0x547   : > { %v1452_v6 = vpack.c.bf16 %v1451_v5, %v1451_v5 }
 0x549   : > { %2814 = vmatmul.mubr.msk.bf16.vlgmr.msra.gmra.mxu1 %vm931_vm1, %v1452_v6 }
 0x54a   : > { %2829 = vmatprep.mubr.msk.bf16.mxu1 %vm3355_vm0, %v3354_v0  ;;  %2826 = vmatpush3.bf16.msra.mxu1 %v3027_v20 }
 0x54b   : > { %2827 = vmatprep.subr.bf16.mxu1 %v3354_v0 }
 0x609   : > { %v1513_v8 = vpop.f32.mrf.mxu1 }
 0x60a   : > { %v1514_v9 = vadd.f32 %v2654_v7, %v1513_v8 }
 0x60b   : > { %v2815_v10 = vpop.f32.mrf.mxu1 }
 0x60c   : > { %v1519_v11 = vadd.f32 %v1514_v9, %v3743_v3  ;;  %v3028_v3 = vld [vmem:[#allocation10] sm:$0xff]   ;;  %v903_v9 = vld [vmem:[%s3703_s23] sm:$0xf]  ;;  %s4123_s23 = sld [smem:[#allocation39_spill]] }
 0x60d   : > { %v1516_v12 = vpop.f32.mrf.mxu1  ;;  %2828 = vmatpush3.bf16.msra.mxu1 %v3028_v3  ;;  %v904_v10 = vunpack.c.l.bf16 %v903_v9 }
 0x60e   : > { %v1520_v13 = vsel %vm931_vm1, %v1519_v11, 0.0  ;;  %2839 = vmatprep.subr.bf16.mxu1 %v3354_v0 }
 0x60f   : > { %1521 = vadd.xlane.f32.xlu0 %v1520_v13  ;;  %v2816_v14 = vpop.f32.mrf.mxu1 }
 0x610   : > { %2830 = vmatmul.mubr.msk.bf16.vlgmr.msra.gmra.mxu1 %vm931_vm1, %v1617_v22 }
 0x611   : > { %2841 = vmatprep.mubr.msk.bf16.mxu1 %vm3355_vm0, %v3354_v0 }
 0x698   : > { %v1522_v15 = vpop.xlane.xlu0 %1521 }
 0x699   : > { %v1524_v16 = vmul.f32 0.03125, %v1522_v15 }
 0x69b   : > { %v1525_v17 = vsub.f32 %v1519_v11, %v1524_v16  ;;  %v2641_v11 = vadd.f32 -1.0, %v904_v10 }
 0x69d   : > { %v1526_v18 = vmul.f32 %v1525_v17, %v1525_v17  ;;  %v906_v12 = vmul.f32 1e+09, %v2641_v11  ;;  %v3031_v11 = vld [vmem:[#allocation11 + $0x8] sm:$0xff]  }
 0x69f   : > { %v1527_v19 = vsel %vm931_vm1, %v1526_v18, 0.0 }
 0x6a0   : > { %1528 = vadd.xlane.f32.xlu1 %v1527_v19 }
 0x6d0   : > { %v1678_v36 = vpop.f32.mrf.mxu1 }
 0x6d1   : > { %v1679_v37 = vadd.f32 %v2664_v35, %v1678_v36 }
 0x6d2   : > { %v2831_v38 = vpop.f32.mrf.mxu1 }
 0x6d3   : > { %1695 = vrot.lane.b32.xlu0 %v1679_v37, %s3357_s30  ;;  %v1712_v41 = vpack.c.bf16 %v1679_v37, %v1679_v37 }
 0x6d4   : > { %v1681_v39 = vpop.f32.mrf.mxu1 }
 0x6d5   : > { %v1720_v42 = vsel %vm1000_vm2, %v1712_v41, 0 }
 0x6d6   : > { %v2832_v40 = vpop.f32.mrf.mxu1 }
 0x6d7   : > { %1698 = vrot.lane.b32.xlu0 %v1679_v37, %s3358_s27 }
 0x729   : > { %v1529_v25 = vpop.xlane.xlu1 %1528 }
 0x72a   : > { %v1530_v26 = vmul.f32 0.03125, %v1529_v25 }
 0x72c   : > { %v1531_v27 = vadd.f32 1e-05, %v1530_v26 }
 0x72e   : > { %3055 = vrsqrt.f32 %v1531_v27 }
 0x73b   : > { %v3056_v28 = vpop.eup %3055 }
 0x73c   : > { %v1533_v30 = vmul.f32 %v3056_v28, %v1525_v17 }
 0x73e   : > { %v1541_v32 = vmul.f32 %v2658_v29, %v1533_v30 }
 0x740   : > { %v3862_v33 = vadd.f32 %v2659_v31, %v1541_v32 }
 0x742   : > { %v1550_v34 = vpack.c.bf16 %v3862_v33, %v3862_v33 }
 0x744   : > { %2822 = vmatmul.mubr.msk.bf16.vlgmr.msra.gmra.mxu0 %vm931_vm1, %v1550_v34 }
 0x745   : > { %2835 = vmatprep.mubr.msk.bf16.mxu0 %vm3355_vm0, %v3354_v0  ;;  %2834 = vmatpush3.bf16.xpose.msra.mxu0 %v1720_v42  ;;  %v1696_v43 = vpop.permute.xlu0 %1695 }
 0x746   : > { %2845 = vmatprep.subr.bf16.mxu0 %v3354_v0  ;;  %v3876_v44 = vpack.c.bf16 %v1696_v43, %v1696_v43 }
 0x748   : > { %v1766_v45 = vsel %vm1000_vm2, %v3876_v44, 0 }
 0x749   : > { %2840 = vmatpush3.bf16.xpose.msra.mxu1 %v1766_v45  ;;  %v1699_v47 = vpop.permute.xlu0 %1698 }
 0x74a   : > { %2851 = vmatprep.subr.bf16.mxu1 %v3354_v0  ;;  %v3884_v50 = vpack.c.bf16 %v1699_v47, %v1699_v47 }
 0x74c   : > { %v1812_v55 = vsel %vm1000_vm2, %v3884_v50, 0 }
 0x804   : > { %v1611_v48 = vpop.f32.mrf.mxu0 }
 0x805   : > { %v1612_v49 = vadd.f32 %v2660_v46, %v1611_v48 }
 0x806   : > { %v2823_v51 = vpop.f32.mrf.mxu0 }
 0x807   : > { %v1704_v52 = vmul.f32 0.35355338, %v1612_v49  ;;  %1685 = vrot.lane.b32.xlu1 %v1612_v49, %s3357_s30  ;;  %1688 = vrot.lane.b32.xlu0 %v1612_v49, %s3358_s27  ;;  %s4124_s27 = sld [smem:[#allocation40_spill]] }
 0x808   : > { %v1614_v53 = vpop.f32.mrf.mxu0 }
 0x809   : > { %v1708_v54 = vpack.c.bf16 %v1704_v52, %v1704_v52 }
 0x80a   : > { %v2824_v56 = vpop.f32.mrf.mxu0 }
 0x80b   : > { %1701 = vrot.lane.b32.xlu1 %v1679_v37, %s3356_s0  ;;  %2836 = vmatmul.mubr.msk.bf16.vlgmr.msra.gmra.mxu0 %vm1000_vm2, %v1708_v54 }
 0x80c   : > { %2846 = vmatpush3.bf16.xpose.msra.mxu0 %v1812_v55  ;;  %2847 = vmatprep.mubr.msk.bf16.mxu0 %vm3355_vm0, %v3354_v0 }
 0x80d   : > { %2857 = vmatprep.subr.bf16.mxu0 %v3354_v0 }
 0x80f   : > { %1691 = vrot.lane.b32.xlu1 %v1612_v49, %s3356_s0  ;;  %s4128_s0 = sld [smem:[#allocation43_spill]] }
 0x813   : > { %1941 = vrot.lane.b32.xlu1 %v1712_v41, %s3359_s8 }
 0x815   : > { %s2451_s30 = scalar_lea.hbm %s4128_s0, %s2695_s1 }
 0x879   : > { %v1686_v57 = vpop.permute.xlu1 %1685  ;;  %v1689_v58 = vpop.permute.xlu0 %1688 }
 0x87a   : > { %v1705_v59 = vmul.f32 0.35355338, %v1686_v57  ;;  %v1706_v60 = vmul.f32 0.35355338, %v1689_v58 }
 0x87c   : > { %v1709_v61 = vpack.c.bf16 %v1705_v59, %v1705_v59  ;;  %v1710_v62 = vpack.c.bf16 %v1706_v60, %v1706_v60 }
 0x87d   : > { %v1702_v63 = vpop.permute.xlu1 %1701 }
 0x87e   : > { %v1715_v1 = vpack.c.bf16 %v1702_v63, %v1702_v63  ;;  %2842 = vmatmul.mubr.msk.bf16.vlgmr.msra.gmra.mxu1 %vm1000_vm2, %v1709_v61  ;;  %2848 = vmatmul.mubr.msk.bf16.vlgmr.msra.gmra.mxu0 %vm1000_vm2, %v1710_v62 }
 0x87f   : > { %2853 = vmatprep.mubr.msk.bf16.mxu1 %vm3355_vm0, %v3354_v0  ;;  %2859 = vmatprep.mubr.msk.bf16.mxu0 %vm3355_vm0, %v3354_v0 }
 0x880   : > { %v1858_v2 = vsel %vm1000_vm2, %v1715_v1, 0 }
 0x881   : > { %v1692_v4 = vpop.permute.xlu1 %1691  ;;  %2852 = vmatpush3.bf16.xpose.msra.mxu1 %v1858_v2 }
 0x882   : > { %v1707_v5 = vmul.f32 0.35355338, %v1692_v4  ;;  %2863 = vmatprep.subr.bf16.mxu1 %v3354_v0 }
 0x884   : > { %v1711_v7 = vpack.c.bf16 %v1707_v5, %v1707_v5 }
 0x885   : > { %v1942_v6 = vpop.permute.xlu1 %1941 }
 0x886   : > { %v1947_v8 = vsel %vm1239_vm3, %v1942_v6, 0 }
 0x887   : > { %2858 = vmatpush3.bf16.msra.mxu0 %v1947_v8 }
 0x888   : > { %2854 = vmatmul.mubr.msk.bf16.vlgmr.msra.gmra.mxu1 %vm1000_vm2, %v1711_v7  ;;  %2869 = vmatprep.subr.bf16.mxu0 %v3354_v0 }
 0x889   : > { %2865 = vmatprep.mubr.msk.bf16.mxu1 %vm3355_vm0, %v3354_v0 }
 0x8cb   : > { %v1756_v13 = vpop.f32.mrf.mxu0 }
 0x8cc   : > { %v1757_v14 = vadd.f32 %v1756_v13, %v906_v12 }
 0x8cd   : > { %v2837_v15 = vpop.f32.mrf.mxu0 }
 0x8ce   : > { %v1900_v16 = vsel %vm1000_vm2, %v1757_v14, -inf  ;;  %v3032_v15 = vld [vmem:[#allocation11] sm:$0xff]  }
 0x8cf   : > { %1901 = vmax.xlane.f32.xlu0 %v1900_v16  ;;  %v1759_v17 = vpop.f32.mrf.mxu0 }
 0x8d1   : > { %v2838_v18 = vpop.f32.mrf.mxu0 }
 0x93e   : > { %v1802_v19 = vpop.f32.mrf.mxu1  ;;  %v1848_v20 = vpop.f32.mrf.mxu0 }
 0x93f   : > { %v1803_v3 = vadd.f32 %v1802_v19, %v906_v12  ;;  %v1849_v21 = vadd.f32 %v1848_v20, %v906_v12 }
 0x940   : > { %v2843_v22 = vpop.f32.mrf.mxu1  ;;  %v2849_v23 = vpop.f32.mrf.mxu0 }
 0x941   : > { %v1906_v24 = vsel %vm1000_vm2, %v1849_v21, -inf  ;;  %v1903_v25 = vsel %vm1000_vm2, %v1803_v3, -inf }
 0x942   : > { %1907 = vmax.xlane.f32.xlu0 %v1906_v24  ;;  %v1851_v26 = vpop.f32.mrf.mxu0  ;;  %1904 = vmax.xlane.f32.xlu1 %v1903_v25  ;;  %v1805_v27 = vpop.f32.mrf.mxu1 }
 0x944   : > { %v2844_v28 = vpop.f32.mrf.mxu1  ;;  %v2850_v29 = vpop.f32.mrf.mxu0 }
 0x948   : > { %v1894_v30 = vpop.f32.mrf.mxu1 }
 0x949   : > { %v1895_v31 = vadd.f32 %v1894_v30, %v906_v12 }
 0x94a   : > { %v2855_v32 = vpop.f32.mrf.mxu1 }
 0x94b   : > { %v1909_v34 = vsel %vm1000_vm2, %v1895_v31, -inf }
 0x94c   : > { %1910 = vmax.xlane.f32.xlu0 %v1909_v34  ;;  %v1897_v35 = vpop.f32.mrf.mxu1 }
 0x94e   : > { %v2856_v36 = vpop.f32.mrf.mxu1 }
 0x953   : > { %2039 = vrot.lane.b32.xlu1 %v3884_v50, %s3359_s8 }
 0x957   : > { %2088 = vrot.lane.b32.xlu1 %v1715_v1, %s3359_s8 }
 0x958   : > { %v1902_v37 = vpop.xlane.xlu0 %1901 }
 0x959   : > { %v1912_v38 = vsub.f32 %v1757_v14, %v1902_v37 }
 0x95b   : > { %v1916_v39 = vmul.f32 1.442695, %v1912_v38 }
 0x95d   : > { %3057 = vpow2.f32 %v1916_v39 }
 0x962   : > { %1990 = vrot.lane.b32.xlu0 %v3876_v44, %s3359_s8  ;;  %s2637_s8 = sshll.u32 %s3692_s15, 3 }
 0x963   : > { %s887_s14 = scalar_lea.vmem [#allocation14], %s2637_s8 }
 0x964   : > { %s2453_s7 = sshll.u32 %s887_s14, 4  ;;  %s2454_s7 = int_to_ptr.vmem [resolvable:$true] %s2453_s7 }
 0x96a   : > { %v3058_v40 = vpop.eup %3057 }
 0x96b   : > { %v1936_v41 = vpack.c.bf16 %v3058_v40, %v3058_v40  ;;  %v1924_v4 = vsel %vm1000_vm2, %v3058_v40, 0.0 }
 0x96d   : > { %2860 = vmatmul.mubr.msk.bf16.vlgmr.msra.gmra.mxu0 %vm1000_vm2, %v1936_v41 }
 0x96e   : > { %2871 = vmatprep.mubr.msk.bf16.mxu0 %vm3355_vm0, %v3354_v0 }
 0x9cb   : > { %v1908_v42 = vpop.xlane.xlu0 %1907  ;;  %v1905_v43 = vpop.xlane.xlu1 %1904 }
 0x9cc   : > { %v1914_v45 = vsub.f32 %v1849_v21, %v1908_v42  ;;  %v1913_v46 = vsub.f32 %v1803_v3, %v1905_v43  ;;  %v2676_v42 = vld [vmem:[%s4046_s13] ss:$0 sm:$0xff] }
 0x9ce   : > { %v1920_v47 = vmul.f32 1.442695, %v1914_v45  ;;  %v1918_v48 = vmul.f32 1.442695, %v1913_v46 }
 0x9cf   : > { %v2040_v49 = vpop.permute.xlu1 %2039 }
 0x9d0   : > { %3059 = vpow2.f32 %v1920_v47  ;;  %v2045_v50 = vsel %vm1239_vm3, %v2040_v49, 0 }
 0x9d1   : > { %3061 = vpow2.f32 %v1918_v48  ;;  %2870 = vmatpush3.bf16.msra.mxu0 %v2045_v50 }
 0x9d2   : > { %2881 = vmatprep.subr.bf16.mxu0 %v3354_v0 }
 0x9d3   : > { %v2089_v57 = vpop.permute.xlu1 %2088 }
 0x9d4   : > { %v2094_v62 = vsel %vm1239_vm3, %v2089_v57, 0  ;;  %v3036_v57 = vld [vmem:[%s4049_s16 + $0x10] sm:$0xff]  }
 0x9d5   : > { %v1911_v44 = vpop.xlane.xlu0 %1910 }
 0x9d6   : > { %v1915_v51 = vsub.f32 %v1895_v31, %v1911_v44 }
 0x9d8   : > { %v1922_v52 = vmul.f32 1.442695, %v1915_v51 }
 0x9d9   : > { %v1991_v53 = vpop.permute.xlu0 %1990 }
 0x9da   : > { %3063 = vpow2.f32 %v1922_v52  ;;  %v1996_v54 = vsel %vm1239_vm3, %v1991_v53, 0 }
 0x9db   : > { %2864 = vmatpush3.bf16.msra.mxu1 %v1996_v54 }
 0x9dc   : > { %2875 = vmatprep.subr.bf16.mxu1 %v3354_v0 }
 0x9dd   : > { %v3060_v55 = vpop.eup %3059 }
 0x9de   : > { %v3062_v56 = vpop.eup %3061  ;;  %v1930_v58 = vsel %vm1000_vm2, %v3060_v55, 0.0  ;;  %v1938_v59 = vpack.c.bf16 %v3060_v55, %v3060_v55  ;;  %v3033_v55 = vld [vmem:[#allocation13 + $0x8] sm:$0xff]  }
 0x9df   : > { %1931 = vadd.xlane.f32.xlu1 %v1930_v58  ;;  %v1927_v60 = vsel %vm1000_vm2, %v3062_v56, 0.0  ;;  %v1937_v61 = vpack.c.bf16 %v3062_v56, %v3062_v56  ;;  %v3034_v56 = vld [vmem:[#allocation13] sm:$0xff]  }
 0x9e0   : > { %1928 = vadd.xlane.f32.xlu0 %v1927_v60  ;;  %2872 = vmatmul.mubr.msk.bf16.vlgmr.msra.gmra.mxu0 %vm1000_vm2, %v1938_v59 }
 0x9e1   : > { %2866 = vmatmul.mubr.msk.bf16.vlgmr.msra.gmra.mxu1 %vm1000_vm2, %v1937_v61  ;;  %2885 = vmatprep.mubr.msk.bf16.mxu0 %vm3355_vm0, %v3354_v0 }
 0x9e2   : > { %2876 = vmatpush3.bf16.msra.mxu1 %v2094_v62  ;;  %2877 = vmatprep.mubr.msk.bf16.mxu1 %vm3355_vm0, %v3354_v0  ;;  %v2680_v62 = vld [vmem:[%s4053_s20] ss:$0 sm:$0xff] }
 0x9e3   : > { %2889 = vmatprep.subr.bf16.mxu1 %v3354_v0  ;;  %2882 = vmatpush3.bf16.msra.mxu0 %v3031_v11 }
 0x9e4   : > { %2883 = vmatprep.subr.bf16.mxu0 %v3354_v0 }
 0x9e7   : > { %v3064_v63 = vpop.eup %3063  ;;  %2884 = vmatpush3.bf16.msra.mxu0 %v3032_v15 }
 0x9e8   : > { %v1933_v1 = vsel %vm1000_vm2, %v3064_v63, 0.0  ;;  %v1939_v2 = vpack.c.bf16 %v3064_v63, %v3064_v63  ;;  %2897 = vmatprep.subr.bf16.mxu0 %v3354_v0 }
 0x9e9   : > { %1934 = vadd.xlane.f32.xlu0 %v1933_v1  ;;  %v2681_v1 = vld [vmem:[%s4054_s21] ss:$0 sm:$0xff] }
 0x9ea   : > { %2878 = vmatmul.mubr.msk.bf16.vlgmr.msra.gmra.mxu1 %vm1000_vm2, %v1939_v2 }
 0x9eb   : > { %2893 = vmatprep.mubr.msk.bf16.mxu1 %vm3355_vm0, %v3354_v0  ;;  %2890 = vmatpush3.bf16.msra.mxu1 %v3033_v55 }
 0x9ec   : > { %2891 = vmatprep.subr.bf16.mxu1 %v3354_v0 }
 0x9ed   : > { %1925 = vadd.xlane.f32.xlu0 %v1924_v4 }
 0x9ef   : > { %2892 = vmatpush3.bf16.msra.mxu1 %v3034_v56 }
 0xa2d   : > { %v1983_v5 = vpop.f32.mrf.mxu0 }
 0xa2f   : > { %v2861_v6 = vpop.f32.mrf.mxu0 }
 0xa30   : > { %v3037_v6 = vld [vmem:[%s4049_s16 + $0x8] sm:$0xff]  }
 0xa31   : > { %v1986_v7 = vpop.f32.mrf.mxu0 }
 0xa32   : > { %v3038_v7 = vld [vmem:[%s4049_s16] sm:$0xff]  }
 0xa33   : > { %v2862_v8 = vpop.f32.mrf.mxu0 }
 0xa34   : > { %v2682_v8 = vld [vmem:[%s4123_s23] ss:$0 sm:$0xff] }
 0xa68   : > { %v1932_v9 = vpop.xlane.xlu1 %1931 }
 0xa69   : > { %v1929_v10 = vpop.xlane.xlu0 %1928  ;;  %3065 = vrcp.f32 %v1932_v9 }
 0xa6a   : > { %3067 = vrcp.f32 %v1929_v10 }
 0xa72   : > { %v1935_v12 = vpop.xlane.xlu0 %1934 }
 0xa73   : > { %3069 = vrcp.f32 %v1935_v12 }
 0xa76   : > { %v3066_v13 = vpop.eup %3065  ;;  %v1926_v31 = vpop.xlane.xlu0 %1925 }
 0xa77   : > { %v3068_v16 = vpop.eup %3067  ;;  %3071 = vrcp.f32 %v1926_v31  ;;  %v2692_v31 = vld [vmem:[%s4126_s22] ss:$0 sm:$0xff] }
 0xa80   : > { %v3070_v25 = vpop.eup %3069 }
 0xa84   : > { %v3072_v32 = vpop.eup %3071 }
 0xa85   : > { %v2140_v35 = vmul.f32 %v3072_v32, %v1983_v5 }
 0xaa0   : > { %v2081_v14 = vpop.f32.mrf.mxu0 }
 0xaa1   : > { %v2032_v17 = vpop.f32.mrf.mxu1  ;;  %v2142_v18 = vmul.f32 %v3066_v13, %v2081_v14 }
 0xaa2   : > { %v2141_v19 = vmul.f32 %v3068_v16, %v2032_v17  ;;  %v2873_v20 = vpop.f32.mrf.mxu0 }
 0xaa3   : > { %v2867_v3 = vpop.f32.mrf.mxu1  ;;  %2149 = vrot.lane.b32.xlu0 %v2142_v18, %s3362_s5  ;;  %s3263_s5 = scalar_lea.vmem %s2454_s7, 128 }
 0xaa4   : > { %2145 = vrot.lane.b32.xlu1 %v2141_v19, %s3361_s12  ;;  %v2084_v21 = vpop.f32.mrf.mxu0  ;;  %s4125_s12 = sld [smem:[#allocation25_spill]]  ;;  %p3264_p13 = scmp.ne.s32.totalorder %s2454_s7, %s3263_s5 }
 0xaa5   : > { %v2035_v22 = vpop.f32.mrf.mxu1 }
 0xaa6   : > { %v2874_v23 = vpop.f32.mrf.mxu0 }
 0xaa7   : > { %v2868_v24 = vpop.f32.mrf.mxu1 }
 0xaaa   : > { %v2130_v26 = vpop.f32.mrf.mxu1  ;;  %p4129_p5 = scmp.ne.s32.totalorder %s4125_s12, 0 }
 0xaab   : > { %v2143_v27 = vmul.f32 %v3070_v25, %v2130_v26 }
 0xaac   : > { %v2879_v28 = vpop.f32.mrf.mxu1  ;;  %p3265_p9 = pnand %p3264_p13, %p4129_p5 }
 0xaad   : > { %2153 = vrot.lane.b32.xlu1 %v2143_v27, %s3363_s10  ;;  %s3364_s10 = smov [#allocation14]  }
 0xaae   : > { %v2133_v29 = vpop.f32.mrf.mxu1  ;;  %p3266_p1 = pneg %p3265_p9  ;;  %s3267_s22 = sshll.u32 %s3364_s10, 4  ;;  %s3268_s22 = int_to_ptr.vmem [resolvable:$false] %s3267_s22 }
 0xaaf   : > { %s3269_s29 = scalar_lea.vmem %s3268_s22, 256  ;;  %p3270_p3 = scmp.lt.s32.totalorder %s2454_s7, %s3268_s22 }
 0xab0   : > { %v2880_v30 = vpop.f32.mrf.mxu1  ;;  %p3271_p4 = scmp.lt.s32.totalorder %s3269_s29, %s3263_s5 }
 0xab2   : > { %p3272_p8 = por %p3271_p4, %p3270_p3 }
 0xab4   : > { %p3273_p7 = pnand %p3272_p8, %p3266_p1 }
 0xb15   : > { %v2150_v36 = vpop.permute.xlu0 %2149 }
 0xb16   : > { %v2146_v34 = vpop.permute.xlu1 %2145 }
 0xb17   : > { %v2156_v37 = vsel %vm1000_vm2, %v2140_v35, %v2146_v34  ;;  %v2693_v34 = vld [vmem:[%s4127_s17] ss:$0 sm:$0xff] }
 0xb18   : > { %v2157_v38 = vsel %vm1448_vm4, %v2156_v37, %v2150_v36 }
 0xb1f   : > { %v2154_v39 = vpop.permute.xlu1 %2153 }
 0xb20   : > { %v2158_v40 = vsel %vm1450_vm5, %v2157_v38, %v2154_v39 }
 0xb21   : > { %v2159_v41 = vpack.c.bf16 %v2158_v40, %v2158_v40 }
 0xb23   : > { %2886 = vmatmul.mubr.msk.bf16.vlgmr.msra.gmra.mxu0 %vm931_vm1, %v2159_v41 }
 0xb24   : > { %2905 = vmatprep.mubr.msk.bf16.mxu0 %vm3355_vm0, %v3354_v0 }
 0xbe3   : > { %v2220_v43 = vpop.f32.mrf.mxu0 }
 0xbe4   : > { %v2221_v45 = vadd.f32 %v2676_v42, %v2220_v43 }
 0xbe5   : > { %v2887_v46 = vpop.f32.mrf.mxu0 }
 0xbe6   : > { %v2226_v47 = vadd.f32 %v2221_v45, %v3862_v33  ;;  %v3035_v33 = vld [vmem:[%s4049_s16 + $0x18] sm:$0xff]  }
 0xbe7   : > { %v2223_v48 = vpop.f32.mrf.mxu0  ;;  %2898 = vmatpush3.bf16.msra.mxu0 %v3035_v33 }
 0xbe8   : > { %v2227_v49 = vsel %vm931_vm1, %v2226_v47, 0.0  ;;  %2899 = vmatprep.subr.bf16.mxu0 %v3354_v0 }
 0xbe9   : > { %2228 = vadd.xlane.f32.xlu1 %v2227_v49  ;;  %v2888_v50 = vpop.f32.mrf.mxu0 }
 0xbeb   : > { %2900 = vmatpush3.bf16.msra.mxu0 %v3036_v57 }
 0xbec   : > { %2901 = vmatprep.subr.bf16.mxu0 %v3354_v0 }
 0xbef   : > { %2902 = vmatpush3.bf16.msra.mxu0 %v3037_v6 }
 0xbf0   : > { %2903 = vmatprep.subr.bf16.mxu0 %v3354_v0  ;;  %v2686_v0 = vld [vmem:[%s4124_s27] ss:$0 sm:$0xff]  ;;  %s2440_s27 = scalar_lea.sflag [#allocation4], %s3692_s15 }
 0xbf3   : > { %2904 = vmatpush3.bf16.msra.mxu0 %v3038_v7 }
 0xc72   : > { %v2229_v44 = vpop.xlane.xlu1 %2228 }
 0xc73   : > { %v2230_v51 = vmul.f32 0.03125, %v2229_v44 }
 0xc75   : > { %v2231_v52 = vsub.f32 %v2226_v47, %v2230_v51 }
 0xc77   : > { %v2232_v53 = vmul.f32 %v2231_v52, %v2231_v52 }
 0xc79   : > { %v2233_v54 = vsel %vm931_vm1, %v2232_v53, 0.0 }
 0xc7a   : > { %2234 = vadd.xlane.f32.xlu0 %v2233_v54 }
 0xd03   : > { %v2235_v58 = vpop.xlane.xlu0 %2234 }
 0xd04   : > { %v2236_v59 = vmul.f32 0.03125, %v2235_v58 }
 0xd06   : > { %v2237_v60 = vadd.f32 1e-05, %v2236_v59 }
 0xd08   : > { %3073 = vrsqrt.f32 %v2237_v60 }
 0xd15   : > { %v3074_v61 = vpop.eup %3073 }
 0xd16   : > { %v2239_v63 = vmul.f32 %v3074_v61, %v2231_v52 }
 0xd18   : > { %v2247_v2 = vmul.f32 %v2680_v62, %v2239_v63 }
 0xd1a   : > { %v2255_v4 = vadd.f32 %v2681_v1, %v2247_v2 }
 0xd1c   : > { %v2256_v5 = vpack.c.bf16 %v2255_v4, %v2255_v4 }
 0xd1e   : > { %2894 = vmatmul.mubr.msk.bf16.vlgmr.msra.gmra.mxu1 %vm931_vm1, %v2256_v5 }
 0xdde   : > { %v2317_v9 = vpop.f32.mrf.mxu1 }
 0xddf   : > { %v2318_v10 = vadd.f32 %v2682_v8, %v2317_v9 }
 0xde0   : > { %v2895_v11 = vpop.f32.mrf.mxu1 }
 0xde1   : > { %v2323_v12 = vmax.f32 %v2318_v10, 0.0 }
 0xde2   : > { %v2320_v13 = vpop.f32.mrf.mxu1 }
 0xde3   : > { %v2324_v14 = vpack.c.bf16 %v2323_v12, %v2323_v12 }
 0xde4   : > { %v2896_v15 = vpop.f32.mrf.mxu1 }
 0xde5   : > { %2906 = vmatmul.mubr.msk.bf16.vlgmr.msra.gmra.mxu0 %vm2364_vm6, %v2324_v14 }
 0xea5   : > { %v2402_v16 = vpop.f32.mrf.mxu0 }
 0xea6   : > { %v2403_v17 = vadd.f32 %v2686_v0, %v2402_v16 }
 0xea7   : > { %v2907_v18 = vpop.f32.mrf.mxu0 }
 0xea8   : > { %v2408_v19 = vadd.f32 %v2403_v17, %v2255_v4 }
 0xea9   : > { %v2405_v20 = vpop.f32.mrf.mxu0 }
 0xeaa   : > { %v2409_v3 = vsel %vm931_vm1, %v2408_v19, 0.0 }
 0xeab   : > { %2410 = vadd.xlane.f32.xlu0 %v2409_v3  ;;  %v2908_v21 = vpop.f32.mrf.mxu0 }
 0xf34   : > { %v2411_v22 = vpop.xlane.xlu0 %2410 }
 0xf35   : > { %v2412_v23 = vmul.f32 0.03125, %v2411_v22 }
 0xf37   : > { %v2413_v24 = vsub.f32 %v2408_v19, %v2412_v23 }
 0xf39   : > { %v2414_v25 = vmul.f32 %v2413_v24, %v2413_v24 }
 0xf3b   : > { %v2415_v26 = vsel %vm931_vm1, %v2414_v25, 0.0 }
 0xf3c   : > { %2416 = vadd.xlane.f32.xlu1 %v2415_v26 }
 0xfc5   : > { %v2417_v27 = vpop.xlane.xlu1 %2416 }
 0xfc6   : > { %v2418_v28 = vmul.f32 0.03125, %v2417_v27 }
 0xfc8   : > { %v2419_v29 = vadd.f32 1e-05, %v2418_v28 }
 0xfca   : > { %3075 = vrsqrt.f32 %v2419_v29 }
 0xfd7   : > { %v3076_v30 = vpop.eup %3075 }
 0xfd8   : > { %v2421_v32 = vmul.f32 %v3076_v30, %v2413_v24 }
 0xfda   : > { %v2429_v35 = vmul.f32 %v2692_v31, %v2421_v32 }
 0xfdc   : > { %v2437_v36 = vadd.f32 %v2693_v34, %v2429_v35 }
 0xfde   : > { %2438 = vst.msk [vmem:[%s887_s14] sm:$0xff] %vm931_vm1, %v2437_v36 }
 0xfdf   : > { %3276 = shalt.err (!%p3273_p7)
}
 0xfe0   : > { %s3277_s8 = scalar_lea.hbm %s2451_s30, 128  ;;  %s3281_s24 = scalar_lea.hbm %s4128_s0, 256 }
 0xfe1   : > { %p3278_p12 = scmp.ne.s32.totalorder %s2451_s30, %s3277_s8  ;;  %p3282_p10 = scmp.lt.s32.totalorder %s2451_s30, %s4128_s0 }
 0xfe2   : > { %p3283_p11 = scmp.lt.s32.totalorder %s3281_s24, %s3277_s8 }
 0xfe3   : > { %p3279_p6 = pnand %p3278_p12, %p4129_p5 }
 0xfe4   : > { %p3284_p0 = por %p3283_p11, %p3282_p10 }
 0xfe5   : > { %p3280_p2 = pneg %p3279_p6 }
 0xfe7   : > { %p3285_p13 = pnand %p3284_p0, %p3280_p2 }
 0xfe9   : > { %3288 = shalt.err (!%p3285_p13)
}
 0xfea   : > { %2933 = dma.vmem_to_hbm [thread:$0]  (%p4129_p5), %s2454_s7, 128, %s2451_s30, %s2440_s27  }
 0xfeb PF: > { %s4130_s14 = sld [smem:[#allocation21_spill]]  ;;  %p4133_p1 = scmp.ge.s32.totalorder %s3343_s28, 2 }
 0xfec   : > { %s4131_s3 = sld [smem:[#allocation26_spill]] }
 0xff1   : > { %s2465_s23 = sand.u32 1, %s4130_s14  }
 0xff2   : > { %p4132_p9 = scmp.ne.s32.totalorder %s4131_s3, 0  ;;  %s2466_s5 = scalar_lea.sflag [#allocation4], %s2465_s23 }
 0xff4   : > { %p2959_p3 = pnand %p4133_p1, %p4132_p9 }
 0xff6   : > { %p2960_p4 = pneg %p2959_p3 }
 0xff8   : > { %3326 = dma.done.wait (%p2960_p4), %s2466_s5, 128  }
 0xff9   : > { %3328 = vsyncadd (%p2960_p4), %s2466_s5, 4294967168  ;;  %s4134_s28 = sld [smem:[#allocation23_spill]]  ;;  %s4137_s5 = smov %s3335_s26 }
 0xffa   : > { %s4135_s10 = sld [smem:[#allocation22_spill]] }
 0xffb   : > { %s4136_s27 = sld [smem:[#allocation24_spill]] }
 0xfff   : > { %p42_p8 = scmp.ge.s32.totalorder %s4134_s28, 4  }
0x1000   : > { %s4138_s26 = smov %s4135_s10 }
0x1001   :  { %44 = sbr.rel (!%p42_p8) target bundleno = 27 (0x1b), region = 200 }
0x1006   :  { %2471 = vsyncpa [#allocation3], 1 }
0x1007   :  { %2473 = vsyncpa [#allocation3 + $0x1], 1 }
0x1008   :  { %2474 = vsyncpa [#allocation6], 1 }
0x1009   :  { %2476 = vsyncpa [#allocation6 + $0x1], 1 }
0x100a   :  { %2477 = vsyncpa [#allocation9], 1 }
0x100b   :  { %2478 = vsyncpa [#allocation12], 1 }
0x100c   :  { %2479 = vsyncpa [#allocation4], 1 }
0x100d   :  { %2481 = vsyncpa [#allocation4 + $0x1], 1 }

</bundles_post_ra>
